<compile_context>
chip_gen: v7x
topology: tpu7x:2x2x1
jax: 0.10.0
libtpu: 0.0.40
codegen_flags: <defaults>
</compile_context>

<pallas_src>
import functools

import jax
import jax.numpy as jnp
from jax.experimental import pallas as pl
from jax.experimental.pallas import tpu as pltpu

_TM = 512                          # row tile
_TK = 1024                         # neighbor (reduction) tile; N padded to this
_RESIDENT_BYTES = 8 * 1024 * 1024  # budget for keeping X / HW2 fully in VMEM
_VMEM_LIMIT = 32 * 1024 * 1024


def _round_up(x, m):
    return (x + m - 1) // m * m


# ---------------------------------------------------------------------------
# Kernel 1 (layer 1, fully fused):
#   acc   += A[i, k-block] @ bf16(X[k-block] @ W1)          (k loop, f32 acc)
#   o_ref  = bf16( relu(acc + b1) @ W2 )                    (finalize only)
# ---------------------------------------------------------------------------
def layer1_kernel(a_ref, x_ref, w1_ref, b1_ref, w2_ref, o_ref, acc_ref,
                  *, tk, x_resident):
    k = pl.program_id(1)

    @pl.when(k == 0)
    def _():
        acc_ref[...] = jnp.zeros_like(acc_ref)

    if x_resident:
        start = pl.multiple_of(k * tk, tk)
        x_blk = x_ref[pl.ds(start, tk), :]
    else:
        x_blk = x_ref[...]

    # On-the-fly XW block (W1 is resident, ~32 KiB): removes the XW HBM stream.
    xw_blk = jnp.dot(
        x_blk, w1_ref[...], preferred_element_type=jnp.float32
    ).astype(jnp.bfloat16)
    acc_ref[...] += jnp.dot(
        a_ref[...], xw_blk, preferred_element_type=jnp.float32
    )

    @pl.when(k == pl.num_programs(1) - 1)
    def _():
        h = jnp.maximum(acc_ref[...] + b1_ref[...], 0.0).astype(jnp.bfloat16)
        # Dropout(p=0.6) is identity in inference mode (see TODO below).
        o_ref[...] = jnp.dot(
            h, w2_ref[...], preferred_element_type=jnp.float32
        ).astype(o_ref.dtype)


def gcn_layer1(a_p, x_p, w1_p, b1_p, w2_p, *, tm, tk):
    np_ = a_p.shape[0]
    fi = x_p.shape[1]
    fh = w1_p.shape[1]
    fo = w2_p.shape[1]

    x_resident = np_ * fi * 2 <= _RESIDENT_BYTES
    if x_resident:
        x_spec = pl.BlockSpec((np_, fi), lambda i, k: (0, 0))
    else:
        x_spec = pl.BlockSpec((tk, fi), lambda i, k: (k, 0))

    kernel = functools.partial(layer1_kernel, tk=tk, x_resident=x_resident)
    return pl.pallas_call(
        kernel,
        out_shape=jax.ShapeDtypeStruct((np_, fo), jnp.bfloat16),
        grid_spec=pltpu.PrefetchScalarGridSpec(
            num_scalar_prefetch=0,
            grid=(np_ // tm, np_ // tk),
            in_specs=[
                pl.BlockSpec((tm, tk), lambda i, k: (i, k)),   # A tile
                x_spec,                                        # X (resident/streamed)
                pl.BlockSpec((fi, fh), lambda i, k: (0, 0)),   # W1 (resident)
                pl.BlockSpec((1, fh), lambda i, k: (0, 0)),    # b1 (resident)
                pl.BlockSpec((fh, fo), lambda i, k: (0, 0)),   # W2 (resident)
            ],
            out_specs=pl.BlockSpec((tm, fo), lambda i, k: (i, 0)),
            scratch_shapes=[pltpu.VMEM((tm, fh), jnp.float32)],
        ),
        compiler_params=pltpu.CompilerParams(
            dimension_semantics=("parallel", "arbitrary"),
            vmem_limit_bytes=_VMEM_LIMIT,
        ),
        cost_estimate=pl.CostEstimate(
            flops=2 * np_ * np_ * fh + 2 * np_ * np_ * fi * fh // tm
            + 2 * np_ * fh * fo,
            transcendentals=0,
            bytes_accessed=np_ * np_ * 2 + np_ * fi * 2 + np_ * fo * 2
            + (fi * fh + fh * fo) * 2 + fh * 4,
        ),
    )(a_p, x_p, w1_p, b1_p, w2_p)


# ---------------------------------------------------------------------------
# Kernel 2 (layer 2 aggregation + masked log_softmax epilogue):
#   acc   += A[i, k-block] @ HW2[k-block]                    (k loop, f32 acc)
#   o_ref  = log_softmax(acc + b2)  over the first f_valid lanes (finalize)
# ---------------------------------------------------------------------------
def layer2_kernel(a_ref, h_ref, b2_ref, o_ref, acc_ref,
                  *, tk, f_valid, h_resident):
    k = pl.program_id(1)

    @pl.when(k == 0)
    def _():
        acc_ref[...] = jnp.zeros_like(acc_ref)

    if h_resident:
        start = pl.multiple_of(k * tk, tk)
        h_blk = h_ref[pl.ds(start, tk), :]
    else:
        h_blk = h_ref[...]

    acc_ref[...] += jnp.dot(
        a_ref[...], h_blk, preferred_element_type=jnp.float32
    )

    @pl.when(k == pl.num_programs(1) - 1)
    def _():
        logits = acc_ref[...] + b2_ref[...]           # f32, [tm, fo_p]
        col = jax.lax.broadcasted_iota(jnp.int32, logits.shape, 1)
        valid = col < f_valid
        z = jnp.where(valid, logits, jnp.float32(-1e30))
        m = jnp.max(z, axis=1, keepdims=True)
        zc = z - m
        lse = jnp.log(jnp.sum(jnp.exp(zc), axis=1, keepdims=True))
        o_ref[...] = jnp.where(valid, zc - lse, 0.0).astype(o_ref.dtype)


def gcn_layer2(a_p, hw2_p, b2_p, *, f_valid, tm, tk):
    np_ = a_p.shape[0]
    fo = hw2_p.shape[1]

    h_resident = np_ * fo * 2 <= _RESIDENT_BYTES
    if h_resident:
        h_spec = pl.BlockSpec((np_, fo), lambda i, k: (0, 0))
    else:
        h_spec = pl.BlockSpec((tk, fo), lambda i, k: (k, 0))

    kernel = functools.partial(
        layer2_kernel, tk=tk, f_valid=f_valid, h_resident=h_resident
    )
    return pl.pallas_call(
        kernel,
        out_shape=jax.ShapeDtypeStruct((np_, fo), jnp.float32),
        grid_spec=pltpu.PrefetchScalarGridSpec(
            num_scalar_prefetch=0,
            grid=(np_ // tm, np_ // tk),
            in_specs=[
                pl.BlockSpec((tm, tk), lambda i, k: (i, k)),   # A tile
                h_spec,                                        # HW2 (resident/streamed)
                pl.BlockSpec((1, fo), lambda i, k: (0, 0)),    # b2 (resident)
            ],
            out_specs=pl.BlockSpec((tm, fo), lambda i, k: (i, 0)),
            scratch_shapes=[pltpu.VMEM((tm, fo), jnp.float32)],
        ),
        compiler_params=pltpu.CompilerParams(
            dimension_semantics=("parallel", "arbitrary"),
            vmem_limit_bytes=_VMEM_LIMIT,
        ),
        cost_estimate=pl.CostEstimate(
            flops=2 * np_ * np_ * fo,
            transcendentals=np_ * (fo + 1),
            bytes_accessed=np_ * np_ * 2 + np_ * fo * 2 + np_ * fo * 4 + fo * 4,
        ),
    )(a_p, hw2_p, b2_p)


# ---------------------------------------------------------------------------
# Full forward:  log_softmax(A @ (relu(A @ (X@W1) + b1) @ W2) + b2)
# ---------------------------------------------------------------------------
def gcn_net(a_norm, x, w1, b1, w2, b2):
    n, f_in = x.shape
    f_hid = w1.shape[1]
    f_out = w2.shape[1]

    # Pad nodes to a multiple of the reduction tile (so tm=512/tk=1024 always
    # divide evenly -> no 128-tile fallback), features to lane-dense 128.
    np_ = _round_up(n, _TK)
    fi_p = _round_up(f_in, 128)
    fh_p = _round_up(f_hid, 128)
    fo_p = _round_up(f_out, 128)
    tm, tk = _TM, _TK

    def pad2(arr, r, c):
        return jnp.pad(arr, ((0, r - arr.shape[0]), (0, c - arr.shape[1])))

    a_p = pad2(a_norm, np_, np_).astype(jnp.bfloat16)
    x_p = pad2(x, np_, fi_p).astype(jnp.bfloat16)
    w1_p = pad2(w1, fi_p, fh_p).astype(jnp.bfloat16)
    w2_p = pad2(w2, fh_p, fo_p).astype(jnp.bfloat16)
    b1_p = pad2(b1.reshape(1, -1), 1, fh_p).astype(jnp.float32)
    b2_p = pad2(b2.reshape(1, -1), 1, fo_p).astype(jnp.float32)

    # Layer 1 (fused): HW2 = relu(A @ (X @ W1) + b1) @ W2   (bf16 output)
    # Dropout(p=0.6) between the layers is inference-mode identity.
    # TODO(synk): training-mode dropout (pltpu.prng_seed + prng_random_bits
    # mask with 1/(1-p) rescale, applied to H before the fused @W2).
    hw2 = gcn_layer1(a_p, x_p, w1_p, b1_p, w2_p, tm=tm, tk=tk)

    # Layer 2: out = log_softmax(A @ HW2 + b2) over the valid feature lanes.
    out_p = gcn_layer2(a_p, hw2, b2_p, f_valid=f_out, tm=tm, tk=tk)

    return out_p[:n, :f_out]


# ---------------------------------------------------------------------------
# Glue: dense D^-1/2 (A + I) D^-1/2 (PyG gcn_norm) and glorot init.
# ---------------------------------------------------------------------------
def build_norm_adj(edge_index, num_nodes):
    src = edge_index[0]
    dst = edge_index[1]
    loop = jnp.arange(num_nodes, dtype=edge_index.dtype)
    src = jnp.concatenate([src, loop])
    dst = jnp.concatenate([dst, loop])
    a = jnp.zeros((num_nodes, num_nodes), jnp.float32).at[dst, src].add(1.0)
    deg = a.sum(axis=1)
    d_inv_sqrt = jnp.where(deg > 0, 1.0 / jnp.sqrt(deg), 0.0)
    return d_inv_sqrt[:, None] * a * d_inv_sqrt[None, :]


def glorot(key, shape):
    limit = (6.0 / (shape[0] + shape[1])) ** 0.5
    return jax.random.uniform(key, shape, jnp.float32, -limit, limit)


if __name__ == "__main__":
    # Shapes implied by the module: x = ones((2, 4)), GCNConv(4, 4) x2,
    # edge_index = [[0], [1]]  (one directed edge 0 -> 1).
    N, F_IN, F_HID, F_OUT = 2, 4, 4, 4

    key = jax.random.PRNGKey(0)
    k1, k2 = jax.random.split(key)

    x = jnp.ones((N, F_IN), dtype=jnp.float32)
    edge_index = jnp.array([[0], [1]], dtype=jnp.int32)
    a_norm = build_norm_adj(edge_index, N)

    w1 = glorot(k1, (F_IN, F_HID))
    b1 = jnp.zeros((F_HID,), jnp.float32)
    w2 = glorot(k2, (F_HID, F_OUT))
    b2 = jnp.zeros((F_OUT,), jnp.float32)

    out = jax.block_until_ready(gcn_net(a_norm, x, w1, b1, w2, b2))

    # Reference mirroring the kernel's bf16-operand / f32-accumulate numerics.
    def bf(a):
        return a.astype(jnp.bfloat16).astype(jnp.float32)

    xw1_r = bf(bf(x) @ bf(w1))
    h_r = bf(jnp.maximum(bf(a_norm) @ xw1_r + b1, 0.0))
    hw2_r = bf(h_r @ bf(w2))
    logits_r = bf(a_norm) @ hw2_r + b2
    ref = jax.nn.log_softmax(logits_r, axis=1)

    # Pure-f32 reference for semantic sanity (loose tol for bf16 operands).
    h32 = jnp.maximum(a_norm @ (x @ w1) + b1, 0.0)
    ref32 = jax.nn.log_softmax(a_norm @ (h32 @ w2) + b2, axis=1)

    assert out.shape == (N, F_OUT)
    assert jnp.allclose(out, ref, atol=1e-4, rtol=1e-4), (out, ref)
    assert jnp.allclose(out, ref32, atol=5e-2, rtol=5e-2), (out, ref32)
    print("KERNEL_OK")
</pallas_src>

<mosaic_0001>
module attributes {stable_mosaic.version = 11 : i64} {
  func.func @layer1_kernel(%arg0: i32, %arg1: i32, %arg2: memref<512x1024xbf16, #tpu.memory_space<vmem>>, %arg3: memref<1024x128xbf16, #tpu.memory_space<vmem>>, %arg4: memref<128x128xbf16, #tpu.memory_space<vmem>>, %arg5: memref<1x128xf32, #tpu.memory_space<vmem>>, %arg6: memref<128x128xbf16, #tpu.memory_space<vmem>>, %arg7: memref<512x128xbf16, #tpu.memory_space<vmem>>, %arg8: memref<512x128xf32, #tpu.memory_space<vmem>>) attributes {dimension_semantics = [#tpu.dimension_semantics<parallel>, #tpu.dimension_semantics<arbitrary>], iteration_bounds = array<i64: 2, 1>, scalar_prefetch = 0 : i64, scratch_operands = 1 : i64, tpu.core_type = #tpu.core_type<tc>, window_params = [{transform_indices = @transform_0, window_bounds = array<i64: 512, 1024>}, {pipeline_mode = #tpu.pipeline_mode<synchronous>, transform_indices = @transform_1, window_bounds = array<i64: 1024, 128>}, {pipeline_mode = #tpu.pipeline_mode<synchronous>, transform_indices = @transform_2, window_bounds = array<i64: 128, 128>}, {pipeline_mode = #tpu.pipeline_mode<synchronous>, transform_indices = @transform_3, window_bounds = array<i64: 1, 128>}, {pipeline_mode = #tpu.pipeline_mode<synchronous>, transform_indices = @transform_4, window_bounds = array<i64: 128, 128>}, {transform_indices = @transform_5, window_bounds = array<i64: 512, 128>}]} {
    %c0_i32 = arith.constant 0 : i32
    %0 = arith.cmpi eq, %arg1, %c0_i32 : i32
    %1 = arith.extui %0 : i1 to i32
    %c0_i32_0 = arith.constant 0 : i32
    %2 = arith.cmpi ne, %1, %c0_i32_0 : i32
    scf.if %2 {
      %cst_12 = arith.constant 0.000000e+00 : f32
      %18 = vector.broadcast %cst_12 : f32 to vector<512x128xf32>
      %c0_13 = arith.constant 0 : index
      %c0_14 = arith.constant 0 : index
      %19 = vector.load %arg8[%c0_13, %c0_14] : memref<512x128xf32, #tpu.memory_space<vmem>>, vector<512x128xf32>
      tpu.vector_store %arg8[%c0_13, %c0_14], %18 {strides = array<i32>} : memref<512x128xf32, #tpu.memory_space<vmem>>, vector<512x128xf32>,
    } else {
    }
    %c1024_i32 = arith.constant 1024 : i32
    %3 = arith.muli %arg1, %c1024_i32 : i32
    %4 = tpu.assume_multiple %3, 1024 : i32
    %5 = arith.index_cast %4 : i32 to index
    %c0 = arith.constant 0 : index
    %6 = vector.load %arg3[%5, %c0] : memref<1024x128xbf16, #tpu.memory_space<vmem>>, vector<1024x128xbf16>
    %c0_1 = arith.constant 0 : index
    %c0_2 = arith.constant 0 : index
    %7 = vector.load %arg4[%c0_1, %c0_2] : memref<128x128xbf16, #tpu.memory_space<vmem>>, vector<128x128xbf16>
    %cst = arith.constant dense<0.000000e+00> : vector<1024x128xf32>
    %8 = tpu.matmul %6, %7, %cst {dimension_numbers = #tpu.dot_dimension_numbers<[1], [0], [0], [1], [0, 0, 1, 1], [], []>} : vector<1024x128xbf16>, vector<128x128xbf16>, vector<1024x128xf32> -> vector<1024x128xf32>
    %9 = arith.truncf %8 : vector<1024x128xf32> to vector<1024x128xbf16>
    %c0_3 = arith.constant 0 : index
    %c0_4 = arith.constant 0 : index
    %10 = vector.load %arg8[%c0_3, %c0_4] : memref<512x128xf32, #tpu.memory_space<vmem>>, vector<512x128xf32>
    %c0_5 = arith.constant 0 : index
    %c0_6 = arith.constant 0 : index
    %11 = vector.load %arg2[%c0_5, %c0_6] : memref<512x1024xbf16, #tpu.memory_space<vmem>>, vector<512x1024xbf16>
    %cst_7 = arith.constant dense<0.000000e+00> : vector<512x128xf32>
    %12 = tpu.matmul %11, %9, %cst_7 {dimension_numbers = #tpu.dot_dimension_numbers<[1], [0], [0], [1], [0, 0, 1, 1], [], []>} : vector<512x1024xbf16>, vector<1024x128xbf16>, vector<512x128xf32> -> vector<512x128xf32>
    %13 = arith.addf %10, %12 : vector<512x128xf32>
    %c0_8 = arith.constant 0 : index
    %c0_9 = arith.constant 0 : index
    %14 = vector.load %arg8[%c0_8, %c0_9] : memref<512x128xf32, #tpu.memory_space<vmem>>, vector<512x128xf32>
    tpu.vector_store %arg8[%c0_8, %c0_9], %13 {strides = array<i32>} : memref<512x128xf32, #tpu.memory_space<vmem>>, vector<512x128xf32>,
    %c0_i32_10 = arith.constant 0 : i32
    %15 = arith.cmpi eq, %arg1, %c0_i32_10 : i32
    %16 = arith.extui %15 : i1 to i32
    %c0_i32_11 = arith.constant 0 : i32
    %17 = arith.cmpi ne, %16, %c0_i32_11 : i32
    scf.if %17 {
      %c0_12 = arith.constant 0 : index
      %c0_13 = arith.constant 0 : index
      %18 = vector.load %arg8[%c0_12, %c0_13] : memref<512x128xf32, #tpu.memory_space<vmem>>, vector<512x128xf32>
      %c0_14 = arith.constant 0 : index
      %c0_15 = arith.constant 0 : index
      %19 = vector.load %arg5[%c0_14, %c0_15] : memref<1x128xf32, #tpu.memory_space<vmem>>, vector<1x128xf32>
      %20 = vector.broadcast %19 : vector<1x128xf32> to vector<512x128xf32>
      %21 = arith.addf %18, %20 : vector<512x128xf32>
      %cst_16 = arith.constant 0.000000e+00 : f32
      %22 = vector.broadcast %cst_16 : f32 to vector<512x128xf32>
      %23 = arith.maximumf %21, %22 : vector<512x128xf32>
      %24 = arith.truncf %23 : vector<512x128xf32> to vector<512x128xbf16>
      %c0_17 = arith.constant 0 : index
      %c0_18 = arith.constant 0 : index
      %25 = vector.load %arg6[%c0_17, %c0_18] : memref<128x128xbf16, #tpu.memory_space<vmem>>, vector<128x128xbf16>
      %cst_19 = arith.constant dense<0.000000e+00> : vector<512x128xf32>
      %26 = tpu.matmul %24, %25, %cst_19 {dimension_numbers = #tpu.dot_dimension_numbers<[1], [0], [0], [1], [0, 0, 1, 1], [], []>} : vector<512x128xbf16>, vector<128x128xbf16>, vector<512x128xf32> -> vector<512x128xf32>
      %27 = arith.truncf %26 : vector<512x128xf32> to vector<512x128xbf16>
      %c0_20 = arith.constant 0 : index
      %c0_21 = arith.constant 0 : index
      %28 = vector.load %arg7[%c0_20, %c0_21] : memref<512x128xbf16, #tpu.memory_space<vmem>>, vector<512x128xbf16>
      tpu.vector_store %arg7[%c0_20, %c0_21], %27 {strides = array<i32>} : memref<512x128xbf16, #tpu.memory_space<vmem>>, vector<512x128xbf16>,
    } else {
    }
    return
  }
  func.func @transform_0(%arg0: i32, %arg1: i32) -> (i32, i32) {
    %c0_i32 = arith.constant 0 : i32
    return %arg0, %arg1 : i32, i32
  }
  func.func @transform_1(%arg0: i32, %arg1: i32) -> (i32, i32) {
    %c0_i32 = arith.constant 0 : i32
    %c0_i32_0 = arith.constant 0 : i32
    %c0_i32_1 = arith.constant 0 : i32
    return %c0_i32, %c0_i32_0 : i32, i32
  }
  func.func @transform_2(%arg0: i32, %arg1: i32) -> (i32, i32) {
    %c0_i32 = arith.constant 0 : i32
    %c0_i32_0 = arith.constant 0 : i32
    %c0_i32_1 = arith.constant 0 : i32
    return %c0_i32, %c0_i32_0 : i32, i32
  }
  func.func @transform_3(%arg0: i32, %arg1: i32) -> (i32, i32) {
    %c0_i32 = arith.constant 0 : i32
    %c0_i32_0 = arith.constant 0 : i32
    %c0_i32_1 = arith.constant 0 : i32
    return %c0_i32, %c0_i32_0 : i32, i32
  }
  func.func @transform_4(%arg0: i32, %arg1: i32) -> (i32, i32) {
    %c0_i32 = arith.constant 0 : i32
    %c0_i32_0 = arith.constant 0 : i32
    %c0_i32_1 = arith.constant 0 : i32
    return %c0_i32, %c0_i32_0 : i32, i32
  }
  func.func @transform_5(%arg0: i32, %arg1: i32) -> (i32, i32) {
    %c0_i32 = arith.constant 0 : i32
    %c0_i32_0 = arith.constant 0 : i32
    return %arg0, %c0_i32 : i32, i32
  }
}

</mosaic_0001>

<bundles_post_ra>
// kernel: tpu_custom_call.1
= control target key start
LH: loop header
LB: loop body
LE: loop exit
PB: predicated region body
PF: predicated region fallthrough
CT: control target
= control target key end

     0   :  { %10 = vsyncpa [#allocation4], 0  ;;  %s8334_s0 = inlined_call_operand.hbm [shape: bf16[1024,1024], index: 0, kind: input, shape index: {}]   ;;  %s8335_s1 = inlined_call_operand.hbm [shape: bf16[1024,128], index: 1, kind: input, shape index: {}]   ;;  %s8336_s2 = inlined_call_operand.hbm [shape: bf16[128,128], index: 2, kind: input, shape index: {}]   ;;  %s8337_s3 = inlined_call_operand.hbm [shape: f32[1,128], index: 3, kind: input, shape index: {}]   ;;  %s8338_s4 = inlined_call_operand.hbm [shape: bf16[128,128], index: 4, kind: input, shape index: {}]   ;;  %s8339_s5 = inlined_call_operand.hbm [shape: bf16[1024,128], index: 5, kind: output, shape index: {}]  }
   0x1   :  { %12 = vsyncpa [#allocation4 + $0x1], 0 }
   0x2   :  { %13 = vsyncpa [#allocation7], 0 }
   0x3   :  { %14 = vsyncpa [#allocation10], 0 }
   0x4   :  { %15 = vsyncpa [#allocation5], 0 }
   0x5   :  { %17 = vsyncpa [#allocation5 + $0x1], 0  ;;  %s7010_s18 = smov 0   ;;  %s7012_s19 = smov 0  }
   0x6   :  { %s7014_s20 = smov 0   ;;  %s7016_s21 = smov 0  }
   0x7   :  { %s7018_s22 = smov 0   ;;  %s7020_s23 = smov 0  }
   0x8 LB: > { %8346 = sst [smem:[#allocation17_spill]] %s6945_s18  ;;  %s5507_s24 = sadd.s32 4294967295, %s6965_s23   ;;  %s6965_s23 = sphi %s7020_s23, %s23_s23   ;;  %s6961_s22 = sphi %s7018_s22, %s8413_s22   ;;  %s6957_s21 = sphi %s7016_s21, %s8412_s21   ;;  %s6953_s20 = sphi %s7014_s20, %s8411_s20   ;;  %s6949_s19 = sphi %s7012_s19, %s8410_s19   ;;  %s6945_s18 = sphi %s7010_s18, %s8409_s18  }
   0x9   : > { %s5508_s25 = sadd.s32 4294967294, %s6965_s23   ;;  %p57_p0 = scmp.ne.s32.totalorder %s6949_s19, %s6945_s18 }
   0xa   : > { %p7044_p1 = scmp.eq.s32.totalorder %s5507_s24, 0  ;;  %p7048_p2 = scmp.eq.s32.totalorder %s5507_s24, 1 }
   0xb   : > { %p171_p3 = scmp.eq.s32.totalorder %s5508_s25, 1  ;;  %p5509_p5 = scmp.ge.s32.totalorder %s6965_s23, 1 }
   0xc   : > { %s8347_s26 = scalar_select %p7044_p1, 1, 0 }
   0xd   : > { %s8348_s27 = scalar_select %p7048_p2, 1, 0 }
   0xe   : > { %p7054_p4 = por %p7044_p1, %p57_p0  ;;  %p7059_p6 = por %p171_p3, %p57_p0 }
   0xf   : > { %p178_p7 = scmp.lt.s32.totalorder %s6965_s23, 3  ;;  %s6967_s6 = smov [#allocation6]  }
  0x10   : > { %s8349_s28 = scalar_select %p7054_p4, 1, 0 }
  0x11   : > { %s8350_s29 = scalar_select %p7059_p6, 1, 0 }
  0x12   : > { %p7064_p8 = pnand %p5509_p5, %p178_p7  ;;  %s190_s7 = sshll.u32 %s6967_s6, 4  ;;  %s7068_s7 = int_to_ptr.vmem [resolvable:$true] %s190_s7 }
  0x13   : > { %8351 = sst [smem:[#allocation18_spill]] %s8350_s29  ;;  %s6968_s9 = smov [#allocation9]  }
  0x14   : > { %s8352_s30 = scalar_select %p7064_p8, 1, 0 }
  0x15   : > { %p6562_p9 = pneg %p7064_p8  ;;  %s217_s10 = sshll.u32 %s6968_s9, 4  ;;  %s7079_s10 = int_to_ptr.vmem [resolvable:$true] %s217_s10 }
  0x16   : > { %s6969_s11 = smov [#allocation8]   ;;  %s6733_s15 = scalar_lea.hbm %s8335_s1, 8192 }
  0x17   : > { %p7075_p11 = pnand %p6562_p9, %p7044_p1  ;;  %s7081_s12 = sshll.u32 %s6969_s11, 4  ;;  %s204_s12 = int_to_ptr.vmem [resolvable:$true] %s7081_s12 }
  0x18   : > { %p6734_p12 = scmp.ne.s32.totalorder %s8335_s1, %s6733_s15  ;;  %p6740_p5 = scmp.lt.u32.totalorder %s6733_s15, %s8335_s1 }
  0x19   : > { %p7091_p13 = pneg %p7075_p11 }
  0x1b   : > { %p6736_p0 = pnand %p7091_p13, %p6734_p12 }
  0x1d   : > { %p6737_p3 = pneg %p6736_p0 }
  0x1f   : > { %p6742_p7 = pnand %p6740_p5, %p6737_p3 }
  0x21   : > { %6745 = shalt.err (!%p6742_p7)
}
  0x22   : > { %s6746_s9 = scalar_lea.vmem %s7068_s7, 8192  ;;  %p6754_p1 = scmp.lt.s32.totalorder %s7068_s7, %s7068_s7 }
  0x23   : > { %p6747_p9 = scmp.ne.s32.totalorder %s7068_s7, %s6746_s9  ;;  %p6755_p4 = scmp.lt.s32.totalorder %s6746_s9, %s6746_s9 }
  0x25   : > { %p6749_p10 = pnand %p6747_p9, %p7091_p13  ;;  %p6756_p12 = por %p6755_p4, %p6754_p1 }
  0x27   : > { %p6750_p6 = pneg %p6749_p10 }
  0x29   : > { %p6757_p0 = pnand %p6756_p12, %p6750_p6 }
  0x2b   : > { %6760 = shalt.err (!%p6757_p0)
}
  0x2c   : > { %s6970_s11 = smov 64   ;;  %s6971_s13 = smov 4  }
  0x2d   : > { %6565 = dma.hbm_to_vmem [thread:$0]  (!%p7075_p11), %s8335_s1, 8192, %s7068_s7, [#allocation7], %s6970_s11, %s6970_s11, %s6971_s13  }
  0x2e   : > { %s6761_s25 = scalar_lea.hbm %s8337_s3, 16 }
  0x2f   : > { %p6762_p1 = scmp.ne.s32.totalorder %s8337_s3, %s6761_s25  ;;  %p6768_p10 = scmp.lt.u32.totalorder %s6761_s25, %s8337_s3 }
  0x31   : > { %p6764_p4 = pnand %p6762_p1, %p7091_p13 }
  0x33   : > { %p6765_p6 = pneg %p6764_p4 }
  0x35   : > { %p6770_p3 = pnand %p6768_p10, %p6765_p6 }
  0x37   : > { %6773 = shalt.err (!%p6770_p3)
}
  0x38   : > { %s6774_s7 = scalar_lea.vmem %s7079_s10, 16  ;;  %s6781_s14 = scalar_lea.vmem %s7079_s10, 32 }
  0x39   : > { %p6775_p5 = scmp.ne.s32.totalorder %s7079_s10, %s6774_s7  ;;  %p6782_p12 = scmp.lt.s32.totalorder %s7079_s10, %s7079_s10 }
  0x3a   : > { %p6783_p0 = scmp.lt.s32.totalorder %s6781_s14, %s6774_s7 }
  0x3b   : > { %p6777_p7 = pnand %p6775_p5, %p7091_p13 }
  0x3c   : > { %p6784_p1 = por %p6783_p0, %p6782_p12 }
  0x3d   : > { %p6778_p9 = pneg %p6777_p7 }
  0x3f   : > { %p6785_p4 = pnand %p6784_p1, %p6778_p9 }
  0x41   : > { %6788 = shalt.err (!%p6785_p4)
}
  0x42   : > { %6571 = dma.hbm_to_vmem [thread:$0]  (!%p7075_p11), %s8337_s3, 16, %s7079_s10, [#allocation10]  }
  0x43   : > { %s6789_s17 = scalar_lea.hbm %s8336_s2, 1024 }
  0x44   : > { %p6790_p6 = scmp.ne.s32.totalorder %s8336_s2, %s6789_s17  ;;  %p6796_p5 = scmp.lt.u32.totalorder %s6789_s17, %s8336_s2 }
  0x46   : > { %p6792_p10 = pnand %p6790_p6, %p7091_p13 }
  0x48   : > { %p6793_p3 = pneg %p6792_p10 }
  0x4a   : > { %p6798_p7 = pnand %p6796_p5, %p6793_p3 }
  0x4c   : > { %6801 = shalt.err (!%p6798_p7)
}
  0x4d   : > { %s6802_s14 = scalar_lea.vmem %s204_s12, 1024  ;;  %p6810_p1 = scmp.lt.s32.totalorder %s204_s12, %s204_s12 }
  0x4e   : > { %p6803_p9 = scmp.ne.s32.totalorder %s204_s12, %s6802_s14  ;;  %p6811_p4 = scmp.lt.s32.totalorder %s6802_s14, %s6802_s14 }
  0x50   : > { %p6805_p12 = pnand %p6803_p9, %p7091_p13  ;;  %p6812_p8 = por %p6811_p4, %p6810_p1 }
  0x52   : > { %p6806_p0 = pneg %p6805_p12 }
  0x54   : > { %p6813_p2 = pnand %p6812_p8, %p6806_p0 }
  0x56   : > { %6816 = shalt.err (!%p6813_p2)
}
  0x57   : > { %6568 = dma.hbm_to_vmem [thread:$0]  (!%p7075_p11), %s8336_s2, 1024, %s204_s12, [#allocation7], %s6970_s11, %s6970_s11, %s6971_s13  }
  0x58   : > { %s6972_s29 = smov [#allocation11]   ;;  %s6817_s25 = scalar_lea.hbm %s8338_s4, 1024 }
  0x59   : > { %s227_s15 = sshll.u32 %s6972_s29, 4  ;;  %p6818_p2 = scmp.ne.s32.totalorder %s8338_s4, %s6817_s25  ;;  %s228_s15 = int_to_ptr.vmem [resolvable:$true] %s227_s15 }
  0x5a   : > { %p6824_p10 = scmp.lt.u32.totalorder %s6817_s25, %s8338_s4 }
  0x5b   : > { %p6820_p8 = pnand %p6818_p2, %p7091_p13 }
  0x5d   : > { %p6821_p6 = pneg %p6820_p8 }
  0x5f   : > { %p6826_p3 = pnand %p6824_p10, %p6821_p6 }
  0x61   : > { %6829 = shalt.err (!%p6826_p3)
}
  0x62   : > { %s6830_s12 = scalar_lea.vmem %s228_s15, 1024  ;;  %p6838_p12 = scmp.lt.s32.totalorder %s228_s15, %s228_s15 }
  0x63   : > { %p6831_p5 = scmp.ne.s32.totalorder %s228_s15, %s6830_s12  ;;  %p6839_p0 = scmp.lt.s32.totalorder %s6830_s12, %s6830_s12 }
  0x65   : > { %p6833_p7 = pnand %p6831_p5, %p7091_p13  ;;  %p6840_p1 = por %p6839_p0, %p6838_p12 }
  0x67   : > { %p6834_p9 = pneg %p6833_p7 }
  0x69   : > { %p6841_p4 = pnand %p6840_p1, %p6834_p9 }
  0x6b   : > { %6844 = shalt.err (!%p6841_p4)
}
  0x6c   : > { %6574 = dma.hbm_to_vmem [thread:$0]  (!%p7075_p11), %s8338_s4, 1024, %s228_s15, [#allocation10], %s6970_s11, %s6970_s11, %s6971_s13  }
  0x6d   : > { %s35_s24 = sadd.s32 1, %s6961_s22  ;;  %s44_s8 = sadd.s32 1, %s6953_s20 }
  0x6e   : > { %p37_p13 = scmp.ge.s32.totalorder %s35_s24, 2  ;;  %p51_p2 = scmp.ne.s32.totalorder %s6953_s20, %s6949_s19 }
  0x6f   : > { %p52_p8 = scmp.eq.s32.totalorder %s6965_s23, 0  ;;  %p6587_p6 = scmp.lt.s32.totalorder %s6965_s23, 2 }
  0x70   : > { %s8415_s24 = smov (%p37_p13, %s35_s24), 0  ;;  %p8355_p3 = scmp.ne.s32.totalorder %s8348_s27, 0 }
  0x71   : > { %p53_p10 = por %p52_p8, %p51_p2  ;;  %s39_s16 = ssub.s32 %s6961_s22, %s8415_s24 }
  0x72   : > { %p7192_p5 = por %p8355_p3, %p51_p2  ;;  %s241_s17 = sand.u32 1, %s6953_s20  }
  0x73   : > { %p42_p7 = scmp.eq.s32.totalorder %s39_s16, 0  ;;  %s5515_s11 = sshll.u32 %s241_s17, 11 }
  0x74   : > { %s5933_s13 = sshll.u32 %s6961_s22, 15  ;;  %s245_s27 = scalar_lea.vmem [#allocation3], %s5515_s11 }
  0x75   : > { %s7201_s15 = scalar_select %p42_p7, %s6953_s20, %s44_s8  }
  0x76   : > { %s7206_s9 = scalar_lea.hbm %s8334_s0, %s5933_s13  ;;  %s255_s7 = sshll.u32 %s245_s27, 4  ;;  %s7214_s7 = int_to_ptr.vmem [resolvable:$true] %s255_s7 }
  0x77   : > { %p7210_p11 = pnand %p6587_p6, %p53_p10  ;;  %s7216_s12 = scalar_lea.sflag [#allocation4], %s241_s17 }
  0x78   : > { %s6845_s10 = scalar_lea.hbm %s7206_s9, 32768  ;;  %s6850_s16 = scalar_lea.hbm %s8334_s0, 65536 }
  0x79   : > { %p6846_p9 = scmp.ne.s32.totalorder %s7206_s9, %s6845_s10  ;;  %p6847_p12 = pneg %p7210_p11 }
  0x7a   : > { %p6851_p4 = scmp.lt.u32.totalorder %s7206_s9, %s8334_s0  ;;  %p6852_p13 = scmp.lt.u32.totalorder %s6850_s16, %s6845_s10 }
  0x7b   : > { %p6848_p0 = pnand %p6847_p12, %p6846_p9  ;;  %p6854_p8 = scmp.lt.u32.totalorder %s6845_s10, %s7206_s9 }
  0x7c   : > { %p6853_p2 = por %p6852_p13, %p6851_p4 }
  0x7d   : > { %p6849_p1 = pneg %p6848_p0 }
  0x7e   : > { %p6855_p6 = por %p6854_p8, %p6853_p2 }
  0x80   : > { %p6856_p10 = pnand %p6855_p6, %p6849_p1 }
  0x82   : > { %6859 = shalt.err (!%p6856_p10)
}
  0x83   : > { %s6860_s17 = scalar_lea.vmem %s7214_s7, 32768  ;;  %s6973_s25 = smov [#allocation3]  }
  0x84   : > { %p6861_p3 = scmp.ne.s32.totalorder %s7214_s7, %s6860_s17  ;;  %s6865_s6 = sshll.u32 %s6973_s25, 4  ;;  %s6866_s6 = int_to_ptr.vmem [resolvable:$false] %s6865_s6 }
  0x85   : > { %s6867_s27 = scalar_lea.vmem %s6866_s6, 65536  ;;  %p6868_p0 = scmp.lt.s32.totalorder %s7214_s7, %s6866_s6 }
  0x86   : > { %p6863_p7 = pnand %p6861_p3, %p6847_p12  ;;  %p6869_p4 = scmp.lt.s32.totalorder %s6867_s27, %s6860_s17 }
  0x88   : > { %p6864_p9 = pneg %p6863_p7  ;;  %p6870_p13 = por %p6869_p4, %p6868_p0 }
  0x8a   : > { %p6871_p2 = pnand %p6870_p13, %p6864_p9 }
  0x8c   : > { %6874 = shalt.err (!%p6871_p2)
}
  0x8d   : > { %s6974_s10 = smov 512   ;;  %s6975_s18 = smov 32  }
  0x8e   : > { %6578 = dma.hbm_to_vmem [thread:$0]  (!%p7210_p11), %s7206_s9, 32768, %s7214_s7, %s7216_s12, %s6974_s10, %s6974_s10, %s6975_s18  }
  0x8f   : > { %p8358_p12 = scmp.ne.s32.totalorder %s8352_s30, 0 }
  0x91   : > { %267 = sbr.rel (%p8358_p12) target bundleno = 1496 (0x5d8), region = 40 }
  0x98   : > { %s7247_s8 = sand.u32 1, %s6949_s19   ;;  %p8359_p1 = scmp.ne.s32.totalorder %s8349_s28, 0 }
  0x99   : > { %s5520_s16 = sshll.u32 %s7247_s8, 11  ;;  %s270_s11 = scalar_lea.sflag [#allocation4], %s7247_s8 }
  0x9a   : > { %s7251_s13 = scalar_lea.vmem [#allocation3], %s5520_s16 }
  0x9b   : > { %6928 = dma.done.wait (%p8359_p1), %s270_s11, 32768  }
  0x9c   : > { %6930 = vsyncadd (%p8359_p1), %s270_s11, 4294934528  ;;  %p8360_p11 = scmp.ne.s32.totalorder %s8347_s26, 0 }
  0x9e   : > { %6932 = dma.done.wait (%p8360_p11), [#allocation7], 9216  }
  0x9f   : > { %6934 = vsyncadd (%p8360_p11), [#allocation7], 4294958080 }
  0xa0   : > { %6936 = dma.done.wait (%p8360_p11), [#allocation10], 1040  }
  0xa1   : > { %6938 = vsyncadd (%p8360_p11), [#allocation10], 4294966256  ;;  %v6652_v0 = vld [vmem:[#allocation8] sm:$0xff]   ;;  %v6653_v1 = vld [vmem:[#allocation8 + $0x8] sm:$0xff]   ;;  %v6976_v35 = vmov 0   ;;  %s5525_s26 = sshll.u32 %s7247_s8, 8 }
  0xa2   : > { %6302 = vmatprep.subr.bf16.mxu0 %v6652_v0  ;;  %6526 = vmatprep.subr.bf16.mxu1 %v6652_v0  ;;  %v6654_v2 = vld [vmem:[#allocation8 + $0x10] sm:$0xff]   ;;  %v6655_v3 = vld [vmem:[#allocation8 + $0x18] sm:$0xff]   ;;  %v6660_v4 = vld [vmem:[#allocation6] sm:$0xff]   ;;  %s8239_s28 = scalar_lea.vmem [#allocation12], %s5525_s26  ;;  %s5998_s30 = sshll.u32 %s6957_s21, 12 }
  0xa3   : > { %6303 = vmatpush3.bf16.msra.mxu0 %v6652_v0  ;;  %6534 = vmatpush3.bf16.msra.mxu1 %v6652_v0  ;;  %v6656_v5 = vld [vmem:[#allocation8 + $0x20] sm:$0xff]   ;;  %v6657_v6 = vld [vmem:[#allocation8 + $0x28] sm:$0xff]   ;;  %v6658_v7 = vld [vmem:[#allocation8 + $0x30] sm:$0xff]   ;;  %s5383_s9 = sshll.u32 %s8239_s28, 4  ;;  %s8281_s12 = scalar_lea.hbm %s8339_s5, %s5998_s30  ;;  %s8283_s9 = int_to_ptr.vmem [resolvable:$true] %s5383_s9 }
  0xa4   : > { %6304 = vmatprep.subr.bf16.mxu0 %v6653_v1  ;;  %6527 = vmatprep.subr.bf16.mxu1 %v6653_v1  ;;  %v6659_v8 = vld [vmem:[#allocation8 + $0x38] sm:$0xff]   ;;  %v6661_v9 = vld [vmem:[#allocation6 + $0x8] sm:$0xff]   ;;  %v6662_v10 = vld [vmem:[#allocation6 + $0x10] sm:$0xff]   ;;  %s5370_s17 = scalar_lea.sflag [#allocation5], %s7247_s8  ;;  %s6875_s21 = scalar_lea.vmem %s8283_s9, 4096 }
  0xa5   : > { %6318 = vmatprep.mubr.bf16.mxu0 %v6660_v4  ;;  %v6663_v11 = vld [vmem:[#allocation6 + $0x18] sm:$0xff]   ;;  %v6664_v12 = vld [vmem:[#allocation6 + $0x20] sm:$0xff]   ;;  %v6665_v13 = vld [vmem:[#allocation6 + $0x28] sm:$0xff]   ;;  %p6876_p8 = scmp.ne.s32.totalorder %s8283_s9, %s6875_s21  ;;  %s6977_s25 = smov [#allocation12]  }
  0xa6   : > { %v6666_v14 = vld [vmem:[#allocation6 + $0x30] sm:$0xff]   ;;  %v6667_v15 = vld [vmem:[#allocation6 + $0x38] sm:$0xff]   ;;  %v6668_v16 = vld [vmem:[#allocation6 + $0x40] sm:$0xff]   ;;  %s6879_s6 = sshll.u32 %s6977_s25, 4  ;;  %s6880_s6 = int_to_ptr.vmem [resolvable:$false] %s6879_s6 }
  0xa7   : > { %6305 = vmatpush3.bf16.msra.mxu0 %v6653_v1  ;;  %6535 = vmatpush3.bf16.msra.mxu1 %v6653_v1  ;;  %v6669_v17 = vld [vmem:[#allocation6 + $0x48] sm:$0xff]   ;;  %v6670_v18 = vld [vmem:[#allocation6 + $0x50] sm:$0xff]   ;;  %v6671_v19 = vld [vmem:[#allocation6 + $0x58] sm:$0xff]   ;;  %p6877_p6 = pnand %p6876_p8, %p7192_p5  ;;  %s6881_s27 = scalar_lea.vmem %s6880_s6, 8192 }
  0xa8   : > { %6306 = vmatprep.subr.bf16.mxu0 %v6654_v2  ;;  %6528 = vmatprep.subr.bf16.mxu1 %v6654_v2  ;;  %v6672_v20 = vld [vmem:[#allocation6 + $0x60] sm:$0xff]   ;;  %v6673_v21 = vld [vmem:[#allocation6 + $0x68] sm:$0xff]   ;;  %v6674_v22 = vld [vmem:[#allocation6 + $0x70] sm:$0xff]   ;;  %p6882_p3 = scmp.lt.s32.totalorder %s8283_s9, %s6880_s6  ;;  %p6883_p7 = scmp.lt.s32.totalorder %s6881_s27, %s6875_s21 }
  0xa9   : > { %v6675_v23 = vld [vmem:[#allocation6 + $0x78] sm:$0xff]   ;;  %v6676_v24 = vld [vmem:[#allocation6 + $0x80] sm:$0xff]   ;;  %v6677_v25 = vld [vmem:[#allocation6 + $0x88] sm:$0xff]   ;;  %p6878_p10 = pneg %p6877_p6 }
  0xaa   : > { %v6678_v26 = vld [vmem:[#allocation6 + $0x90] sm:$0xff]   ;;  %v6679_v27 = vld [vmem:[#allocation6 + $0x98] sm:$0xff]   ;;  %v6680_v28 = vld [vmem:[#allocation6 + $0xa0] sm:$0xff]   ;;  %p6884_p9 = por %p6883_p7, %p6882_p3 }
  0xab   : > { %6307 = vmatpush3.bf16.msra.mxu0 %v6654_v2  ;;  %6536 = vmatpush3.bf16.msra.mxu1 %v6654_v2  ;;  %v6681_v29 = vld [vmem:[#allocation6 + $0xa8] sm:$0xff]   ;;  %v6682_v30 = vld [vmem:[#allocation6 + $0xb0] sm:$0xff]   ;;  %v6683_v31 = vld [vmem:[#allocation6 + $0xb8] sm:$0xff]  }
  0xac   : > { %6308 = vmatprep.subr.bf16.mxu0 %v6655_v3  ;;  %6529 = vmatprep.subr.bf16.mxu1 %v6655_v3  ;;  %v6684_v32 = vld [vmem:[#allocation6 + $0xc0] sm:$0xff]   ;;  %v6693_v34 = vld [vmem:[#allocation6 + $0x188] sm:$0xff]   ;;  %v6686_v37 = vld [vmem:[#allocation6 + $0xd0] sm:$0xff]   ;;  %p6885_p0 = pnand %p6884_p9, %p6878_p10 }
  0xad   : > { %v6692_v33 = vld [vmem:[#allocation6 + $0x180] sm:$0xff]   ;;  %v6685_v36 = vld [vmem:[#allocation6 + $0xc8] sm:$0xff]   ;;  %v6694_v38 = vld [vmem:[#allocation6 + $0x190] sm:$0xff]  }
  0xae   : > { %6414 = vmatprep.mubr.bf16.mxu1 %v6692_v33  ;;  %v6695_v39 = vld [vmem:[#allocation6 + $0x198] sm:$0xff]   ;;  %v6688_v41 = vld [vmem:[#allocation6 + $0xe0] sm:$0xff]   ;;  %v6697_v43 = vld [vmem:[#allocation6 + $0x1a8] sm:$0xff]  }
  0xaf   : > { %6309 = vmatpush3.bf16.msra.mxu0 %v6655_v3  ;;  %6537 = vmatpush3.bf16.msra.mxu1 %v6655_v3  ;;  %v6687_v40 = vld [vmem:[#allocation6 + $0xd8] sm:$0xff]   ;;  %v6696_v42 = vld [vmem:[#allocation6 + $0x1a0] sm:$0xff]   ;;  %v6689_v44 = vld [vmem:[#allocation6 + $0xe8] sm:$0xff]  }
  0xb0   : > { %6310 = vmatprep.subr.bf16.mxu0 %v6656_v5  ;;  %6530 = vmatprep.subr.bf16.mxu1 %v6656_v5  ;;  %v6690_v45 = vld [vmem:[#allocation6 + $0xf0] sm:$0xff]   ;;  %v6699_v47 = vld [vmem:[#allocation6 + $0x1b8] sm:$0xff]   ;;  %v6702_v49 = vld [vmem:[#allocation6 + $0x1c0] sm:$0xff]  }
  0xb1   : > { %v6698_v46 = vld [vmem:[#allocation6 + $0x1b0] sm:$0xff]   ;;  %v6691_v48 = vld [vmem:[#allocation6 + $0xf8] sm:$0xff]   ;;  %v6703_v50 = vld [vmem:[#allocation6 + $0x1c8] sm:$0xff]  }
  0xb2   : > { %v6700_v51 = vld [vmem:[#allocation6 + $0x100] sm:$0xff]   ;;  %v6701_v52 = vld [vmem:[#allocation6 + $0x108] sm:$0xff]   ;;  %v6704_v53 = vld [vmem:[#allocation6 + $0x1d0] sm:$0xff]  }
  0xb3   : > { %6311 = vmatpush3.bf16.msra.mxu0 %v6656_v5  ;;  %6538 = vmatpush3.bf16.msra.mxu1 %v6656_v5  ;;  %v6705_v54 = vld [vmem:[#allocation6 + $0x1d8] sm:$0xff]   ;;  %v6706_v55 = vld [vmem:[#allocation6 + $0x110] sm:$0xff]   ;;  %v6707_v56 = vld [vmem:[#allocation6 + $0x1e0] sm:$0xff]  }
  0xb4   : > { %6312 = vmatprep.subr.bf16.mxu0 %v6657_v6  ;;  %6531 = vmatprep.subr.bf16.mxu1 %v6657_v6  ;;  %v6708_v57 = vld [vmem:[#allocation6 + $0x118] sm:$0xff]   ;;  %v6709_v58 = vld [vmem:[#allocation6 + $0x1e8] sm:$0xff]   ;;  %v6710_v59 = vld [vmem:[#allocation6 + $0x120] sm:$0xff]  }
  0xb5   : > { %v6711_v60 = vld [vmem:[#allocation6 + $0x1f0] sm:$0xff]   ;;  %v6712_v61 = vld [vmem:[#allocation6 + $0x128] sm:$0xff]   ;;  %v6713_v62 = vld [vmem:[#allocation6 + $0x1f8] sm:$0xff]  }
  0xb6   : > { %v7268_v63 = vld [vmem:[%s7251_s13] sm:$0xff]  ;;  %v6714_v1 = vld [vmem:[#allocation6 + $0x130] sm:$0xff]   ;;  %v6715_v4 = vld [vmem:[#allocation6 + $0x138] sm:$0xff]  }
  0xb7   : > { %6313 = vmatpush3.bf16.msra.mxu0 %v6657_v6  ;;  %6539 = vmatpush3.bf16.msra.mxu1 %v6657_v6  ;;  %v7271_v0 = vld [vmem:[%s7251_s13 + $0x20] sm:$0xff]  ;;  %v6717_v6 = vld [vmem:[#allocation6 + $0x148] sm:$0xff]  }
  0xb8   : > { %6314 = vmatprep.subr.bf16.mxu0 %v6658_v7  ;;  %6532 = vmatprep.subr.bf16.mxu1 %v6658_v7  ;;  %v5599_v2 = vcombine.high %v7268_v63, %v7271_v0  ;;  %v5598_v3 = vcombine.low %v7268_v63, %v7271_v0  ;;  %v6716_v5 = vld [vmem:[#allocation6 + $0x140] sm:$0xff]  }
  0xb9   : > { %v1666_v0 = vld [vmem:[%s7251_s13 + $0xc0] sm:$0xff] }
  0xbb   : > { %6315 = vmatpush3.bf16.msra.mxu0 %v6658_v7  ;;  %6540 = vmatpush3.bf16.msra.mxu1 %v6658_v7  ;;  %v6718_v7 = vld [vmem:[#allocation6 + $0x150] sm:$0xff]  }
  0xbc   : > { %6316 = vmatprep.subr.bf16.mxu0 %v6659_v8  ;;  %6533 = vmatprep.subr.bf16.mxu1 %v6659_v8 }
  0xbf   : > { %6317 = vmatpush3.bf16.msra.mxu0 %v6659_v8  ;;  %6541 = vmatpush3.bf16.msra.mxu1 %v6659_v8  ;;  %v6719_v8 = vld [vmem:[#allocation6 + $0x158] sm:$0xff]  }
  0xc0   : > { %3178 = vmatprep.subr.bf16.mxu1 %v6976_v35  ;;  %3467 = vmatprep.subr.bf16.mxu0 %v6976_v35 }
  0xc2   : > { %6319 = vmatmul.mubr.bf16.vlgmr.msra.gmra.mrb[0].mxu0 %v6661_v9  ;;  %6415 = vmatmul.mubr.bf16.vlgmr.msra.gmra.mrb[0].mxu1 %v6693_v34  ;;  %v6720_v9 = vld [vmem:[#allocation6 + $0x160] sm:$0xff]  }
  0xc3   : > { %6322 = vmatprep.mubr.bf16.mxu0 %v6662_v10  ;;  %6418 = vmatprep.mubr.bf16.mxu1 %v6694_v38  ;;  %v6721_v10 = vld [vmem:[#allocation6 + $0x168] sm:$0xff]  }
  0xca   : > { %6323 = vmatmul.mubr.bf16.gmra.mrb[4].mxu0 %v6663_v11  ;;  %6419 = vmatmul.mubr.bf16.gmra.mrb[4].mxu1 %v6695_v39  ;;  %v6722_v11 = vld [vmem:[#allocation6 + $0x170] sm:$0xff]  }
  0xcb   : > { %6326 = vmatprep.mubr.bf16.mxu0 %v6664_v12  ;;  %6422 = vmatprep.mubr.bf16.mxu1 %v6696_v42  ;;  %v6723_v12 = vld [vmem:[#allocation6 + $0x178] sm:$0xff]  }
  0xd2   : > { %6327 = vmatmul.mubr.bf16.gmra.mrb[8].mxu0 %v6665_v13  ;;  %6423 = vmatmul.mubr.bf16.gmra.mrb[8].mxu1 %v6697_v43 }
  0xd3   : > { %6330 = vmatprep.mubr.bf16.mxu0 %v6666_v14  ;;  %6426 = vmatprep.mubr.bf16.mxu1 %v6698_v46 }
  0xda   : > { %6331 = vmatmul.mubr.bf16.gmra.mrb[12].mxu0 %v6667_v15  ;;  %6427 = vmatmul.mubr.bf16.gmra.mrb[12].mxu1 %v6699_v47  ;;  %v7278_v15 = vld [vmem:[%s7251_s13 + $0x8] sm:$0xff] }
  0xdb   : > { %6334 = vmatprep.mubr.bf16.mxu0 %v6668_v16  ;;  %6430 = vmatprep.mubr.bf16.mxu1 %v6702_v49 }
  0xe2   : > { %6335 = vmatmul.mubr.bf16.gmra.mrb[16].mxu0 %v6669_v17  ;;  %6431 = vmatmul.mubr.bf16.gmra.mrb[16].mxu1 %v6703_v50  ;;  %v7281_v17 = vld [vmem:[%s7251_s13 + $0x28] sm:$0xff] }
  0xe3   : > { %6338 = vmatprep.mubr.bf16.mxu0 %v6670_v18  ;;  %6434 = vmatprep.mubr.bf16.mxu1 %v6704_v53 }
  0xea   : > { %6339 = vmatmul.mubr.bf16.gmra.mrb[20].mxu0 %v6671_v19  ;;  %6435 = vmatmul.mubr.bf16.gmra.mrb[20].mxu1 %v6705_v54 }
  0xeb   : > { %6342 = vmatprep.mubr.bf16.mxu0 %v6672_v20  ;;  %6438 = vmatprep.mubr.bf16.mxu1 %v6707_v56  ;;  %v5600_v20 = vcombine.low %v7278_v15, %v7281_v17 }
  0xf2   : > { %6343 = vmatmul.mubr.bf16.gmra.mrb[24].mxu0 %v6673_v21  ;;  %6439 = vmatmul.mubr.bf16.gmra.mrb[24].mxu1 %v6709_v58  ;;  %v5601_v21 = vcombine.high %v7278_v15, %v7281_v17 }
  0xf3   : > { %6346 = vmatprep.mubr.bf16.mxu0 %v6674_v22  ;;  %6442 = vmatprep.mubr.bf16.mxu1 %v6711_v60 }
  0xfa   : > { %6347 = vmatmul.mubr.bf16.gmra.mrb[28].mxu0 %v6675_v23  ;;  %6443 = vmatmul.mubr.bf16.gmra.mrb[28].mxu1 %v6713_v62 }
  0xfb   : > { %6350 = vmatprep.mubr.bf16.mxu0 %v6676_v24  ;;  %3210 = vmatprep.mubr.bf16.mxu1 %v5599_v2 }
 0x102   : > { %6351 = vmatmul.mubr.bf16.gmra.mrb[32].mxu0 %v6677_v25 }
 0x103   : > { %6354 = vmatprep.mubr.bf16.mxu0 %v6678_v26 }
 0x10a   : > { %6355 = vmatmul.mubr.bf16.gmra.mrb[36].mxu0 %v6679_v27 }
 0x10b   : > { %6358 = vmatprep.mubr.bf16.mxu0 %v6680_v28 }
 0x112   : > { %6359 = vmatmul.mubr.bf16.gmra.mrb[40].mxu0 %v6681_v29 }
 0x113   : > { %6362 = vmatprep.mubr.bf16.mxu0 %v6682_v30 }
 0x11a   : > { %6363 = vmatmul.mubr.bf16.gmra.mrb[44].mxu0 %v6683_v31 }
 0x11b   : > { %6366 = vmatprep.mubr.bf16.mxu0 %v6684_v32 }
 0x122   : > { %6367 = vmatmul.mubr.bf16.gmra.mrb[48].mxu0 %v6685_v36 }
 0x123   : > { %6370 = vmatprep.mubr.bf16.mxu0 %v6686_v37 }
 0x12a   : > { %6371 = vmatmul.mubr.bf16.gmra.mrb[52].mxu0 %v6687_v40 }
 0x12b   : > { %6374 = vmatprep.mubr.bf16.mxu0 %v6688_v41 }
 0x132   : > { %6375 = vmatmul.mubr.bf16.gmra.mrb[56].mxu0 %v6689_v44 }
 0x133   : > { %6378 = vmatprep.mubr.bf16.mxu0 %v6690_v45 }
 0x13a   : > { %6379 = vmatmul.mubr.bf16.gmra.mrb[60].mxu0 %v6691_v48 }
 0x13b   : > { %6382 = vmatprep.mubr.bf16.mxu0 %v6700_v51 }
 0x142   : > { %6383 = vmatmul.mubr.bf16.gmra.mrb[64].mxu0 %v6701_v52 }
 0x143   : > { %6386 = vmatprep.mubr.bf16.mxu0 %v6706_v55 }
 0x14a   : > { %6387 = vmatmul.mubr.bf16.gmra.mrb[68].mxu0 %v6708_v57 }
 0x14b   : > { %6390 = vmatprep.mubr.bf16.mxu0 %v6710_v59 }
 0x152   : > { %6391 = vmatmul.mubr.bf16.gmra.mrb[72].mxu0 %v6712_v61 }
 0x153   : > { %6394 = vmatprep.mubr.bf16.mxu0 %v6714_v1 }
 0x15a   : > { %6395 = vmatmul.mubr.bf16.gmra.mrb[76].mxu0 %v6715_v4 }
 0x15b   : > { %6398 = vmatprep.mubr.bf16.mxu0 %v6716_v5  ;;  %v1650_v5 = vld [vmem:[%s7251_s13 + $0x40] sm:$0xff] }
 0x162   : > { %6399 = vmatmul.mubr.bf16.gmra.mrb[80].mxu0 %v6717_v6  ;;  %v1654_v6 = vld [vmem:[%s7251_s13 + $0x60] sm:$0xff] }
 0x163   : > { %6402 = vmatprep.mubr.bf16.mxu0 %v6718_v7 }
 0x16a   : > { %6403 = vmatmul.mubr.bf16.gmra.mrb[84].mxu0 %v6719_v8 }
 0x16b   : > { %6406 = vmatprep.mubr.bf16.mxu0 %v6720_v9 }
 0x172   : > { %6407 = vmatmul.mubr.bf16.gmra.mrb[88].mxu0 %v6721_v10  ;;  %v5607_v10 = vcombine.high %v1650_v5, %v1654_v6 }
 0x173   : > { %6410 = vmatprep.mubr.bf16.mxu0 %v6722_v11 }
 0x17a   : > { %6411 = vmatmul.mubr.bf16.gmra.mrb[92].mxu0 %v6723_v12 }
 0x17b   : > { %3499 = vmatprep.mubr.bf16.mxu0 %v5601_v21  ;;  %v5606_v21 = vcombine.low %v1650_v5, %v1654_v6  ;;  %v1702_v5 = vld [vmem:[%s7251_s13 + $0x1e0] sm:$0xff] }
 0x195   : > { %v6320_v13 = vpop.f32.mrb[0].mxu0 }
 0x196   : > { %v1003_v14 = vpop.f32.mrb[1].mxu0 }
 0x197   : > { %v6321_v16 = vpop.f32.mrb[2].mxu0 }
 0x198   : > { %v1515_v18 = vpack.c.bf16 %v6321_v16, %v6320_v13  ;;  %v1006_v19 = vpop.f32.mrb[3].mxu0  ;;  %v1662_v16 = vld [vmem:[%s7251_s13 + $0xa0] sm:$0xff] }
 0x199   : > { %v1514_v22 = vpack.c.bf16 %v1006_v19, %v1003_v14  ;;  %v1658_v14 = vld [vmem:[%s7251_s13 + $0x80] sm:$0xff] }
 0x19b   : > { %3179 = vmatpush1.bf16.msra.mxu1 %v1514_v22 }
 0x19c   : > { %3180 = vmatprep.subr.bf16.mxu1 %v6976_v35 }
 0x19d   : > { %v6324_v23 = vpop.f32.mrb[4].mxu0 }
 0x19e   : > { %v1019_v24 = vpop.f32.mrb[5].mxu0 }
 0x19f   : > { %v6325_v25 = vpop.f32.mrb[6].mxu0  ;;  %3181 = vmatpush1.bf16.msra.mxu1 %v1515_v18 }
 0x1a0   : > { %v1517_v26 = vpack.c.bf16 %v6325_v25, %v6324_v23  ;;  %v1022_v27 = vpop.f32.mrb[7].mxu0  ;;  %3182 = vmatprep.subr.bf16.mxu1 %v6976_v35  ;;  %v5615_v23 = vcombine.high %v1658_v14, %v1662_v16 }
 0x1a1   : > { %v1516_v28 = vpack.c.bf16 %v1022_v27, %v1019_v24 }
 0x1a3   : > { %3183 = vmatpush1.bf16.msra.mxu1 %v1516_v28  ;;  %v5614_v28 = vcombine.low %v1658_v14, %v1662_v16  ;;  %v6416_v14 = vpop.f32.mrb[0].mxu1 }
 0x1a4   : > { %3184 = vmatprep.subr.bf16.mxu1 %v6976_v35  ;;  %v1387_v16 = vpop.f32.mrb[1].mxu1 }
 0x1a5   : > { %v6328_v29 = vpop.f32.mrb[8].mxu0 }
 0x1a6   : > { %v1035_v30 = vpop.f32.mrb[9].mxu0 }
 0x1a7   : > { %v6329_v31 = vpop.f32.mrb[10].mxu0  ;;  %3185 = vmatpush1.bf16.msra.mxu1 %v1517_v26 }
 0x1a8   : > { %v1519_v32 = vpack.c.bf16 %v6329_v31, %v6328_v29  ;;  %v1038_v33 = vpop.f32.mrb[11].mxu0  ;;  %3186 = vmatprep.subr.bf16.mxu1 %v6976_v35 }
 0x1a9   : > { %v1518_v34 = vpack.c.bf16 %v1038_v33, %v1035_v30 }
 0x1ab   : > { %3187 = vmatpush1.bf16.msra.mxu1 %v1518_v34  ;;  %v1674_v34 = vld [vmem:[%s7251_s13 + $0x100] sm:$0xff] }
 0x1ac   : > { %3188 = vmatprep.subr.bf16.mxu1 %v6976_v35 }
 0x1ad   : > { %v6332_v36 = vpop.f32.mrb[12].mxu0 }
 0x1ae   : > { %v1051_v37 = vpop.f32.mrb[13].mxu0 }
 0x1af   : > { %v6333_v38 = vpop.f32.mrb[14].mxu0  ;;  %3189 = vmatpush1.bf16.msra.mxu1 %v1519_v32 }
 0x1b0   : > { %v1521_v39 = vpack.c.bf16 %v6333_v38, %v6332_v36  ;;  %v1054_v40 = vpop.f32.mrb[15].mxu0  ;;  %3190 = vmatprep.subr.bf16.mxu1 %v6976_v35  ;;  %v1678_v36 = vld [vmem:[%s7251_s13 + $0x120] sm:$0xff] }
 0x1b1   : > { %v1520_v41 = vpack.c.bf16 %v1054_v40, %v1051_v37 }
 0x1b3   : > { %3191 = vmatpush1.bf16.msra.mxu1 %v1520_v41  ;;  %v5631_v41 = vcombine.high %v1674_v34, %v1678_v36 }
 0x1b4   : > { %3192 = vmatprep.subr.bf16.mxu1 %v6976_v35 }
 0x1b5   : > { %v6336_v42 = vpop.f32.mrb[16].mxu0 }
 0x1b6   : > { %v1067_v43 = vpop.f32.mrb[17].mxu0 }
 0x1b7   : > { %v6337_v44 = vpop.f32.mrb[18].mxu0  ;;  %3193 = vmatpush1.bf16.msra.mxu1 %v1521_v39 }
 0x1b8   : > { %v1523_v45 = vpack.c.bf16 %v6337_v44, %v6336_v42  ;;  %v1070_v46 = vpop.f32.mrb[19].mxu0  ;;  %3194 = vmatprep.subr.bf16.mxu1 %v6976_v35 }
 0x1b9   : > { %v1522_v47 = vpack.c.bf16 %v1070_v46, %v1067_v43  ;;  %v1686_v46 = vld [vmem:[%s7251_s13 + $0x160] sm:$0xff] }
 0x1bb   : > { %3195 = vmatpush1.bf16.msra.mxu1 %v1522_v47 }
 0x1bc   : > { %3196 = vmatprep.subr.bf16.mxu1 %v6976_v35 }
 0x1bd   : > { %v6340_v48 = vpop.f32.mrb[20].mxu0 }
 0x1be   : > { %v1083_v49 = vpop.f32.mrb[21].mxu0 }
 0x1bf   : > { %v6341_v50 = vpop.f32.mrb[22].mxu0  ;;  %3197 = vmatpush1.bf16.msra.mxu1 %v1523_v45  ;;  %v1682_v45 = vld [vmem:[%s7251_s13 + $0x140] sm:$0xff] }
 0x1c0   : > { %v1525_v51 = vpack.c.bf16 %v6341_v50, %v6340_v48  ;;  %v1086_v52 = vpop.f32.mrb[23].mxu0  ;;  %3198 = vmatprep.subr.bf16.mxu1 %v6976_v35 }
 0x1c1   : > { %v1524_v53 = vpack.c.bf16 %v1086_v52, %v1083_v49  ;;  %v5630_v49 = vcombine.low %v1674_v34, %v1678_v36 }
 0x1c3   : > { %3199 = vmatpush1.bf16.msra.mxu1 %v1524_v53 }
 0x1c4   : > { %3200 = vmatprep.subr.bf16.mxu1 %v6976_v35 }
 0x1c5   : > { %v6344_v54 = vpop.f32.mrb[24].mxu0 }
 0x1c6   : > { %v1099_v55 = vpop.f32.mrb[25].mxu0 }
 0x1c7   : > { %v6345_v56 = vpop.f32.mrb[26].mxu0  ;;  %3201 = vmatpush1.bf16.msra.mxu1 %v1525_v51  ;;  %v5639_v51 = vcombine.high %v1682_v45, %v1686_v46 }
 0x1c8   : > { %v1527_v57 = vpack.c.bf16 %v6345_v56, %v6344_v54  ;;  %v1102_v58 = vpop.f32.mrb[27].mxu0  ;;  %3202 = vmatprep.subr.bf16.mxu1 %v6976_v35  ;;  %v1694_v56 = vld [vmem:[%s7251_s13 + $0x1a0] sm:$0xff] }
 0x1c9   : > { %v1526_v59 = vpack.c.bf16 %v1102_v58, %v1099_v55  ;;  %v1690_v55 = vld [vmem:[%s7251_s13 + $0x180] sm:$0xff] }
 0x1cb   : > { %3203 = vmatpush1.bf16.msra.mxu1 %v1526_v59  ;;  %v5638_v59 = vcombine.low %v1682_v45, %v1686_v46  ;;  %v1726_v45 = vld [vmem:[%s7251_s13 + $0x2a0] sm:$0xff]  ;;  %v1659_v46 = vld [vmem:[%s7251_s13 + $0x88] sm:$0xff] }
 0x1cc   : > { %3204 = vmatprep.subr.bf16.mxu1 %v6976_v35 }
 0x1cd   : > { %v6348_v60 = vpop.f32.mrb[28].mxu0 }
 0x1ce   : > { %v1115_v61 = vpop.f32.mrb[29].mxu0 }
 0x1cf   : > { %v6349_v62 = vpop.f32.mrb[30].mxu0  ;;  %3205 = vmatpush1.bf16.msra.mxu1 %v1527_v57 }
 0x1d0   : > { %v1529_v1 = vpack.c.bf16 %v6349_v62, %v6348_v60  ;;  %v1118_v2 = vpop.f32.mrb[31].mxu0  ;;  %3206 = vmatprep.subr.bf16.mxu1 %v6976_v35 }
 0x1d1   : > { %v1528_v4 = vpack.c.bf16 %v1118_v2, %v1115_v61  ;;  %v5647_v61 = vcombine.high %v1690_v55, %v1694_v56 }
 0x1d3   : > { %3207 = vmatpush1.bf16.msra.mxu1 %v1528_v4  ;;  %v1698_v4 = vld [vmem:[%s7251_s13 + $0x1c0] sm:$0xff] }
 0x1d4   : > { %3208 = vmatprep.subr.bf16.mxu1 %v6976_v35 }
 0x1d5   : > { %v6352_v7 = vpop.f32.mrb[32].mxu0 }
 0x1d6   : > { %v1131_v8 = vpop.f32.mrb[33].mxu0 }
 0x1d7   : > { %v6353_v9 = vpop.f32.mrb[34].mxu0  ;;  %3209 = vmatpush1.bf16.msra.mxu1 %v1529_v1 }
 0x1d8   : > { %v1531_v11 = vpack.c.bf16 %v6353_v9, %v6352_v7  ;;  %v1134_v12 = vpop.f32.mrb[35].mxu0  ;;  %3756 = vmatprep.subr.bf16.mxu1 %v6976_v35 }
 0x1d9   : > { %v1530_v13 = vpack.c.bf16 %v1134_v12, %v1131_v8  ;;  %v5646_v8 = vcombine.low %v1690_v55, %v1694_v56  ;;  %v1730_v55 = vld [vmem:[%s7251_s13 + $0x2c0] sm:$0xff] }
 0x1da   : > { %3211 = vmatmul.mubr.bf16.vlgmr.msra.gmra.mrb[32].mxu1 %v5598_v3  ;;  %v1670_v3 = vld [vmem:[%s7251_s13 + $0xe0] sm:$0xff] }
 0x1db   : > { %3468 = vmatpush1.bf16.msra.mxu0 %v1530_v13  ;;  %3218 = vmatprep.mubr.bf16.mxu1 %v5607_v10  ;;  %v5623_v30 = vcombine.high %v1666_v0, %v1670_v3  ;;  %v5622_v39 = vcombine.low %v1666_v0, %v1670_v3  ;;  %v5655_v10 = vcombine.high %v1698_v4, %v1702_v5  ;;  %v1734_v56 = vld [vmem:[%s7251_s13 + $0x2e0] sm:$0xff] }
 0x1dc   : > { %3469 = vmatprep.subr.bf16.mxu0 %v6976_v35 }
 0x1dd   : > { %v6356_v18 = vpop.f32.mrb[36].mxu0 }
 0x1de   : > { %v1147_v19 = vpop.f32.mrb[37].mxu0 }
 0x1df   : > { %v6357_v22 = vpop.f32.mrb[38].mxu0  ;;  %3470 = vmatpush1.bf16.msra.mxu0 %v1531_v11 }
 0x1e0   : > { %v1533_v24 = vpack.c.bf16 %v6357_v22, %v6356_v18  ;;  %v1150_v25 = vpop.f32.mrb[39].mxu0  ;;  %3471 = vmatprep.subr.bf16.mxu0 %v6976_v35  ;;  %v1706_v18 = vld [vmem:[%s7251_s13 + $0x200] sm:$0xff] }
 0x1e1   : > { %v1532_v63 = vpack.c.bf16 %v1150_v25, %v1147_v19  ;;  %v1710_v19 = vld [vmem:[%s7251_s13 + $0x220] sm:$0xff] }
 0x1e2   : > { %3219 = vmatmul.mubr.bf16.gmra.mrb[36].mxu1 %v5606_v21  ;;  %v6417_v21 = vpop.f32.mrb[2].mxu1  ;;  %v5662_v36 = vcombine.low %v1706_v18, %v1710_v19 }
 0x1e3   : > { %3472 = vmatpush1.bf16.msra.mxu0 %v1532_v63  ;;  %3226 = vmatprep.mubr.bf16.mxu1 %v5615_v23  ;;  %v1563_v23 = vpack.c.bf16 %v6417_v21, %v6416_v14  ;;  %v5654_v63 = vcombine.low %v1698_v4, %v1702_v5  ;;  %v5686_v21 = vcombine.low %v1730_v55, %v1734_v56 }
 0x1e4   : > { %3473 = vmatprep.subr.bf16.mxu0 %v6976_v35 }
 0x1e5   : > { %v6360_v26 = vpop.f32.mrb[40].mxu0 }
 0x1e6   : > { %v1163_v27 = vpop.f32.mrb[41].mxu0 }
 0x1e7   : > { %v6361_v29 = vpop.f32.mrb[42].mxu0  ;;  %3474 = vmatpush1.bf16.msra.mxu0 %v1533_v24  ;;  %v1390_v24 = vpop.f32.mrb[3].mxu1 }
 0x1e8   : > { %v1535_v31 = vpack.c.bf16 %v6361_v29, %v6360_v26  ;;  %v1166_v32 = vpop.f32.mrb[43].mxu0  ;;  %3475 = vmatprep.subr.bf16.mxu0 %v6976_v35  ;;  %v1562_v0 = vpack.c.bf16 %v1390_v24, %v1387_v16  ;;  %v5663_v26 = vcombine.high %v1706_v18, %v1710_v19 }
 0x1e9   : > { %v1534_v33 = vpack.c.bf16 %v1166_v32, %v1163_v27  ;;  %v1651_v32 = vld [vmem:[%s7251_s13 + $0x48] sm:$0xff] }
 0x1ea   : > { %3227 = vmatmul.mubr.bf16.gmra.mrb[40].mxu1 %v5614_v28 }
 0x1eb   : > { %3476 = vmatpush1.bf16.msra.mxu0 %v1534_v33  ;;  %3234 = vmatprep.mubr.bf16.mxu1 %v5623_v30  ;;  %v1714_v30 = vld [vmem:[%s7251_s13 + $0x240] sm:$0xff]  ;;  %v1655_v33 = vld [vmem:[%s7251_s13 + $0x68] sm:$0xff] }
 0x1ec   : > { %3477 = vmatprep.subr.bf16.mxu0 %v6976_v35 }
 0x1ed   : > { %v6364_v37 = vpop.f32.mrb[44].mxu0 }
 0x1ee   : > { %v1179_v38 = vpop.f32.mrb[45].mxu0 }
 0x1ef   : > { %v6365_v40 = vpop.f32.mrb[46].mxu0  ;;  %3478 = vmatpush1.bf16.msra.mxu0 %v1535_v31  ;;  %v1718_v31 = vld [vmem:[%s7251_s13 + $0x260] sm:$0xff] }
 0x1f0   : > { %v1537_v42 = vpack.c.bf16 %v6365_v40, %v6364_v37  ;;  %v1182_v43 = vpop.f32.mrb[47].mxu0  ;;  %3479 = vmatprep.subr.bf16.mxu0 %v6976_v35 }
 0x1f1   : > { %v1536_v44 = vpack.c.bf16 %v1182_v43, %v1179_v38  ;;  %v5671_v38 = vcombine.high %v1714_v30, %v1718_v31 }
 0x1f2   : > { %3235 = vmatmul.mubr.bf16.gmra.mrb[44].mxu1 %v5622_v39  ;;  %v5609_v39 = vcombine.high %v1651_v32, %v1655_v33 }
 0x1f3   : > { %3480 = vmatpush1.bf16.msra.mxu0 %v1536_v44  ;;  %3242 = vmatprep.mubr.bf16.mxu1 %v5631_v41  ;;  %v1722_v44 = vld [vmem:[%s7251_s13 + $0x280] sm:$0xff] }
 0x1f4   : > { %3481 = vmatprep.subr.bf16.mxu0 %v6976_v35  ;;  %v5679_v15 = vcombine.high %v1722_v44, %v1726_v45 }
 0x1f5   : > { %v6368_v47 = vpop.f32.mrb[48].mxu0 }
 0x1f6   : > { %v1195_v48 = vpop.f32.mrb[49].mxu0 }
 0x1f7   : > { %v6369_v50 = vpop.f32.mrb[50].mxu0  ;;  %3482 = vmatpush1.bf16.msra.mxu0 %v1537_v42 }
 0x1f8   : > { %v1539_v52 = vpack.c.bf16 %v6369_v50, %v6368_v47  ;;  %v1198_v53 = vpop.f32.mrb[51].mxu0  ;;  %3483 = vmatprep.subr.bf16.mxu0 %v6976_v35  ;;  %v1663_v47 = vld [vmem:[%s7251_s13 + $0xa8] sm:$0xff]  ;;  %v5608_v50 = vcombine.low %v1651_v32, %v1655_v33 }
 0x1f9   : > { %v1538_v54 = vpack.c.bf16 %v1198_v53, %v1195_v48  ;;  %v5617_v17 = vcombine.high %v1659_v46, %v1663_v47 }
 0x1fa   : > { %3243 = vmatmul.mubr.bf16.gmra.mrb[48].mxu1 %v5630_v49  ;;  %v5670_v49 = vcombine.low %v1714_v30, %v1718_v31  ;;  %v1683_v30 = vld [vmem:[%s7251_s13 + $0x148] sm:$0xff] }
 0x1fb   : > { %3484 = vmatpush1.bf16.msra.mxu0 %v1538_v54  ;;  %3250 = vmatprep.mubr.bf16.mxu1 %v5639_v51  ;;  %v1687_v31 = vld [vmem:[%s7251_s13 + $0x168] sm:$0xff] }
 0x1fc   : > { %3485 = vmatprep.subr.bf16.mxu0 %v6976_v35 }
 0x1fd   : > { %v6372_v57 = vpop.f32.mrb[52].mxu0 }
 0x1fe   : > { %v1211_v58 = vpop.f32.mrb[53].mxu0 }
 0x1ff   : > { %v6373_v60 = vpop.f32.mrb[54].mxu0  ;;  %3486 = vmatpush1.bf16.msra.mxu0 %v1539_v52 }
 0x200   : > { %v1541_v62 = vpack.c.bf16 %v6373_v60, %v6372_v57  ;;  %v1214_v1 = vpop.f32.mrb[55].mxu0  ;;  %3487 = vmatprep.subr.bf16.mxu0 %v6976_v35  ;;  %v1667_v57 = vld [vmem:[%s7251_s13 + $0xc8] sm:$0xff]  ;;  %v5678_v60 = vcombine.low %v1722_v44, %v1726_v45 }
 0x201   : > { %v1540_v2 = vpack.c.bf16 %v1214_v1, %v1211_v58  ;;  %v1671_v58 = vld [vmem:[%s7251_s13 + $0xe8] sm:$0xff]  ;;  %v5687_v1 = vcombine.high %v1730_v55, %v1734_v56 }
 0x202   : > { %3251 = vmatmul.mubr.bf16.gmra.mrb[52].mxu1 %v5638_v59 }
 0x203   : > { %3488 = vmatpush1.bf16.msra.mxu0 %v1540_v2  ;;  %3258 = vmatprep.mubr.bf16.mxu1 %v5647_v61  ;;  %v5616_v61 = vcombine.low %v1659_v46, %v1663_v47  ;;  %v5625_v2 = vcombine.high %v1667_v57, %v1671_v58 }
 0x204   : > { %3489 = vmatprep.subr.bf16.mxu0 %v6976_v35 }
 0x205   : > { %v6376_v6 = vpop.f32.mrb[56].mxu0 }
 0x206   : > { %v1227_v7 = vpop.f32.mrb[57].mxu0 }
 0x207   : > { %v6377_v9 = vpop.f32.mrb[58].mxu0  ;;  %3490 = vmatpush1.bf16.msra.mxu0 %v1541_v62 }
 0x208   : > { %v1543_v11 = vpack.c.bf16 %v6377_v9, %v6376_v6  ;;  %v1230_v12 = vpop.f32.mrb[59].mxu0  ;;  %3491 = vmatprep.subr.bf16.mxu0 %v6976_v35  ;;  %v1738_v9 = vld [vmem:[%s7251_s13 + $0x300] sm:$0xff] }
 0x209   : > { %v1542_v13 = vpack.c.bf16 %v1230_v12, %v1227_v7  ;;  %v1675_v12 = vld [vmem:[%s7251_s13 + $0x108] sm:$0xff] }
 0x20a   : > { %3259 = vmatmul.mubr.bf16.gmra.mrb[56].mxu1 %v5646_v8  ;;  %v6420_v8 = vpop.f32.mrb[4].mxu1 }
 0x20b   : > { %3492 = vmatpush1.bf16.msra.mxu0 %v1542_v13  ;;  %3266 = vmatprep.mubr.bf16.mxu1 %v5655_v10  ;;  %v1403_v10 = vpop.f32.mrb[5].mxu1  ;;  %v1679_v13 = vld [vmem:[%s7251_s13 + $0x128] sm:$0xff] }
 0x20c   : > { %3493 = vmatprep.subr.bf16.mxu0 %v6976_v35  ;;  %v6421_v14 = vpop.f32.mrb[6].mxu1 }
 0x20d   : > { %v6380_v22 = vpop.f32.mrb[60].mxu0  ;;  %v1565_v18 = vpack.c.bf16 %v6421_v14, %v6420_v8  ;;  %v1406_v19 = vpop.f32.mrb[7].mxu1 }
 0x20e   : > { %v1243_v25 = vpop.f32.mrb[61].mxu0  ;;  %v1564_v24 = vpack.c.bf16 %v1406_v19, %v1403_v10  ;;  %v6424_v32 = vpop.f32.mrb[8].mxu1 }
 0x20f   : > { %v6381_v3 = vpop.f32.mrb[62].mxu0  ;;  %3494 = vmatpush1.bf16.msra.mxu0 %v1543_v11  ;;  %v1742_v11 = vld [vmem:[%s7251_s13 + $0x320] sm:$0xff] }
 0x210   : > { %v1545_v27 = vpack.c.bf16 %v6381_v3, %v6380_v22  ;;  %v1246_v28 = vpop.f32.mrb[63].mxu0  ;;  %3495 = vmatprep.subr.bf16.mxu0 %v6976_v35  ;;  %v5624_v22 = vcombine.low %v1667_v57, %v1671_v58 }
 0x211   : > { %v1544_v29 = vpack.c.bf16 %v1246_v28, %v1243_v25  ;;  %v5695_v25 = vcombine.high %v1738_v9, %v1742_v11  ;;  %v1746_v28 = vld [vmem:[%s7251_s13 + $0x340] sm:$0xff] }
 0x212   : > { %3267 = vmatmul.mubr.bf16.gmra.mrb[60].mxu1 %v5654_v63  ;;  %v5633_v63 = vcombine.high %v1675_v12, %v1679_v13 }
 0x213   : > { %3496 = vmatpush1.bf16.msra.mxu0 %v1544_v29  ;;  %3274 = vmatprep.mubr.bf16.mxu1 %v5663_v26  ;;  %v1750_v29 = vld [vmem:[%s7251_s13 + $0x360] sm:$0xff] }
 0x214   : > { %3497 = vmatprep.subr.bf16.mxu0 %v6976_v35 }
 0x215   : > { %v6384_v34 = vpop.f32.mrb[64].mxu0 }
 0x216   : > { %v1259_v37 = vpop.f32.mrb[65].mxu0 }
 0x217   : > { %3498 = vmatpush1.bf16.msra.mxu0 %v1545_v27  ;;  %v6385_v40 = vpop.f32.mrb[66].mxu0 }
 0x218   : > { %v1547_v41 = vpack.c.bf16 %v6385_v40, %v6384_v34  ;;  %v1262_v42 = vpop.f32.mrb[67].mxu0  ;;  %4045 = vmatprep.subr.bf16.mxu0 %v6976_v35  ;;  %v1419_v34 = vpop.f32.mrb[9].mxu1  ;;  %v5703_v40 = vcombine.high %v1746_v28, %v1750_v29 }
 0x219   : > { %v1546_v43 = vpack.c.bf16 %v1262_v42, %v1259_v37  ;;  %v5632_v37 = vcombine.low %v1675_v12, %v1679_v13 }
 0x21a   : > { %3275 = vmatmul.mubr.bf16.gmra.mrb[64].mxu1 %v5662_v36  ;;  %3500 = vmatmul.mubr.bf16.vlgmr.msra.gmra.mrb[96].mxu0 %v5600_v20  ;;  %v5694_v36 = vcombine.low %v1738_v9, %v1742_v11 }
 0x21b   : > { %3282 = vmatprep.mubr.bf16.mxu1 %v5671_v38  ;;  %3507 = vmatprep.mubr.bf16.mxu0 %v5609_v39  ;;  %v6425_v39 = vpop.f32.mrb[10].mxu1 }
 0x21c   : > { %3757 = vmatpush1.bf16.msra.mxu1 %v1546_v43  ;;  %4046 = vmatpush1.bf16.msra.mxu0 %v1562_v0  ;;  %v1422_v43 = vpop.f32.mrb[11].mxu1 }
 0x21d   : > { %3758 = vmatprep.subr.bf16.mxu1 %v6976_v35  ;;  %4047 = vmatprep.subr.bf16.mxu0 %v6976_v35  ;;  %v6388_v48 = vpop.f32.mrb[68].mxu0  ;;  %v1566_v46 = vpack.c.bf16 %v1422_v43, %v1419_v34 }
 0x21e   : > { %v1275_v51 = vpop.f32.mrb[69].mxu0 }
 0x21f   : > { %v6389_v20 = vpop.f32.mrb[70].mxu0 }
 0x220   : > { %3759 = vmatpush1.bf16.msra.mxu1 %v1547_v41  ;;  %4048 = vmatpush1.bf16.msra.mxu0 %v1563_v23  ;;  %v1549_v52 = vpack.c.bf16 %v6389_v20, %v6388_v48  ;;  %v1278_v53 = vpop.f32.mrb[71].mxu0  ;;  %v5641_v41 = vcombine.high %v1683_v30, %v1687_v31  ;;  %v1754_v48 = vld [vmem:[%s7251_s13 + $0x380] sm:$0xff] }
 0x221   : > { %v1548_v54 = vpack.c.bf16 %v1278_v53, %v1275_v51  ;;  %3760 = vmatprep.subr.bf16.mxu1 %v6976_v35  ;;  %4049 = vmatprep.subr.bf16.mxu0 %v6976_v35  ;;  %v1695_v51 = vld [vmem:[%s7251_s13 + $0x1a8] sm:$0xff]  ;;  %v5702_v53 = vcombine.low %v1746_v28, %v1750_v29 }
 0x222   : > { %3283 = vmatmul.mubr.bf16.gmra.mrb[68].mxu1 %v5670_v49  ;;  %3508 = vmatmul.mubr.bf16.gmra.mrb[100].mxu0 %v5608_v50  ;;  %v1758_v49 = vld [vmem:[%s7251_s13 + $0x3a0] sm:$0xff]  ;;  %v1691_v50 = vld [vmem:[%s7251_s13 + $0x188] sm:$0xff] }
 0x223   : > { %3290 = vmatprep.mubr.bf16.mxu1 %v5679_v15  ;;  %3515 = vmatprep.mubr.bf16.mxu0 %v5617_v17  ;;  %v1567_v15 = vpack.c.bf16 %v6425_v39, %v6424_v32  ;;  %v6428_v17 = vpop.f32.mrb[12].mxu1  ;;  %v5711_v57 = vcombine.high %v1754_v48, %v1758_v49  ;;  %v5649_v58 = vcombine.high %v1691_v50, %v1695_v51 }
 0x224   : > { %3761 = vmatpush1.bf16.msra.mxu1 %v1548_v54  ;;  %4050 = vmatpush1.bf16.msra.mxu0 %v1564_v24  ;;  %v5640_v54 = vcombine.low %v1683_v30, %v1687_v31  ;;  %v5710_v12 = vcombine.low %v1754_v48, %v1758_v49  ;;  %v5648_v13 = vcombine.low %v1691_v50, %v1695_v51  ;;  %v1719_v48 = vld [vmem:[%s7251_s13 + $0x268] sm:$0xff] }
 0x225   : > { %v6392_v59 = vpop.f32.mrb[72].mxu0  ;;  %3762 = vmatprep.subr.bf16.mxu1 %v6976_v35  ;;  %4051 = vmatprep.subr.bf16.mxu0 %v6976_v35 }
 0x226   : > { %v1291_v62 = vpop.f32.mrb[73].mxu0 }
 0x227   : > { %v6393_v4 = vpop.f32.mrb[74].mxu0 }
 0x228   : > { %v1551_v5 = vpack.c.bf16 %v6393_v4, %v6392_v59  ;;  %3763 = vmatpush1.bf16.msra.mxu1 %v1549_v52  ;;  %v1294_v6 = vpop.f32.mrb[75].mxu0  ;;  %4052 = vmatpush1.bf16.msra.mxu0 %v1565_v18  ;;  %v1435_v52 = vpop.f32.mrb[13].mxu1  ;;  %v1762_v4 = vld [vmem:[%s7251_s13 + $0x3c0] sm:$0xff] }
 0x229   : > { %v1550_v7 = vpack.c.bf16 %v1294_v6, %v1291_v62  ;;  %3764 = vmatprep.subr.bf16.mxu1 %v6976_v35  ;;  %4053 = vmatprep.subr.bf16.mxu0 %v6976_v35  ;;  %v6429_v56 = vpop.f32.mrb[14].mxu1  ;;  %v1699_v6 = vld [vmem:[%s7251_s13 + $0x1c8] sm:$0xff] }
 0x22a   : > { %3291 = vmatmul.mubr.bf16.gmra.mrb[72].mxu1 %v5678_v60  ;;  %3516 = vmatmul.mubr.bf16.gmra.mrb[104].mxu0 %v5616_v61  ;;  %v1438_v60 = vpop.f32.mrb[15].mxu1  ;;  %v1569_v8 = vpack.c.bf16 %v6429_v56, %v6428_v17  ;;  %v1786_v56 = vld [vmem:[%s7251_s13 + $0x480] sm:$0xff] }
 0x22b   : > { %3298 = vmatprep.mubr.bf16.mxu1 %v5687_v1  ;;  %3523 = vmatprep.mubr.bf16.mxu0 %v5625_v2  ;;  %v1568_v1 = vpack.c.bf16 %v1438_v60, %v1435_v52  ;;  %v6432_v9 = vpop.f32.mrb[16].mxu1 }
 0x22c   : > { %3765 = vmatpush1.bf16.msra.mxu1 %v1550_v7  ;;  %4054 = vmatpush1.bf16.msra.mxu0 %v1566_v46  ;;  %v1703_v7 = vld [vmem:[%s7251_s13 + $0x1e8] sm:$0xff]  ;;  %v1451_v11 = vpop.f32.mrb[17].mxu1  ;;  %v1782_v46 = vld [vmem:[%s7251_s13 + $0x460] sm:$0xff] }
 0x22d   : > { %v6396_v16 = vpop.f32.mrb[76].mxu0  ;;  %3766 = vmatprep.subr.bf16.mxu1 %v6976_v35  ;;  %4055 = vmatprep.subr.bf16.mxu0 %v6976_v35  ;;  %v5657_v19 = vcombine.high %v1699_v6, %v1703_v7 }
 0x22e   : > { %v1307_v23 = vpop.f32.mrb[77].mxu0 }
 0x22f   : > { %v6397_v0 = vpop.f32.mrb[78].mxu0 }
 0x230   : > { %v1553_v3 = vpack.c.bf16 %v6397_v0, %v6396_v16  ;;  %3767 = vmatpush1.bf16.msra.mxu1 %v1551_v5  ;;  %v1310_v26 = vpop.f32.mrb[79].mxu0  ;;  %4056 = vmatpush1.bf16.msra.mxu0 %v1567_v15  ;;  %v1766_v5 = vld [vmem:[%s7251_s13 + $0x3e0] sm:$0xff]  ;;  %v6433_v16 = vpop.f32.mrb[18].mxu1 }
 0x231   : > { %v1552_v27 = vpack.c.bf16 %v1310_v26, %v1307_v23  ;;  %3768 = vmatprep.subr.bf16.mxu1 %v6976_v35  ;;  %4057 = vmatprep.subr.bf16.mxu0 %v6976_v35  ;;  %v5719_v18 = vcombine.high %v1762_v4, %v1766_v5  ;;  %v1770_v0 = vld [vmem:[%s7251_s13 + $0x400] sm:$0xff]  ;;  %v1707_v26 = vld [vmem:[%s7251_s13 + $0x208] sm:$0xff]  ;;  %v1571_v28 = vpack.c.bf16 %v6433_v16, %v6432_v9 }
 0x232   : > { %3299 = vmatmul.mubr.bf16.gmra.mrb[76].mxu1 %v5686_v21  ;;  %3524 = vmatmul.mubr.bf16.gmra.mrb[108].mxu0 %v5624_v22  ;;  %v1454_v22 = vpop.f32.mrb[19].mxu1  ;;  %v5718_v32 = vcombine.low %v1762_v4, %v1766_v5  ;;  %v1794_v9 = vld [vmem:[%s7251_s13 + $0x4c0] sm:$0xff] }
 0x233   : > { %3306 = vmatprep.mubr.bf16.mxu1 %v5695_v25  ;;  %3531 = vmatprep.mubr.bf16.mxu0 %v5633_v63  ;;  %v1570_v25 = vpack.c.bf16 %v1454_v22, %v1451_v11  ;;  %v6436_v29 = vpop.f32.mrb[20].mxu1  ;;  %v1731_v11 = vld [vmem:[%s7251_s13 + $0x2c8] sm:$0xff]  ;;  %v1806_v22 = vld [vmem:[%s7251_s13 + $0x520] sm:$0xff] }
 0x234   : > { %3769 = vmatpush1.bf16.msra.mxu1 %v1552_v27  ;;  %4058 = vmatpush1.bf16.msra.mxu0 %v1568_v1  ;;  %v1711_v27 = vld [vmem:[%s7251_s13 + $0x228] sm:$0xff]  ;;  %v1467_v31 = vpop.f32.mrb[21].mxu1 }
 0x235   : > { %v6400_v33 = vpop.f32.mrb[80].mxu0  ;;  %3770 = vmatprep.subr.bf16.mxu1 %v6976_v35  ;;  %4059 = vmatprep.subr.bf16.mxu0 %v6976_v35  ;;  %v5664_v17 = vcombine.low %v1707_v26, %v1711_v27 }
 0x236   : > { %v1323_v38 = vpop.f32.mrb[81].mxu0 }
 0x237   : > { %v6401_v42 = vpop.f32.mrb[82].mxu0 }
 0x238   : > { %v1555_v44 = vpack.c.bf16 %v6401_v42, %v6400_v33  ;;  %3771 = vmatpush1.bf16.msra.mxu1 %v1553_v3  ;;  %v1326_v45 = vpop.f32.mrb[83].mxu0  ;;  %4060 = vmatpush1.bf16.msra.mxu0 %v1569_v8  ;;  %v1774_v3 = vld [vmem:[%s7251_s13 + $0x420] sm:$0xff]  ;;  %v5656_v33 = vcombine.low %v1699_v6, %v1703_v7 }
 0x239   : > { %v1554_v47 = vpack.c.bf16 %v1326_v45, %v1323_v38  ;;  %3772 = vmatprep.subr.bf16.mxu1 %v6976_v35  ;;  %4061 = vmatprep.subr.bf16.mxu0 %v6976_v35  ;;  %v5665_v38 = vcombine.high %v1707_v26, %v1711_v27  ;;  %v1778_v45 = vld [vmem:[%s7251_s13 + $0x440] sm:$0xff]  ;;  %v5726_v15 = vcombine.low %v1770_v0, %v1774_v3  ;;  %v1747_v27 = vld [vmem:[%s7251_s13 + $0x348] sm:$0xff] }
 0x23a   : > { %3307 = vmatmul.mubr.bf16.gmra.mrb[80].mxu1 %v5694_v36  ;;  %3532 = vmatmul.mubr.bf16.gmra.mrb[112].mxu0 %v5632_v37  ;;  %v6437_v36 = vpop.f32.mrb[22].mxu1  ;;  %v5727_v37 = vcombine.high %v1770_v0, %v1774_v3  ;;  %v5735_v52 = vcombine.high %v1778_v45, %v1782_v46  ;;  %v5734_v1 = vcombine.low %v1778_v45, %v1782_v46  ;;  %v1810_v3 = vld [vmem:[%s7251_s13 + $0x540] sm:$0xff]  ;;  %v1767_v45 = vld [vmem:[%s7251_s13 + $0x3e8] sm:$0xff] }
 0x23b   : > { %3314 = vmatprep.mubr.bf16.mxu1 %v5703_v40  ;;  %3539 = vmatprep.mubr.bf16.mxu0 %v5641_v41  ;;  %v1470_v40 = vpop.f32.mrb[23].mxu1  ;;  %v1573_v49 = vpack.c.bf16 %v6437_v36, %v6436_v29  ;;  %v1814_v26 = vld [vmem:[%s7251_s13 + $0x560] sm:$0xff]  ;;  %v1755_v36 = vld [vmem:[%s7251_s13 + $0x388] sm:$0xff] }
 0x23c   : > { %3773 = vmatpush1.bf16.msra.mxu1 %v1554_v47  ;;  %4062 = vmatpush1.bf16.msra.mxu0 %v1570_v25  ;;  %v1572_v43 = vpack.c.bf16 %v1470_v40, %v1467_v31  ;;  %v1715_v47 = vld [vmem:[%s7251_s13 + $0x248] sm:$0xff]  ;;  %v6440_v50 = vpop.f32.mrb[24].mxu1  ;;  %v5767_v31 = vcombine.high %v1810_v3, %v1814_v26 }
 0x23d   : > { %v6404_v20 = vpop.f32.mrb[84].mxu0  ;;  %3774 = vmatprep.subr.bf16.mxu1 %v6976_v35  ;;  %4063 = vmatprep.subr.bf16.mxu0 %v6976_v35  ;;  %v1483_v51 = vpop.f32.mrb[25].mxu1 }
 0x23e   : > { %v1339_v55 = vpop.f32.mrb[85].mxu0 }
 0x23f   : > { %v6405_v59 = vpop.f32.mrb[86].mxu0 }
 0x240   : > { %v1557_v61 = vpack.c.bf16 %v6405_v59, %v6404_v20  ;;  %3775 = vmatpush1.bf16.msra.mxu1 %v1555_v44  ;;  %v1342_v62 = vpop.f32.mrb[87].mxu0  ;;  %4064 = vmatpush1.bf16.msra.mxu0 %v1571_v28  ;;  %v6441_v20 = vpop.f32.mrb[26].mxu1  ;;  %v1727_v59 = vld [vmem:[%s7251_s13 + $0x2a8] sm:$0xff] }
 0x241   : > { %v1556_v2 = vpack.c.bf16 %v1342_v62, %v1339_v55  ;;  %3776 = vmatprep.subr.bf16.mxu1 %v6976_v35  ;;  %4065 = vmatprep.subr.bf16.mxu0 %v6976_v35  ;;  %v1575_v60 = vpack.c.bf16 %v6441_v20, %v6440_v50  ;;  %v1751_v28 = vld [vmem:[%s7251_s13 + $0x368] sm:$0xff]  ;;  %v1834_v50 = vld [vmem:[%s7251_s13 + $0x600] sm:$0xff] }
 0x242   : > { %3315 = vmatmul.mubr.bf16.gmra.mrb[84].mxu1 %v5702_v53  ;;  %3540 = vmatmul.mubr.bf16.gmra.mrb[116].mxu0 %v5640_v54  ;;  %v5673_v53 = vcombine.high %v1715_v47, %v1719_v48  ;;  %v1486_v54 = vpop.f32.mrb[27].mxu1 }
 0x243   : > { %3322 = vmatprep.mubr.bf16.mxu1 %v5711_v57  ;;  %3547 = vmatprep.mubr.bf16.mxu0 %v5649_v58  ;;  %v1574_v55 = vpack.c.bf16 %v1486_v54, %v1483_v51  ;;  %v1790_v57 = vld [vmem:[%s7251_s13 + $0x4a0] sm:$0xff]  ;;  %v1723_v58 = vld [vmem:[%s7251_s13 + $0x288] sm:$0xff] }
 0x244   : > { %3777 = vmatpush1.bf16.msra.mxu1 %v1556_v2  ;;  %4066 = vmatpush1.bf16.msra.mxu0 %v1572_v43  ;;  %v5672_v2 = vcombine.low %v1715_v47, %v1719_v48  ;;  %v5743_v5 = vcombine.high %v1786_v56, %v1790_v57  ;;  %v5681_v6 = vcombine.high %v1723_v58, %v1727_v59  ;;  %v1830_v43 = vld [vmem:[%s7251_s13 + $0x5e0] sm:$0xff] }
 0x245   : > { %v6408_v10 = vpop.f32.mrb[88].mxu0  ;;  %3778 = vmatprep.subr.bf16.mxu1 %v6976_v35  ;;  %4067 = vmatprep.subr.bf16.mxu0 %v6976_v35  ;;  %v5680_v16 = vcombine.low %v1723_v58, %v1727_v59  ;;  %v1838_v51 = vld [vmem:[%s7251_s13 + $0x620] sm:$0xff]  ;;  %v1783_v58 = vld [vmem:[%s7251_s13 + $0x468] sm:$0xff] }
 0x246   : > { %v1355_v14 = vpop.f32.mrb[89].mxu0  ;;  %v5790_v59 = vcombine.low %v1834_v50, %v1838_v51 }
 0x247   : > { %v6409_v21 = vpop.f32.mrb[90].mxu0 }
 0x248   : > { %v1559_v23 = vpack.c.bf16 %v6409_v21, %v6408_v10  ;;  %3779 = vmatpush1.bf16.msra.mxu1 %v1557_v61  ;;  %v1358_v24 = vpop.f32.mrb[91].mxu0  ;;  %4068 = vmatpush1.bf16.msra.mxu0 %v1573_v49  ;;  %v6444_v61 = vpop.f32.mrb[28].mxu1  ;;  %v1798_v10 = vld [vmem:[%s7251_s13 + $0x4e0] sm:$0xff] }
 0x249   : > { %v1558_v63 = vpack.c.bf16 %v1358_v24, %v1355_v14  ;;  %3780 = vmatprep.subr.bf16.mxu1 %v6976_v35  ;;  %4069 = vmatprep.subr.bf16.mxu0 %v6976_v35  ;;  %v1499_v62 = vpop.f32.mrb[29].mxu1  ;;  %v5742_v14 = vcombine.low %v1786_v56, %v1790_v57  ;;  %v1802_v21 = vld [vmem:[%s7251_s13 + $0x500] sm:$0xff]  ;;  %v1743_v24 = vld [vmem:[%s7251_s13 + $0x328] sm:$0xff]  ;;  %v5750_v25 = vcombine.low %v1794_v9, %v1798_v10 }
 0x24a   : > { %3323 = vmatmul.mubr.bf16.gmra.mrb[88].mxu1 %v5710_v12  ;;  %3548 = vmatmul.mubr.bf16.gmra.mrb[120].mxu0 %v5648_v13  ;;  %v6445_v4 = vpop.f32.mrb[30].mxu1  ;;  %v1735_v12 = vld [vmem:[%s7251_s13 + $0x2e8] sm:$0xff]  ;;  %v5758_v29 = vcombine.low %v1802_v21, %v1806_v22  ;;  %v1846_v56 = vld [vmem:[%s7251_s13 + $0x660] sm:$0xff] }
 0x24b   : > { %3330 = vmatprep.mubr.bf16.mxu1 %v5719_v18  ;;  %3555 = vmatprep.mubr.bf16.mxu0 %v5657_v19  ;;  %v1502_v7 = vpop.f32.mrb[31].mxu1  ;;  %v1577_v13 = vpack.c.bf16 %v6445_v4, %v6444_v61  ;;  %v5751_v18 = vcombine.high %v1794_v9, %v1798_v10  ;;  %v5689_v19 = vcombine.high %v1731_v11, %v1735_v12  ;;  %v1779_v57 = vld [vmem:[%s7251_s13 + $0x448] sm:$0xff]  ;;  %v1858_v10 = vld [vmem:[%s7251_s13 + $0x6c0] sm:$0xff] }
 0x24c   : > { %3781 = vmatpush1.bf16.msra.mxu1 %v1558_v63  ;;  %4070 = vmatpush1.bf16.msra.mxu0 %v1574_v55  ;;  %v1576_v8 = vpack.c.bf16 %v1502_v7, %v1499_v62  ;;  %v5688_v63 = vcombine.low %v1731_v11, %v1735_v12  ;;  %v1842_v55 = vld [vmem:[%s7251_s13 + $0x640] sm:$0xff]  ;;  %v5737_v62 = vcombine.high %v1779_v57, %v1783_v58  ;;  %v1787_v4 = vld [vmem:[%s7251_s13 + $0x488] sm:$0xff] }
 0x24d   : > { %v6412_v30 = vpop.f32.mrb[92].mxu0  ;;  %3782 = vmatprep.subr.bf16.mxu1 %v6976_v35  ;;  %4071 = vmatprep.subr.bf16.mxu0 %v6976_v35  ;;  %v5799_v61 = vcombine.high %v1842_v55, %v1846_v56  ;;  %v5736_v7 = vcombine.low %v1779_v57, %v1783_v58  ;;  %v1862_v11 = vld [vmem:[%s7251_s13 + $0x6e0] sm:$0xff]  ;;  %v1795_v12 = vld [vmem:[%s7251_s13 + $0x4c8] sm:$0xff] }
 0x24e   : > { %v1371_v34 = vpop.f32.mrb[93].mxu0 }
 0x24f   : > { %v6413_v39 = vpop.f32.mrb[94].mxu0 }
 0x250   : > { %v1561_v41 = vpack.c.bf16 %v6413_v39, %v6412_v30  ;;  %3783 = vmatpush1.bf16.msra.mxu1 %v1559_v23  ;;  %v1374_v42 = vpop.f32.mrb[95].mxu0  ;;  %4072 = vmatpush1.bf16.msra.mxu0 %v1575_v60  ;;  %v1739_v23 = vld [vmem:[%s7251_s13 + $0x308] sm:$0xff]  ;;  %v5704_v39 = vcombine.low %v1747_v27, %v1751_v28 }
 0x251   : > { %v1560_v44 = vpack.c.bf16 %v1374_v42, %v1371_v34  ;;  %3784 = vmatprep.subr.bf16.mxu1 %v6976_v35  ;;  %4073 = vmatprep.subr.bf16.mxu0 %v6976_v35  ;;  %v5697_v0 = vcombine.high %v1739_v23, %v1743_v24  ;;  %v5696_v30 = vcombine.low %v1739_v23, %v1743_v24  ;;  %v1822_v34 = vld [vmem:[%s7251_s13 + $0x5a0] sm:$0xff]  ;;  %v1803_v23 = vld [vmem:[%s7251_s13 + $0x508] sm:$0xff] }
 0x252   : > { %3331 = vmatmul.mubr.bf16.gmra.mrb[92].mxu1 %v5718_v32  ;;  %3556 = vmatmul.mubr.bf16.gmra.mrb[124].mxu0 %v5656_v33  ;;  %v5705_v32 = vcombine.high %v1747_v27, %v1751_v28  ;;  %v1818_v33 = vld [vmem:[%s7251_s13 + $0x580] sm:$0xff]  ;;  %v1807_v24 = vld [vmem:[%s7251_s13 + $0x528] sm:$0xff] }
 0x253   : > { %3338 = vmatprep.mubr.bf16.mxu1 %v5727_v37  ;;  %3563 = vmatprep.mubr.bf16.mxu0 %v5665_v38  ;;  %v1759_v37 = vld [vmem:[%s7251_s13 + $0x3a8] sm:$0xff]  ;;  %v5766_v38 = vcombine.low %v1810_v3, %v1814_v26  ;;  %v5775_v40 = vcombine.high %v1818_v33, %v1822_v34  ;;  %v1826_v42 = vld [vmem:[%s7251_s13 + $0x5c0] sm:$0xff]  ;;  %v5774_v46 = vcombine.low %v1818_v33, %v1822_v34 }
 0x254   : > { %3785 = vmatpush1.bf16.msra.mxu1 %v1560_v44  ;;  %4074 = vmatpush1.bf16.msra.mxu0 %v1576_v8  ;;  %v1763_v44 = vld [vmem:[%s7251_s13 + $0x3c8] sm:$0xff]  ;;  %v5712_v47 = vcombine.low %v1755_v36, %v1759_v37  ;;  %v5783_v48 = vcombine.high %v1826_v42, %v1830_v43  ;;  %v5782_v20 = vcombine.low %v1826_v42, %v1830_v43  ;;  %v1882_v42 = vld [vmem:[%s7251_s13 + $0x780] sm:$0xff] }
 0x255   : > { %3786 = vmatprep.subr.bf16.mxu1 %v6976_v35  ;;  %4075 = vmatprep.subr.bf16.mxu0 %v6976_v35  ;;  %v5759_v35 = vcombine.high %v1802_v21, %v1806_v22  ;;  %v5721_v49 = vcombine.high %v1763_v44, %v1767_v45  ;;  %v1866_v21 = vld [vmem:[%s7251_s13 + $0x700] sm:$0xff]  ;;  %v5761_v26 = vcombine.high %v1803_v23, %v1807_v24 }
 0x256   : > { %v1870_v22 = vld [vmem:[%s7251_s13 + $0x720] sm:$0xff] }
 0x257   : > { %v5823_v3 = vcombine.high %v1866_v21, %v1870_v22  ;;  %v5822_v34 = vcombine.low %v1866_v21, %v1870_v22  ;;  %v1886_v43 = vld [vmem:[%s7251_s13 + $0x7a0] sm:$0xff] }
 0x258   : > { %3787 = vmatpush1.bf16.msra.mxu1 %v1561_v41  ;;  %4076 = vmatpush1.bf16.msra.mxu0 %v1577_v13  ;;  %v5713_v41 = vcombine.high %v1755_v36, %v1759_v37  ;;  %v1799_v13 = vld [vmem:[%s7251_s13 + $0x4e8] sm:$0xff]  ;;  %v5760_v36 = vcombine.low %v1803_v23, %v1807_v24 }
 0x25a   : > { %3339 = vmatmul.mubr.bf16.gmra.mrb[96].mxu1 %v5726_v15  ;;  %3564 = vmatmul.mubr.bf16.gmra.mrb[128].mxu0 %v5664_v17  ;;  %v1771_v15 = vld [vmem:[%s7251_s13 + $0x408] sm:$0xff] }
 0x25b   : > { %3346 = vmatprep.mubr.bf16.mxu1 %v5735_v52  ;;  %3571 = vmatprep.mubr.bf16.mxu0 %v5673_v53  ;;  %v1775_v17 = vld [vmem:[%s7251_s13 + $0x428] sm:$0xff]  ;;  %v5720_v52 = vcombine.low %v1763_v44, %v1767_v45  ;;  %v5791_v53 = vcombine.high %v1834_v50, %v1838_v51  ;;  %v5839_v50 = vcombine.high %v1882_v42, %v1886_v43 }
 0x25c   : > { %v5729_v54 = vcombine.high %v1771_v15, %v1775_v17  ;;  %v5728_v60 = vcombine.low %v1771_v15, %v1775_v17  ;;  %v1819_v44 = vld [vmem:[%s7251_s13 + $0x588] sm:$0xff] }
 0x25d   : > { %v1823_v45 = vld [vmem:[%s7251_s13 + $0x5a8] sm:$0xff] }
 0x25e   : > { %v5777_v51 = vcombine.high %v1819_v44, %v1823_v45  ;;  %v5776_v57 = vcombine.low %v1819_v44, %v1823_v45  ;;  %v1668_v44 = vld [vmem:[%s7251_s13 + $0xd0] sm:$0xff] }
 0x25f   : > { %v1672_v45 = vld [vmem:[%s7251_s13 + $0xf0] sm:$0xff] }
 0x262   : > { %3347 = vmatmul.mubr.bf16.gmra.mrb[100].mxu1 %v5734_v1  ;;  %3572 = vmatmul.mubr.bf16.gmra.mrb[132].mxu0 %v5672_v2  ;;  %v1850_v1 = vld [vmem:[%s7251_s13 + $0x680] sm:$0xff] }
 0x263   : > { %3354 = vmatprep.mubr.bf16.mxu1 %v5743_v5  ;;  %3579 = vmatprep.mubr.bf16.mxu0 %v5681_v6  ;;  %v1854_v2 = vld [vmem:[%s7251_s13 + $0x6a0] sm:$0xff]  ;;  %v1791_v5 = vld [vmem:[%s7251_s13 + $0x4a8] sm:$0xff]  ;;  %v5798_v6 = vcombine.low %v1842_v55, %v1846_v56  ;;  %v5838_v56 = vcombine.low %v1882_v42, %v1886_v43 }
 0x264   : > { %v5807_v8 = vcombine.high %v1850_v1, %v1854_v2  ;;  %v5745_v9 = vcombine.high %v1787_v4, %v1791_v5  ;;  %v1859_v42 = vld [vmem:[%s7251_s13 + $0x6c8] sm:$0xff] }
 0x265   : > { %v1863_v43 = vld [vmem:[%s7251_s13 + $0x6e8] sm:$0xff] }
 0x26a   : > { %3355 = vmatmul.mubr.bf16.gmra.mrb[104].mxu1 %v5742_v14  ;;  %3580 = vmatmul.mubr.bf16.gmra.mrb[136].mxu0 %v5680_v16  ;;  %v5806_v14 = vcombine.low %v1850_v1, %v1854_v2  ;;  %v5744_v16 = vcombine.low %v1787_v4, %v1791_v5  ;;  %v1835_v1 = vld [vmem:[%s7251_s13 + $0x608] sm:$0xff]  ;;  %v1644_v4 = vld [vmem:[%s7251_s13 + $0x10] sm:$0xff] }
 0x26b   : > { %3362 = vmatprep.mubr.bf16.mxu1 %v5751_v18  ;;  %3587 = vmatprep.mubr.bf16.mxu0 %v5689_v19  ;;  %v5815_v18 = vcombine.high %v1858_v10, %v1862_v11  ;;  %v5753_v19 = vcombine.high %v1795_v12, %v1799_v13  ;;  %v1839_v2 = vld [vmem:[%s7251_s13 + $0x628] sm:$0xff]  ;;  %v1648_v5 = vld [vmem:[%s7251_s13 + $0x30] sm:$0xff] }
 0x26c   : > { %v5602_v22 = vcombine.low %v1644_v4, %v1648_v5  ;;  %v5792_v23 = vcombine.low %v1835_v1, %v1839_v2 }
 0x272   : > { %3363 = vmatmul.mubr.bf16.gmra.mrb[108].mxu1 %v5750_v25  ;;  %3588 = vmatmul.mubr.bf16.gmra.mrb[140].mxu0 %v5688_v63  ;;  %v5814_v63 = vcombine.low %v1858_v10, %v1862_v11  ;;  %v5793_v10 = vcombine.high %v1835_v1, %v1839_v2  ;;  %v5603_v11 = vcombine.high %v1644_v4, %v1648_v5 }
 0x273   : > { %3370 = vmatprep.mubr.bf16.mxu1 %v5759_v35  ;;  %3595 = vmatprep.mubr.bf16.mxu0 %v5697_v0  ;;  %v5752_v35 = vcombine.low %v1795_v12, %v1799_v13 }
 0x27a   : > { %3371 = vmatmul.mubr.bf16.gmra.mrb[112].mxu1 %v5758_v29  ;;  %3596 = vmatmul.mubr.bf16.gmra.mrb[144].mxu0 %v5696_v30  ;;  %v1874_v29 = vld [vmem:[%s7251_s13 + $0x740] sm:$0xff] }
 0x27b   : > { %3378 = vmatprep.mubr.bf16.mxu1 %v5767_v31  ;;  %3603 = vmatprep.mubr.bf16.mxu0 %v5705_v32  ;;  %v1878_v30 = vld [vmem:[%s7251_s13 + $0x760] sm:$0xff]  ;;  %v1811_v31 = vld [vmem:[%s7251_s13 + $0x548] sm:$0xff] }
 0x27c   : > { %v1815_v32 = vld [vmem:[%s7251_s13 + $0x568] sm:$0xff] }
 0x282   : > { %3379 = vmatmul.mubr.bf16.gmra.mrb[116].mxu1 %v5766_v38  ;;  %3604 = vmatmul.mubr.bf16.gmra.mrb[148].mxu0 %v5704_v39  ;;  %v5831_v38 = vcombine.high %v1874_v29, %v1878_v30  ;;  %v5769_v39 = vcombine.high %v1811_v31, %v1815_v32 }
 0x283   : > { %3386 = vmatprep.mubr.bf16.mxu1 %v5775_v40  ;;  %3611 = vmatprep.mubr.bf16.mxu0 %v5713_v41 }
 0x28a   : > { %3387 = vmatmul.mubr.bf16.gmra.mrb[120].mxu1 %v5774_v46  ;;  %3612 = vmatmul.mubr.bf16.gmra.mrb[152].mxu0 %v5712_v47  ;;  %v5830_v47 = vcombine.low %v1874_v29, %v1878_v30  ;;  %v1660_v29 = vld [vmem:[%s7251_s13 + $0x90] sm:$0xff] }
 0x28b   : > { %3394 = vmatprep.mubr.bf16.mxu1 %v5783_v48  ;;  %3619 = vmatprep.mubr.bf16.mxu0 %v5721_v49  ;;  %v5768_v48 = vcombine.low %v1811_v31, %v1815_v32  ;;  %v1664_v30 = vld [vmem:[%s7251_s13 + $0xb0] sm:$0xff] }
 0x292   : > { %3395 = vmatmul.mubr.bf16.gmra.mrb[124].mxu1 %v5782_v20  ;;  %3620 = vmatmul.mubr.bf16.gmra.mrb[156].mxu0 %v5720_v52  ;;  %v1890_v20 = vld [vmem:[%s7251_s13 + $0x7c0] sm:$0xff] }
 0x293   : > { %3402 = vmatprep.mubr.bf16.mxu1 %v5791_v53  ;;  %3627 = vmatprep.mubr.bf16.mxu0 %v5729_v54  ;;  %v1894_v52 = vld [vmem:[%s7251_s13 + $0x7e0] sm:$0xff]  ;;  %v1827_v53 = vld [vmem:[%s7251_s13 + $0x5c8] sm:$0xff] }
 0x294   : > { %v1831_v54 = vld [vmem:[%s7251_s13 + $0x5e8] sm:$0xff] }
 0x29a   : > { %3403 = vmatmul.mubr.bf16.gmra.mrb[128].mxu1 %v5790_v59  ;;  %3628 = vmatmul.mubr.bf16.gmra.mrb[160].mxu0 %v5728_v60  ;;  %v5847_v59 = vcombine.high %v1890_v20, %v1894_v52  ;;  %v5785_v60 = vcombine.high %v1827_v53, %v1831_v54 }
 0x29b   : > { %3410 = vmatprep.mubr.bf16.mxu1 %v5799_v61  ;;  %3635 = vmatprep.mubr.bf16.mxu0 %v5737_v62 }
 0x2a2   : > { %3411 = vmatmul.mubr.bf16.gmra.mrb[132].mxu1 %v5798_v6  ;;  %3636 = vmatmul.mubr.bf16.gmra.mrb[164].mxu0 %v5736_v7  ;;  %v5846_v7 = vcombine.low %v1890_v20, %v1894_v52 }
 0x2a3   : > { %3418 = vmatprep.mubr.bf16.mxu1 %v5807_v8  ;;  %3643 = vmatprep.mubr.bf16.mxu0 %v5745_v9  ;;  %v5784_v8 = vcombine.low %v1827_v53, %v1831_v54  ;;  %v1867_v53 = vld [vmem:[%s7251_s13 + $0x708] sm:$0xff] }
 0x2a4   : > { %v1871_v54 = vld [vmem:[%s7251_s13 + $0x728] sm:$0xff] }
 0x2a5   : > { %v5825_v5 = vcombine.high %v1867_v53, %v1871_v54 }
 0x2aa   : > { %3419 = vmatmul.mubr.bf16.gmra.mrb[136].mxu1 %v5806_v14  ;;  %3644 = vmatmul.mubr.bf16.gmra.mrb[168].mxu0 %v5744_v16  ;;  %v1843_v14 = vld [vmem:[%s7251_s13 + $0x648] sm:$0xff] }
 0x2ab   : > { %3426 = vmatprep.mubr.bf16.mxu1 %v5815_v18  ;;  %3651 = vmatprep.mubr.bf16.mxu0 %v5753_v19  ;;  %v1847_v16 = vld [vmem:[%s7251_s13 + $0x668] sm:$0xff]  ;;  %v1652_v18 = vld [vmem:[%s7251_s13 + $0x50] sm:$0xff] }
 0x2ac   : > { %v1656_v19 = vld [vmem:[%s7251_s13 + $0x70] sm:$0xff]  ;;  %v5800_v32 = vcombine.low %v1843_v14, %v1847_v16 }
 0x2ad   : > { %v7451_v25 = vpop.f32.mrb[32].mxu1 }
 0x2ae   : > { %v3214_v0 = vpop.f32.mrb[33].mxu1 }
 0x2af   : > { %v7453_v27 = vpop.f32.mrb[34].mxu1 }
 0x2b0   : > { %v3217_v28 = vpop.f32.mrb[35].mxu1 }
 0x2b1   : > { %v1855_v28 = vld [vmem:[%s7251_s13 + $0x6a8] sm:$0xff] }
 0x2b2   : > { %3427 = vmatmul.mubr.bf16.gmra.mrb[140].mxu1 %v5814_v63  ;;  %3652 = vmatmul.mubr.bf16.gmra.mrb[172].mxu0 %v5752_v35  ;;  %v5801_v63 = vcombine.high %v1843_v14, %v1847_v16  ;;  %v5611_v35 = vcombine.high %v1652_v18, %v1656_v19  ;;  %v1875_v14 = vld [vmem:[%s7251_s13 + $0x748] sm:$0xff] }
 0x2b3   : > { %3434 = vmatprep.mubr.bf16.mxu1 %v5823_v3  ;;  %3659 = vmatprep.mubr.bf16.mxu0 %v5761_v26  ;;  %v1851_v26 = vld [vmem:[%s7251_s13 + $0x688] sm:$0xff] }
 0x2b4   : > { %v1879_v16 = vld [vmem:[%s7251_s13 + $0x768] sm:$0xff] }
 0x2b5   : > { %v7459_v33 = vpop.f32.mrb[36].mxu1 }
 0x2b6   : > { %v3222_v37 = vpop.f32.mrb[37].mxu1 }
 0x2b7   : > { %v7461_v40 = vpop.f32.mrb[38].mxu1  ;;  %v5809_v37 = vcombine.high %v1851_v26, %v1855_v28 }
 0x2b8   : > { %v3225_v41 = vpop.f32.mrb[39].mxu1 }
 0x2ba   : > { %3435 = vmatmul.mubr.bf16.gmra.mrb[144].mxu1 %v5822_v34  ;;  %3660 = vmatmul.mubr.bf16.gmra.mrb[176].mxu0 %v5760_v36  ;;  %v5610_v34 = vcombine.low %v1652_v18, %v1656_v19  ;;  %v1688_v18 = vld [vmem:[%s7251_s13 + $0x170] sm:$0xff] }
 0x2bb   : > { %3442 = vmatprep.mubr.bf16.mxu1 %v5831_v38  ;;  %3667 = vmatprep.mubr.bf16.mxu0 %v5769_v39  ;;  %v5619_v38 = vcombine.high %v1660_v29, %v1664_v30 }
 0x2bd   : > { %v7467_v46 = vpop.f32.mrb[40].mxu1 }
 0x2be   : > { %v3230_v49 = vpop.f32.mrb[41].mxu1 }
 0x2bf   : > { %v7469_v15 = vpop.f32.mrb[42].mxu1  ;;  %v5618_v49 = vcombine.low %v1660_v29, %v1664_v30 }
 0x2c0   : > { %v3233_v17 = vpop.f32.mrb[43].mxu1 }
 0x2c1   : > { %v5627_v17 = vcombine.high %v1668_v44, %v1672_v45 }
 0x2c2   : > { %3443 = vmatmul.mubr.bf16.gmra.mrb[148].mxu1 %v5830_v47  ;;  %3668 = vmatmul.mubr.bf16.gmra.mrb[180].mxu0 %v5768_v48  ;;  %v5808_v48 = vcombine.low %v1851_v26, %v1855_v28 }
 0x2c3   : > { %3450 = vmatprep.mubr.bf16.mxu1 %v5839_v50  ;;  %3675 = vmatprep.mubr.bf16.mxu0 %v5777_v51  ;;  %v5817_v51 = vcombine.high %v1859_v42, %v1863_v43 }
 0x2c5   : > { %v7475_v55 = vpop.f32.mrb[44].mxu1 }
 0x2c6   : > { %v3238_v58 = vpop.f32.mrb[45].mxu1 }
 0x2c7   : > { %v7477_v61 = vpop.f32.mrb[46].mxu1 }
 0x2c8   : > { %v3241_v62 = vpop.f32.mrb[47].mxu1 }
 0x2c9   : > { %v5626_v62 = vcombine.low %v1668_v44, %v1672_v45 }
 0x2ca   : > { %3451 = vmatmul.mubr.bf16.gmra.mrb[152].mxu1 %v5838_v56  ;;  %3676 = vmatmul.mubr.bf16.gmra.mrb[184].mxu0 %v5776_v57  ;;  %v1676_v56 = vld [vmem:[%s7251_s13 + $0x110] sm:$0xff] }
 0x2cb   : > { %3458 = vmatprep.mubr.bf16.mxu1 %v5847_v59  ;;  %3683 = vmatprep.mubr.bf16.mxu0 %v5785_v60  ;;  %v1680_v57 = vld [vmem:[%s7251_s13 + $0x130] sm:$0xff]  ;;  %v5816_v60 = vcombine.low %v1859_v42, %v1863_v43  ;;  %v5832_v43 = vcombine.low %v1875_v14, %v1879_v16 }
 0x2cd   : > { %v7483_v6 = vpop.f32.mrb[48].mxu1 }
 0x2ce   : > { %v3246_v9 = vpop.f32.mrb[49].mxu1 }
 0x2cf   : > { %v7485_v12 = vpop.f32.mrb[50].mxu1 }
 0x2d0   : > { %v3249_v13 = vpop.f32.mrb[51].mxu1 }
 0x2d2   : > { %3459 = vmatmul.mubr.bf16.gmra.mrb[156].mxu1 %v5846_v7  ;;  %3684 = vmatmul.mubr.bf16.gmra.mrb[188].mxu0 %v5784_v8  ;;  %v5635_v7 = vcombine.high %v1676_v56, %v1680_v57 }
 0x2d3   : > { %3691 = vmatprep.mubr.bf16.mxu0 %v5793_v10  ;;  %3788 = vmatprep.mubr.bf16.mxu1 %v5603_v11 }
 0x2d5   : > { %v7491_v21 = vpop.f32.mrb[52].mxu1 }
 0x2d6   : > { %v3254_v24 = vpop.f32.mrb[53].mxu1 }
 0x2d7   : > { %v7493_v0 = vpop.f32.mrb[54].mxu1  ;;  %v5634_v24 = vcombine.low %v1676_v56, %v1680_v57  ;;  %v1891_v56 = vld [vmem:[%s7251_s13 + $0x7c8] sm:$0xff] }
 0x2d8   : > { %v3257_v3 = vpop.f32.mrb[55].mxu1  ;;  %v1895_v57 = vld [vmem:[%s7251_s13 + $0x7e8] sm:$0xff] }
 0x2d9   : > { %v5833_v3 = vcombine.high %v1875_v14, %v1879_v16 }
 0x2da   : > { %3692 = vmatmul.mubr.bf16.gmra.mrb[192].mxu0 %v5792_v23  ;;  %3789 = vmatmul.mubr.bf16.vlgmr.msra.gmra.mrb[160].mxu1 %v5602_v22  ;;  %v5824_v23 = vcombine.low %v1867_v53, %v1871_v54 }
 0x2db   : > { %3699 = vmatprep.mubr.bf16.mxu0 %v5801_v63  ;;  %3796 = vmatprep.mubr.bf16.mxu1 %v5611_v35 }
 0x2dd   : > { %v7499_v31 = vpop.f32.mrb[56].mxu1 }
 0x2de   : > { %v3262_v36 = vpop.f32.mrb[57].mxu1 }
 0x2df   : > { %v7501_v39 = vpop.f32.mrb[58].mxu1  ;;  %v1883_v36 = vld [vmem:[%s7251_s13 + $0x788] sm:$0xff] }
 0x2e0   : > { %v3265_v41 = vpop.f32.mrb[59].mxu1 }
 0x2e2   : > { %3700 = vmatmul.mubr.bf16.gmra.mrb[196].mxu0 %v5800_v32  ;;  %3797 = vmatmul.mubr.bf16.gmra.mrb[164].mxu1 %v5610_v34 }
 0x2e3   : > { %3707 = vmatprep.mubr.bf16.mxu0 %v5809_v37  ;;  %3804 = vmatprep.mubr.bf16.mxu1 %v5619_v38  ;;  %v1887_v37 = vld [vmem:[%s7251_s13 + $0x7a8] sm:$0xff]  ;;  %v1696_v38 = vld [vmem:[%s7251_s13 + $0x1b0] sm:$0xff] }
 0x2e5   : > { %v7507_v47 = vpop.f32.mrb[60].mxu1 }
 0x2e6   : > { %v3270_v50 = vpop.f32.mrb[61].mxu1 }
 0x2e7   : > { %v7509_v20 = vpop.f32.mrb[62].mxu1 }
 0x2e8   : > { %v3273_v52 = vpop.f32.mrb[63].mxu1 }
 0x2ea   : > { %3708 = vmatmul.mubr.bf16.gmra.mrb[200].mxu0 %v5808_v48  ;;  %3805 = vmatmul.mubr.bf16.gmra.mrb[168].mxu1 %v5618_v49  ;;  %v5841_v49 = vcombine.high %v1883_v36, %v1887_v37 }
 0x2eb   : > { %3715 = vmatprep.mubr.bf16.mxu0 %v5817_v51  ;;  %3812 = vmatprep.mubr.bf16.mxu1 %v5627_v17 }
 0x2ed   : > { %v7515_v58 = vpop.f32.mrb[64].mxu1  ;;  %v3501_v59 = vpop.f32.mrb[96].mxu0 }
 0x2ee   : > { %v3278_v1 = vpop.f32.mrb[65].mxu1  ;;  %v7518_v2 = vadd.f32 %v3501_v59, %v7451_v25  ;;  %v3503_v4 = vpop.f32.mrb[97].mxu0  ;;  %v1684_v25 = vld [vmem:[%s7251_s13 + $0x150] sm:$0xff] }
 0x2ef   : > { %v7520_v8 = vpop.f32.mrb[66].mxu1  ;;  %v3504_v9 = vpop.f32.mrb[98].mxu0  ;;  %v5643_v26 = vcombine.high %v1684_v25, %v1688_v18  ;;  %v5642_v44 = vcombine.low %v1684_v25, %v1688_v18  ;;  %v1704_v59 = vld [vmem:[%s7251_s13 + $0x1f0] sm:$0xff]  ;;  %v5840_v1 = vcombine.low %v1883_v36, %v1887_v37 }
 0x2f0   : > { %v3281_v10 = vpop.f32.mrb[67].mxu1  ;;  %v7523_v11 = vadd.f32 %v3504_v9, %v7453_v27  ;;  %v3506_v13 = vpop.f32.mrb[99].mxu0  ;;  %v5849_v9 = vcombine.high %v1891_v56, %v1895_v57 }
 0x2f2   : > { %3716 = vmatmul.mubr.bf16.gmra.mrb[204].mxu0 %v5816_v60  ;;  %3813 = vmatmul.mubr.bf16.gmra.mrb[172].mxu1 %v5626_v62 }
 0x2f3   : > { %3723 = vmatprep.mubr.bf16.mxu0 %v5825_v5  ;;  %3820 = vmatprep.mubr.bf16.mxu1 %v5635_v7 }
 0x2f5   : > { %v7529_v19 = vpop.f32.mrb[68].mxu1  ;;  %v3509_v22 = vpop.f32.mrb[100].mxu0 }
 0x2f6   : > { %v3286_v63 = vpop.f32.mrb[69].mxu1  ;;  %v7532_v27 = vadd.f32 %v3509_v22, %v7459_v33  ;;  %v3511_v35 = vpop.f32.mrb[101].mxu0  ;;  %v1692_v33 = vld [vmem:[%s7251_s13 + $0x190] sm:$0xff] }
 0x2f7   : > { %v7534_v28 = vpop.f32.mrb[70].mxu1  ;;  %v3512_v29 = vpop.f32.mrb[102].mxu0  ;;  %v5651_v50 = vcombine.high %v1692_v33, %v1696_v38  ;;  %v5650_v4 = vcombine.low %v1692_v33, %v1696_v38  ;;  %v1708_v22 = vld [vmem:[%s7251_s13 + $0x210] sm:$0xff] }
 0x2f8   : > { %v3289_v30 = vpop.f32.mrb[71].mxu1  ;;  %v7537_v32 = vadd.f32 %v3512_v29, %v7461_v40  ;;  %v3514_v34 = vpop.f32.mrb[103].mxu0 }
 0x2fa   : > { %3724 = vmatmul.mubr.bf16.gmra.mrb[208].mxu0 %v5824_v23  ;;  %3821 = vmatmul.mubr.bf16.gmra.mrb[176].mxu1 %v5634_v24  ;;  %v1712_v23 = vld [vmem:[%s7251_s13 + $0x230] sm:$0xff]  ;;  %v1649_v24 = vld [vmem:[%s7251_s13 + $0x38] sm:$0xff] }
 0x2fb   : > { %3731 = vmatprep.mubr.bf16.mxu0 %v5833_v3  ;;  %3828 = vmatprep.mubr.bf16.mxu1 %v5643_v26  ;;  %v5848_v3 = vcombine.low %v1891_v56, %v1895_v57  ;;  %v5667_v34 = vcombine.high %v1708_v22, %v1712_v23 }
 0x2fd   : > { %v7543_v41 = vpop.f32.mrb[72].mxu1  ;;  %v3517_v42 = vpop.f32.mrb[104].mxu0 }
 0x2fe   : > { %v3294_v45 = vpop.f32.mrb[73].mxu1  ;;  %v7546_v40 = vadd.f32 %v3517_v42, %v7467_v46  ;;  %v3519_v48 = vpop.f32.mrb[105].mxu0  ;;  %v1700_v46 = vld [vmem:[%s7251_s13 + $0x1d0] sm:$0xff] }
 0x2ff   : > { %v7548_v51 = vpop.f32.mrb[74].mxu1  ;;  %v3520_v17 = vpop.f32.mrb[106].mxu0  ;;  %v5659_v10 = vcombine.high %v1700_v46, %v1704_v59  ;;  %v5658_v26 = vcombine.low %v1700_v46, %v1704_v59  ;;  %v1720_v45 = vld [vmem:[%s7251_s13 + $0x270] sm:$0xff]  ;;  %v1657_v48 = vld [vmem:[%s7251_s13 + $0x78] sm:$0xff] }
 0x300   : > { %v3297_v52 = vpop.f32.mrb[75].mxu1  ;;  %v7551_v53 = vadd.f32 %v3520_v17, %v7469_v15  ;;  %v3522_v54 = vpop.f32.mrb[107].mxu0 }
 0x301   : > { %v5666_v52 = vcombine.low %v1708_v22, %v1712_v23 }
 0x302   : > { %3732 = vmatmul.mubr.bf16.gmra.mrb[212].mxu0 %v5832_v43  ;;  %3829 = vmatmul.mubr.bf16.gmra.mrb[180].mxu1 %v5642_v44  ;;  %v1716_v44 = vld [vmem:[%s7251_s13 + $0x250] sm:$0xff] }
 0x303   : > { %3739 = vmatprep.mubr.bf16.mxu0 %v5841_v49  ;;  %3836 = vmatprep.mubr.bf16.mxu1 %v5651_v50  ;;  %v5675_v57 = vcombine.high %v1716_v44, %v1720_v45 }
 0x305   : > { %v7557_v60 = vpop.f32.mrb[76].mxu1  ;;  %v3525_v62 = vpop.f32.mrb[108].mxu0 }
 0x306   : > { %v3302_v5 = vpop.f32.mrb[77].mxu1  ;;  %v7560_v15 = vadd.f32 %v3525_v62, %v7475_v55  ;;  %v3527_v7 = vpop.f32.mrb[109].mxu0  ;;  %v1645_v55 = vld [vmem:[%s7251_s13 + $0x18] sm:$0xff] }
 0x307   : > { %v7562_v13 = vpop.f32.mrb[78].mxu1  ;;  %v3528_v14 = vpop.f32.mrb[110].mxu0  ;;  %v5605_v36 = vcombine.high %v1645_v55, %v1649_v24  ;;  %v5604_v17 = vcombine.low %v1645_v55, %v1649_v24  ;;  %v1724_v7 = vld [vmem:[%s7251_s13 + $0x290] sm:$0xff] }
 0x308   : > { %v3305_v16 = vpop.f32.mrb[79].mxu1  ;;  %v7565_v25 = vadd.f32 %v3528_v14, %v7477_v61  ;;  %v3530_v18 = vpop.f32.mrb[111].mxu0 }
 0x309   : > { %v5674_v18 = vcombine.low %v1716_v44, %v1720_v45 }
 0x30a   : > { %3740 = vmatmul.mubr.bf16.gmra.mrb[216].mxu0 %v5840_v1  ;;  %3837 = vmatmul.mubr.bf16.gmra.mrb[184].mxu1 %v5650_v4 }
 0x30b   : > { %3747 = vmatprep.mubr.bf16.mxu0 %v5849_v9  ;;  %3844 = vmatprep.mubr.bf16.mxu1 %v5659_v10  ;;  %v1728_v9 = vld [vmem:[%s7251_s13 + $0x2b0] sm:$0xff]  ;;  %v1665_v10 = vld [vmem:[%s7251_s13 + $0xb8] sm:$0xff] }
 0x30c   : > { %v5683_v24 = vcombine.high %v1724_v7, %v1728_v9  ;;  %v5682_v45 = vcombine.low %v1724_v7, %v1728_v9  ;;  %v1681_v7 = vld [vmem:[%s7251_s13 + $0x138] sm:$0xff] }
 0x30d   : > { %v7571_v63 = vpop.f32.mrb[80].mxu1  ;;  %v3533_v35 = vpop.f32.mrb[112].mxu0 }
 0x30e   : > { %v3310_v29 = vpop.f32.mrb[81].mxu1  ;;  %v7574_v61 = vadd.f32 %v3533_v35, %v7483_v6  ;;  %v3535_v30 = vpop.f32.mrb[113].mxu0  ;;  %v1653_v6 = vld [vmem:[%s7251_s13 + $0x58] sm:$0xff] }
 0x30f   : > { %v7576_v37 = vpop.f32.mrb[82].mxu1  ;;  %v3536_v33 = vpop.f32.mrb[114].mxu0  ;;  %v5613_v46 = vcombine.high %v1653_v6, %v1657_v48  ;;  %v5612_v22 = vcombine.low %v1653_v6, %v1657_v48 }
 0x310   : > { %v3313_v38 = vpop.f32.mrb[83].mxu1  ;;  %v7579_v42 = vadd.f32 %v3536_v33, %v7485_v12  ;;  %v3538_v43 = vpop.f32.mrb[115].mxu0  ;;  %v1736_v33 = vld [vmem:[%s7251_s13 + $0x2f0] sm:$0xff] }
 0x311   : > { %v1673_v38 = vld [vmem:[%s7251_s13 + $0xf8] sm:$0xff] }
 0x312   : > { %3748 = vmatmul.mubr.bf16.gmra.mrb[220].mxu0 %v5848_v3  ;;  %3845 = vmatmul.mubr.bf16.gmra.mrb[188].mxu1 %v5658_v26 }
 0x313   : > { %3852 = vmatprep.mubr.bf16.mxu1 %v5667_v34  ;;  %4077 = vmatprep.mubr.bf16.mxu0 %v5605_v36  ;;  %v1732_v36 = vld [vmem:[%s7251_s13 + $0x2d0] sm:$0xff] }
 0x315   : > { %v7585_v49 = vpop.f32.mrb[84].mxu1  ;;  %v3541_v50 = vpop.f32.mrb[116].mxu0 }
 0x316   : > { %v3318_v54 = vpop.f32.mrb[85].mxu1  ;;  %v7588_v12 = vadd.f32 %v3541_v50, %v7491_v21  ;;  %v3543_v56 = vpop.f32.mrb[117].mxu0  ;;  %v1661_v21 = vld [vmem:[%s7251_s13 + $0x98] sm:$0xff] }
 0x317   : > { %v7590_v59 = vpop.f32.mrb[86].mxu1  ;;  %v3544_v62 = vpop.f32.mrb[118].mxu0  ;;  %v5621_v35 = vcombine.high %v1661_v21, %v1665_v10  ;;  %v5620_v6 = vcombine.low %v1661_v21, %v1665_v10  ;;  %v5690_v10 = vcombine.low %v1732_v36, %v1736_v33 }
 0x318   : > { %v3321_v1 = vpop.f32.mrb[87].mxu1  ;;  %v7593_v4 = vadd.f32 %v3544_v62, %v7493_v0  ;;  %v3546_v5 = vpop.f32.mrb[119].mxu0 }
 0x319   : > { %v1740_v1 = vld [vmem:[%s7251_s13 + $0x310] sm:$0xff] }
 0x31a   : > { %3853 = vmatmul.mubr.bf16.gmra.mrb[192].mxu1 %v5666_v52  ;;  %4078 = vmatmul.mubr.bf16.vlgmr.msra.gmra.mrb[224].mxu0 %v5604_v17  ;;  %v5691_v17 = vcombine.high %v1732_v36, %v1736_v33  ;;  %v1744_v5 = vld [vmem:[%s7251_s13 + $0x330] sm:$0xff] }
 0x31b   : > { %3860 = vmatprep.mubr.bf16.mxu1 %v5675_v57  ;;  %4085 = vmatprep.mubr.bf16.mxu0 %v5613_v46  ;;  %v1748_v36 = vld [vmem:[%s7251_s13 + $0x350] sm:$0xff] }
 0x31c   : > { %v1752_v33 = vld [vmem:[%s7251_s13 + $0x370] sm:$0xff] }
 0x31d   : > { %v7599_v14 = vpop.f32.mrb[88].mxu1  ;;  %v3549_v16 = vpop.f32.mrb[120].mxu0 }
 0x31e   : > { %v3326_v23 = vpop.f32.mrb[89].mxu1  ;;  %v7602_v0 = vadd.f32 %v3549_v16, %v7499_v31  ;;  %v3551_v55 = vpop.f32.mrb[121].mxu0  ;;  %v1669_v31 = vld [vmem:[%s7251_s13 + $0xd8] sm:$0xff] }
 0x31f   : > { %v7604_v3 = vpop.f32.mrb[90].mxu1  ;;  %v3552_v26 = vpop.f32.mrb[122].mxu0  ;;  %v5629_v52 = vcombine.high %v1669_v31, %v1673_v38  ;;  %v5628_v16 = vcombine.low %v1669_v31, %v1673_v38  ;;  %v5699_v23 = vcombine.high %v1740_v1, %v1744_v5  ;;  %v1689_v31 = vld [vmem:[%s7251_s13 + $0x178] sm:$0xff] }
 0x320   : > { %v3329_v29 = vpop.f32.mrb[91].mxu1  ;;  %v7607_v30 = vadd.f32 %v3552_v26, %v7501_v39  ;;  %v3554_v34 = vpop.f32.mrb[123].mxu0 }
 0x322   : > { %3861 = vmatmul.mubr.bf16.gmra.mrb[196].mxu1 %v5674_v18  ;;  %4086 = vmatmul.mubr.bf16.gmra.mrb[228].mxu0 %v5612_v22 }
 0x323   : > { %3868 = vmatprep.mubr.bf16.mxu1 %v5683_v24  ;;  %4093 = vmatprep.mubr.bf16.mxu0 %v5621_v35 }
 0x325   : > { %v7613_v43 = vpop.f32.mrb[92].mxu1  ;;  %v3557_v44 = vpop.f32.mrb[124].mxu0 }
 0x326   : > { %v3334_v48 = vpop.f32.mrb[93].mxu1  ;;  %v7616_v39 = vadd.f32 %v3557_v44, %v7507_v47  ;;  %v3559_v50 = vpop.f32.mrb[125].mxu0  ;;  %v1677_v47 = vld [vmem:[%s7251_s13 + $0x118] sm:$0xff] }
 0x327   : > { %v7618_v54 = vpop.f32.mrb[94].mxu1  ;;  %v3560_v56 = vpop.f32.mrb[126].mxu0  ;;  %v5637_v55 = vcombine.high %v1677_v47, %v1681_v7 }
 0x328   : > { %v3337_v57 = vpop.f32.mrb[95].mxu1  ;;  %v7621_v46 = vadd.f32 %v3560_v56, %v7509_v20  ;;  %v3562_v62 = vpop.f32.mrb[127].mxu0 }
 0x32a   : > { %3869 = vmatmul.mubr.bf16.gmra.mrb[200].mxu1 %v5682_v45  ;;  %4094 = vmatmul.mubr.bf16.gmra.mrb[232].mxu0 %v5620_v6  ;;  %v5698_v45 = vcombine.low %v1740_v1, %v1744_v5  ;;  %v5636_v6 = vcombine.low %v1677_v47, %v1681_v7  ;;  %v1756_v5 = vld [vmem:[%s7251_s13 + $0x390] sm:$0xff]  ;;  %v1697_v7 = vld [vmem:[%s7251_s13 + $0x1b8] sm:$0xff] }
 0x32b   : > { %3876 = vmatprep.mubr.bf16.mxu1 %v5691_v17  ;;  %4101 = vmatprep.mubr.bf16.mxu0 %v5629_v52  ;;  %v5707_v17 = vcombine.high %v1748_v36, %v1752_v33  ;;  %v1760_v47 = vld [vmem:[%s7251_s13 + $0x3b0] sm:$0xff] }
 0x32d   : > { %v7627_v9 = vpop.f32.mrb[96].mxu1  ;;  %v3565_v21 = vpop.f32.mrb[128].mxu0 }
 0x32e   : > { %v3342_v18 = vpop.f32.mrb[97].mxu1  ;;  %v7630_v20 = vadd.f32 %v3565_v21, %v7515_v58  ;;  %v3567_v22 = vpop.f32.mrb[129].mxu0  ;;  %v1685_v58 = vld [vmem:[%s7251_s13 + $0x158] sm:$0xff] }
 0x32f   : > { %v7632_v24 = vpop.f32.mrb[98].mxu1  ;;  %v3568_v35 = vpop.f32.mrb[130].mxu0  ;;  %v5645_v52 = vcombine.high %v1685_v58, %v1689_v31  ;;  %v5706_v18 = vcombine.low %v1748_v36, %v1752_v33  ;;  %v5644_v22 = vcombine.low %v1685_v58, %v1689_v31  ;;  %v1764_v33 = vld [vmem:[%s7251_s13 + $0x3d0] sm:$0xff]  ;;  %v1705_v31 = vld [vmem:[%s7251_s13 + $0x1f8] sm:$0xff] }
 0x330   : > { %v3345_v26 = vpop.f32.mrb[99].mxu1  ;;  %v7635_v29 = vadd.f32 %v3568_v35, %v7520_v8  ;;  %v3570_v34 = vpop.f32.mrb[131].mxu0  ;;  %v5715_v35 = vcombine.high %v1756_v5, %v1760_v47  ;;  %v1768_v58 = vld [vmem:[%s7251_s13 + $0x3f0] sm:$0xff] }
 0x332   : > { %3877 = vmatmul.mubr.bf16.gmra.mrb[204].mxu1 %v5690_v10  ;;  %4102 = vmatmul.mubr.bf16.gmra.mrb[236].mxu0 %v5628_v16 }
 0x333   : > { %3884 = vmatprep.mubr.bf16.mxu1 %v5699_v23  ;;  %4109 = vmatprep.mubr.bf16.mxu0 %v5637_v55 }
 0x335   : > { %v7641_v38 = vpop.f32.mrb[100].mxu1  ;;  %v3573_v44 = vpop.f32.mrb[132].mxu0 }
 0x336   : > { %v3350_v48 = vpop.f32.mrb[101].mxu1  ;;  %v7644_v8 = vadd.f32 %v3573_v44, %v7529_v19  ;;  %v3575_v50 = vpop.f32.mrb[133].mxu0  ;;  %v1693_v19 = vld [vmem:[%s7251_s13 + $0x198] sm:$0xff] }
 0x337   : > { %v7646_v56 = vpop.f32.mrb[102].mxu1  ;;  %v3576_v57 = vpop.f32.mrb[134].mxu0  ;;  %v5653_v26 = vcombine.high %v1693_v19, %v1697_v7 }
 0x338   : > { %v3353_v62 = vpop.f32.mrb[103].mxu1  ;;  %v7649_v21 = vadd.f32 %v3576_v57, %v7534_v28  ;;  %v3578_v1 = vpop.f32.mrb[135].mxu0 }
 0x339   : > { %v5723_v1 = vcombine.high %v1764_v33, %v1768_v58 }
 0x33a   : > { %3885 = vmatmul.mubr.bf16.gmra.mrb[208].mxu1 %v5698_v45  ;;  %4110 = vmatmul.mubr.bf16.gmra.mrb[240].mxu0 %v5636_v6 }
 0x33b   : > { %3892 = vmatprep.mubr.bf16.mxu1 %v5707_v17  ;;  %4117 = vmatprep.mubr.bf16.mxu0 %v5645_v52  ;;  %v5714_v17 = vcombine.low %v1756_v5, %v1760_v47  ;;  %v5652_v52 = vcombine.low %v1693_v19, %v1697_v7  ;;  %v1772_v47 = vld [vmem:[%s7251_s13 + $0x410] sm:$0xff]  ;;  %v1713_v7 = vld [vmem:[%s7251_s13 + $0x238] sm:$0xff] }
 0x33c   : > { %v1776_v19 = vld [vmem:[%s7251_s13 + $0x430] sm:$0xff] }
 0x33d   : > { %v7655_v10 = vpop.f32.mrb[104].mxu1  ;;  %v3581_v16 = vpop.f32.mrb[136].mxu0 }
 0x33e   : > { %v3358_v23 = vpop.f32.mrb[105].mxu1  ;;  %v7658_v28 = vadd.f32 %v3581_v16, %v7543_v41  ;;  %v3583_v55 = vpop.f32.mrb[137].mxu0  ;;  %v1701_v41 = vld [vmem:[%s7251_s13 + $0x1d8] sm:$0xff] }
 0x33f   : > { %v7660_v34 = vpop.f32.mrb[106].mxu1  ;;  %v3584_v44 = vpop.f32.mrb[138].mxu0  ;;  %v5661_v16 = vcombine.high %v1701_v41, %v1705_v31 }
 0x340   : > { %v3361_v45 = vpop.f32.mrb[107].mxu1  ;;  %v7663_v6 = vadd.f32 %v3584_v44, %v7548_v51  ;;  %v3586_v36 = vpop.f32.mrb[139].mxu0  ;;  %v5722_v44 = vcombine.low %v1764_v33, %v1768_v58  ;;  %v1780_v58 = vld [vmem:[%s7251_s13 + $0x450] sm:$0xff] }
 0x341   : > { %v5660_v45 = vcombine.low %v1701_v41, %v1705_v31  ;;  %v1784_v41 = vld [vmem:[%s7251_s13 + $0x470] sm:$0xff]  ;;  %v1721_v31 = vld [vmem:[%s7251_s13 + $0x278] sm:$0xff] }
 0x342   : > { %3893 = vmatmul.mubr.bf16.gmra.mrb[212].mxu1 %v5706_v18  ;;  %4118 = vmatmul.mubr.bf16.gmra.mrb[244].mxu0 %v5644_v22 }
 0x343   : > { %3900 = vmatprep.mubr.bf16.mxu1 %v5715_v35  ;;  %4125 = vmatprep.mubr.bf16.mxu0 %v5653_v26 }
 0x345   : > { %v7669_v48 = vpop.f32.mrb[108].mxu1  ;;  %v3589_v50 = vpop.f32.mrb[140].mxu0 }
 0x346   : > { %v3366_v57 = vpop.f32.mrb[109].mxu1  ;;  %v7672_v51 = vadd.f32 %v3589_v50, %v7557_v60  ;;  %v3591_v62 = vpop.f32.mrb[141].mxu0  ;;  %v1709_v60 = vld [vmem:[%s7251_s13 + $0x218] sm:$0xff] }
 0x347   : > { %v7674_v18 = vpop.f32.mrb[110].mxu1  ;;  %v3592_v22 = vpop.f32.mrb[142].mxu0 }
 0x348   : > { %v3369_v23 = vpop.f32.mrb[111].mxu1  ;;  %v7677_v55 = vadd.f32 %v3592_v22, %v7562_v13  ;;  %v3594_v5 = vpop.f32.mrb[143].mxu0 }
 0x349   : > { %v5668_v5 = vcombine.low %v1709_v60, %v1713_v7 }
 0x34a   : > { %3901 = vmatmul.mubr.bf16.gmra.mrb[216].mxu1 %v5714_v17  ;;  %4126 = vmatmul.mubr.bf16.gmra.mrb[248].mxu0 %v5652_v52  ;;  %v5731_v17 = vcombine.high %v1772_v47, %v1776_v19  ;;  %v5669_v52 = vcombine.high %v1709_v60, %v1713_v7  ;;  %v1729_v7 = vld [vmem:[%s7251_s13 + $0x2b8] sm:$0xff] }
 0x34b   : > { %3908 = vmatprep.mubr.bf16.mxu1 %v5723_v1  ;;  %4133 = vmatprep.mubr.bf16.mxu0 %v5661_v16 }
 0x34d   : > { %v7683_v35 = vpop.f32.mrb[112].mxu1  ;;  %v3597_v26 = vpop.f32.mrb[144].mxu0 }
 0x34e   : > { %v3374_v36 = vpop.f32.mrb[113].mxu1  ;;  %v7686_v13 = vadd.f32 %v3597_v26, %v7571_v63  ;;  %v3599_v50 = vpop.f32.mrb[145].mxu0  ;;  %v1717_v63 = vld [vmem:[%s7251_s13 + $0x258] sm:$0xff]  ;;  %v5730_v26 = vcombine.low %v1772_v47, %v1776_v19  ;;  %v1788_v47 = vld [vmem:[%s7251_s13 + $0x490] sm:$0xff] }
 0x34f   : > { %v7688_v57 = vpop.f32.mrb[114].mxu1  ;;  %v3600_v62 = vpop.f32.mrb[146].mxu0  ;;  %v5677_v50 = vcombine.high %v1717_v63, %v1721_v31  ;;  %v1792_v19 = vld [vmem:[%s7251_s13 + $0x4b0] sm:$0xff] }
 0x350   : > { %v3377_v1 = vpop.f32.mrb[115].mxu1  ;;  %v7691_v16 = vadd.f32 %v3600_v62, %v7576_v37  ;;  %v3602_v33 = vpop.f32.mrb[147].mxu0 }
 0x352   : > { %3909 = vmatmul.mubr.bf16.gmra.mrb[220].mxu1 %v5722_v44  ;;  %4134 = vmatmul.mubr.bf16.gmra.mrb[252].mxu0 %v5660_v45  ;;  %v5739_v45 = vcombine.high %v1780_v58, %v1784_v41 }
 0x353   : > { %3916 = vmatprep.mubr.bf16.mxu1 %v5731_v17  ;;  %4141 = vmatprep.mubr.bf16.mxu0 %v5669_v52 }
 0x355   : > { %v7697_v22 = vpop.f32.mrb[116].mxu1  ;;  %v3605_v23 = vpop.f32.mrb[148].mxu0 }
 0x356   : > { %v3382_v36 = vpop.f32.mrb[117].mxu1  ;;  %v7700_v37 = vadd.f32 %v3605_v23, %v7585_v49  ;;  %v3607_v44 = vpop.f32.mrb[149].mxu0  ;;  %v1725_v49 = vld [vmem:[%s7251_s13 + $0x298] sm:$0xff] }
 0x357   : > { %v7702_v17 = vpop.f32.mrb[118].mxu1  ;;  %v3608_v52 = vpop.f32.mrb[150].mxu0  ;;  %v5676_v36 = vcombine.low %v1717_v63, %v1721_v31  ;;  %v5738_v44 = vcombine.low %v1780_v58, %v1784_v41  ;;  %v1796_v41 = vld [vmem:[%s7251_s13 + $0x4d0] sm:$0xff]  ;;  %v1733_v31 = vld [vmem:[%s7251_s13 + $0x2d8] sm:$0xff] }
 0x358   : > { %8361 = vst [vmem:[#allocation19_spill] sm:$0xff] %v7700_v37  ;;  %v3385_v62 = vpop.f32.mrb[119].mxu1  ;;  %v7705_v1 = vadd.f32 %v3608_v52, %v7590_v59  ;;  %v3610_v60 = vpop.f32.mrb[151].mxu0  ;;  %v6724_v52 = vld [vmem:[#allocation11] sm:$0xff]   ;;  %v1800_v63 = vld [vmem:[%s7251_s13 + $0x4f0] sm:$0xff] }
 0x359   : > { %6446 = vmatprep.subr.bf16.mxu1 %v6724_v52 }
 0x35a   : > { %8362 = vst [vmem:[#allocation20_spill] sm:$0xff] %v7705_v1  ;;  %3917 = vmatmul.mubr.bf16.gmra.mrb[224].mxu1 %v5730_v26  ;;  %4142 = vmatmul.mubr.bf16.gmra.mrb[0].mxu0 %v5668_v5  ;;  %v5747_v5 = vcombine.high %v1788_v47, %v1792_v19  ;;  %v5685_v26 = vcombine.high %v1725_v49, %v1729_v7 }
 0x35b   : > { %3924 = vmatprep.mubr.bf16.mxu1 %v5739_v45  ;;  %4149 = vmatprep.mubr.bf16.mxu0 %v5677_v50 }
 0x35c   : > { %6447 = vmatpush3.bf16.msra.mxu1 %v6724_v52  ;;  %v5755_v52 = vcombine.high %v1796_v41, %v1800_v63 }
 0x35d   : > { %v7711_v33 = vpop.f32.mrb[120].mxu1  ;;  %v3613_v23 = vpop.f32.mrb[152].mxu0 }
 0x35e   : > { %v3390_v37 = vpop.f32.mrb[121].mxu1  ;;  %v7714_v62 = vadd.f32 %v3613_v23, %v7599_v14  ;;  %v3615_v59 = vpop.f32.mrb[153].mxu0  ;;  %v6725_v14 = vld [vmem:[#allocation11 + $0x8] sm:$0xff]  }
 0x35f   : > { %v7716_v45 = vpop.f32.mrb[122].mxu1  ;;  %v3616_v50 = vpop.f32.mrb[154].mxu0  ;;  %v1737_v37 = vld [vmem:[%s7251_s13 + $0x2f8] sm:$0xff]  ;;  %6448 = vmatprep.subr.bf16.mxu1 %v6725_v14 }
 0x360   : > { %8363 = vst [vmem:[#allocation21_spill] sm:$0xff] %v7714_v62  ;;  %v3393_v60 = vpop.f32.mrb[123].mxu1  ;;  %v7719_v1 = vadd.f32 %v3616_v50, %v7604_v3  ;;  %v3618_v58 = vpop.f32.mrb[155].mxu0  ;;  %6449 = vmatpush3.bf16.msra.mxu1 %v6725_v14  ;;  %v5746_v3 = vcombine.low %v1788_v47, %v1792_v19  ;;  %v1804_v19 = vld [vmem:[%s7251_s13 + $0x510] sm:$0xff] }
 0x361   : > { %v5684_v60 = vcombine.low %v1725_v49, %v1729_v7  ;;  %v1808_v49 = vld [vmem:[%s7251_s13 + $0x530] sm:$0xff]  ;;  %v1741_v7 = vld [vmem:[%s7251_s13 + $0x318] sm:$0xff] }
 0x362   : > { %8364 = vst [vmem:[#allocation22_spill] sm:$0xff] %v7719_v1  ;;  %3925 = vmatmul.mubr.bf16.gmra.mrb[228].mxu1 %v5738_v44  ;;  %4150 = vmatmul.mubr.bf16.gmra.mrb[4].mxu0 %v5676_v36  ;;  %v6726_v36 = vld [vmem:[#allocation11 + $0x10] sm:$0xff]  }
 0x363   : > { %3932 = vmatprep.mubr.bf16.mxu1 %v5747_v5  ;;  %4157 = vmatprep.mubr.bf16.mxu0 %v5685_v26  ;;  %v5693_v5 = vcombine.high %v1733_v31, %v1737_v37 }
 0x364   : > { %6450 = vmatprep.subr.bf16.mxu1 %v6726_v36 }
 0x365   : > { %v7725_v23 = vpop.f32.mrb[124].mxu1  ;;  %v3621_v59 = vpop.f32.mrb[156].mxu0  ;;  %6451 = vmatpush3.bf16.msra.mxu1 %v6726_v36  ;;  %v5763_v36 = vcombine.high %v1804_v19, %v1808_v49 }
 0x366   : > { %v3398_v50 = vpop.f32.mrb[125].mxu1  ;;  %v7728_v58 = vadd.f32 %v3621_v59, %v7613_v43  ;;  %v3623_v44 = vpop.f32.mrb[157].mxu0  ;;  %v6727_v43 = vld [vmem:[#allocation11 + $0x18] sm:$0xff]  }
 0x367   : > { %v7730_v26 = vpop.f32.mrb[126].mxu1  ;;  %v3624_v1 = vpop.f32.mrb[158].mxu0  ;;  %v1745_v59 = vld [vmem:[%s7251_s13 + $0x338] sm:$0xff]  ;;  %6452 = vmatprep.subr.bf16.mxu1 %v6727_v43 }
 0x368   : > { %8365 = vst [vmem:[#allocation23_spill] sm:$0xff] %v7728_v58  ;;  %v3401_v62 = vpop.f32.mrb[127].mxu1  ;;  %v7733_v14 = vadd.f32 %v3624_v1, %v7618_v54  ;;  %v3626_v47 = vpop.f32.mrb[159].mxu0  ;;  %v5754_v54 = vcombine.low %v1796_v41, %v1800_v63  ;;  %v1812_v63 = vld [vmem:[%s7251_s13 + $0x550] sm:$0xff] }
 0x369   : > { %6453 = vmatpush3.bf16.msra.mxu1 %v6727_v43  ;;  %v5692_v62 = vcombine.low %v1733_v31, %v1737_v37  ;;  %v1816_v31 = vld [vmem:[%s7251_s13 + $0x570] sm:$0xff]  ;;  %v1749_v37 = vld [vmem:[%s7251_s13 + $0x358] sm:$0xff] }
 0x36a   : > { %8366 = vst [vmem:[#allocation24_spill] sm:$0xff] %v7733_v14  ;;  %3933 = vmatmul.mubr.bf16.gmra.mrb[232].mxu1 %v5746_v3  ;;  %4158 = vmatmul.mubr.bf16.gmra.mrb[8].mxu0 %v5684_v60  ;;  %v6728_v60 = vld [vmem:[#allocation11 + $0x20] sm:$0xff]  }
 0x36b   : > { %3940 = vmatprep.mubr.bf16.mxu1 %v5755_v52  ;;  %4165 = vmatprep.mubr.bf16.mxu0 %v5693_v5  ;;  %v5701_v52 = vcombine.high %v1741_v7, %v1745_v59 }
 0x36c   : > { %6454 = vmatprep.subr.bf16.mxu1 %v6728_v60 }
 0x36d   : > { %v7739_v50 = vpop.f32.mrb[128].mxu1  ;;  %v3629_v44 = vpop.f32.mrb[160].mxu0  ;;  %6455 = vmatpush3.bf16.msra.mxu1 %v6728_v60  ;;  %v5771_v60 = vcombine.high %v1812_v63, %v1816_v31 }
 0x36e   : > { %v3406_v1 = vpop.f32.mrb[129].mxu1  ;;  %v7742_v47 = vadd.f32 %v3629_v44, %v7627_v9  ;;  %v3631_v3 = vpop.f32.mrb[161].mxu0  ;;  %v6729_v9 = vld [vmem:[#allocation11 + $0x28] sm:$0xff]   ;;  %v1753_v44 = vld [vmem:[%s7251_s13 + $0x378] sm:$0xff] }
 0x36f   : > { %v7744_v5 = vpop.f32.mrb[130].mxu1  ;;  %v3632_v14 = vpop.f32.mrb[162].mxu0  ;;  %6456 = vmatprep.subr.bf16.mxu1 %v6729_v9 }
 0x370   : > { %8367 = vst [vmem:[#allocation25_spill] sm:$0xff] %v7742_v47  ;;  %v3409_v58 = vpop.f32.mrb[131].mxu1  ;;  %v7747_v43 = vadd.f32 %v3632_v14, %v7632_v24  ;;  %v3634_v41 = vpop.f32.mrb[163].mxu0  ;;  %v5762_v24 = vcombine.low %v1804_v19, %v1808_v49  ;;  %v1820_v49 = vld [vmem:[%s7251_s13 + $0x590] sm:$0xff] }
 0x371   : > { %6457 = vmatpush3.bf16.msra.mxu1 %v6729_v9  ;;  %v5700_v58 = vcombine.low %v1741_v7, %v1745_v59  ;;  %v1824_v7 = vld [vmem:[%s7251_s13 + $0x5b0] sm:$0xff]  ;;  %v1757_v59 = vld [vmem:[%s7251_s13 + $0x398] sm:$0xff] }
 0x372   : > { %8368 = vst [vmem:[#allocation26_spill] sm:$0xff] %v7747_v43  ;;  %3941 = vmatmul.mubr.bf16.gmra.mrb[236].mxu1 %v5754_v54  ;;  %4166 = vmatmul.mubr.bf16.gmra.mrb[12].mxu0 %v5692_v62  ;;  %v6730_v62 = vld [vmem:[#allocation11 + $0x30] sm:$0xff]  }
 0x373   : > { %3948 = vmatprep.mubr.bf16.mxu1 %v5763_v36  ;;  %4173 = vmatprep.mubr.bf16.mxu0 %v5701_v52  ;;  %v5709_v36 = vcombine.high %v1749_v37, %v1753_v44 }
 0x374   : > { %6458 = vmatprep.subr.bf16.mxu1 %v6730_v62 }
 0x375   : > { %v7753_v1 = vpop.f32.mrb[132].mxu1  ;;  %v3637_v3 = vpop.f32.mrb[164].mxu0  ;;  %6459 = vmatpush3.bf16.msra.mxu1 %v6730_v62  ;;  %v5779_v62 = vcombine.high %v1820_v49, %v1824_v7 }
 0x376   : > { %v3414_v14 = vpop.f32.mrb[133].mxu1  ;;  %v7756_v41 = vadd.f32 %v3637_v3, %v7641_v38  ;;  %v3639_v54 = vpop.f32.mrb[165].mxu0  ;;  %v6731_v38 = vld [vmem:[#allocation11 + $0x38] sm:$0xff]  }
 0x377   : > { %v7758_v52 = vpop.f32.mrb[134].mxu1  ;;  %v3640_v43 = vpop.f32.mrb[166].mxu0  ;;  %v1761_v3 = vld [vmem:[%s7251_s13 + $0x3b8] sm:$0xff]  ;;  %6460 = vmatprep.subr.bf16.mxu1 %v6731_v38 }
 0x378   : > { %8369 = vst [vmem:[#allocation27_spill] sm:$0xff] %v7756_v41  ;;  %v3417_v47 = vpop.f32.mrb[135].mxu1  ;;  %v7761_v9 = vadd.f32 %v3640_v43, %v7646_v56  ;;  %v3642_v19 = vpop.f32.mrb[167].mxu0  ;;  %v5770_v56 = vcombine.low %v1812_v63, %v1816_v31  ;;  %v1828_v63 = vld [vmem:[%s7251_s13 + $0x5d0] sm:$0xff] }
 0x379   : > { %6461 = vmatpush3.bf16.msra.mxu1 %v6731_v38  ;;  %v5708_v47 = vcombine.low %v1749_v37, %v1753_v44  ;;  %v1832_v31 = vld [vmem:[%s7251_s13 + $0x5f0] sm:$0xff]  ;;  %v1769_v44 = vld [vmem:[%s7251_s13 + $0x3f8] sm:$0xff] }
 0x37a   : > { %8370 = vst [vmem:[#allocation28_spill] sm:$0xff] %v7761_v9  ;;  %3949 = vmatmul.mubr.bf16.gmra.mrb[240].mxu1 %v5762_v24  ;;  %4174 = vmatmul.mubr.bf16.gmra.mrb[16].mxu0 %v5700_v58 }
 0x37b   : > { %3956 = vmatprep.mubr.bf16.mxu1 %v5771_v60  ;;  %4181 = vmatprep.mubr.bf16.mxu0 %v5709_v36  ;;  %v5717_v60 = vcombine.high %v1757_v59, %v1761_v3 }
 0x37d   : > { %v7767_v14 = vpop.f32.mrb[136].mxu1  ;;  %v3645_v54 = vpop.f32.mrb[168].mxu0 }
 0x37e   : > { %v3422_v43 = vpop.f32.mrb[137].mxu1  ;;  %v7770_v58 = vadd.f32 %v3645_v54, %v7655_v10  ;;  %v3647_v24 = vpop.f32.mrb[169].mxu0  ;;  %v1765_v10 = vld [vmem:[%s7251_s13 + $0x3d8] sm:$0xff] }
 0x37f   : > { %v7772_v36 = vpop.f32.mrb[138].mxu1  ;;  %v3648_v19 = vpop.f32.mrb[170].mxu0  ;;  %v5716_v43 = vcombine.low %v1757_v59, %v1761_v3  ;;  %v5778_v24 = vcombine.low %v1820_v49, %v1824_v7  ;;  %v1836_v49 = vld [vmem:[%s7251_s13 + $0x610] sm:$0xff]  ;;  %v1777_v3 = vld [vmem:[%s7251_s13 + $0x438] sm:$0xff] }
 0x380   : > { %8371 = vst [vmem:[#allocation29_spill] sm:$0xff] %v7770_v58  ;;  %v3425_v9 = vpop.f32.mrb[139].mxu1  ;;  %v7775_v41 = vadd.f32 %v3648_v19, %v7660_v34  ;;  %v3650_v37 = vpop.f32.mrb[171].mxu0  ;;  %v1840_v7 = vld [vmem:[%s7251_s13 + $0x630] sm:$0xff] }
 0x382   : > { %8372 = vst [vmem:[#allocation30_spill] sm:$0xff] %v7775_v41  ;;  %3957 = vmatmul.mubr.bf16.gmra.mrb[244].mxu1 %v5770_v56  ;;  %4182 = vmatmul.mubr.bf16.gmra.mrb[20].mxu0 %v5708_v47  ;;  %v5787_v56 = vcombine.high %v1828_v63, %v1832_v31 }
 0x383   : > { %3964 = vmatprep.mubr.bf16.mxu1 %v5779_v62  ;;  %4189 = vmatprep.mubr.bf16.mxu0 %v5717_v60  ;;  %v5725_v62 = vcombine.high %v1765_v10, %v1769_v44 }
 0x385   : > { %v7781_v38 = vpop.f32.mrb[140].mxu1  ;;  %v3653_v54 = vpop.f32.mrb[172].mxu0 }
 0x386   : > { %v3430_v9 = vpop.f32.mrb[141].mxu1  ;;  %v7784_v34 = vadd.f32 %v3653_v54, %v7669_v48  ;;  %v3655_v47 = vpop.f32.mrb[173].mxu0  ;;  %v1773_v48 = vld [vmem:[%s7251_s13 + $0x418] sm:$0xff] }
 0x387   : > { %v7786_v60 = vpop.f32.mrb[142].mxu1  ;;  %v3656_v19 = vpop.f32.mrb[174].mxu0  ;;  %v5724_v47 = vcombine.low %v1765_v10, %v1769_v44  ;;  %v1785_v44 = vld [vmem:[%s7251_s13 + $0x478] sm:$0xff] }
 0x388   : > { %8373 = vst [vmem:[#allocation31_spill] sm:$0xff] %v7784_v34  ;;  %v3433_v37 = vpop.f32.mrb[143].mxu1  ;;  %v7789_v41 = vadd.f32 %v3656_v19, %v7674_v18  ;;  %v3658_v59 = vpop.f32.mrb[175].mxu0  ;;  %v5786_v34 = vcombine.low %v1828_v63, %v1832_v31  ;;  %v1844_v63 = vld [vmem:[%s7251_s13 + $0x650] sm:$0xff] }
 0x389   : > { %v1848_v31 = vld [vmem:[%s7251_s13 + $0x670] sm:$0xff] }
 0x38a   : > { %8374 = vst [vmem:[#allocation32_spill] sm:$0xff] %v7789_v41  ;;  %3965 = vmatmul.mubr.bf16.gmra.mrb[248].mxu1 %v5778_v24  ;;  %4190 = vmatmul.mubr.bf16.gmra.mrb[24].mxu0 %v5716_v43  ;;  %v5795_v24 = vcombine.high %v1836_v49, %v1840_v7 }
 0x38b   : > { %3972 = vmatprep.mubr.bf16.mxu1 %v5787_v56  ;;  %4197 = vmatprep.mubr.bf16.mxu0 %v5725_v62  ;;  %v5733_v56 = vcombine.high %v1773_v48, %v1777_v3 }
 0x38d   : > { %v7795_v54 = vpop.f32.mrb[144].mxu1  ;;  %v3661_v9 = vpop.f32.mrb[176].mxu0 }
 0x38e   : > { %v3438_v37 = vpop.f32.mrb[145].mxu1  ;;  %v7798_v18 = vadd.f32 %v3661_v9, %v7683_v35  ;;  %v3663_v43 = vpop.f32.mrb[177].mxu0  ;;  %v1781_v35 = vld [vmem:[%s7251_s13 + $0x458] sm:$0xff] }
 0x38f   : > { %v7800_v62 = vpop.f32.mrb[146].mxu1  ;;  %v3664_v19 = vpop.f32.mrb[178].mxu0  ;;  %v5794_v43 = vcombine.low %v1836_v49, %v1840_v7  ;;  %v1852_v7 = vld [vmem:[%s7251_s13 + $0x690] sm:$0xff] }
 0x390   : > { %8375 = vst [vmem:[#allocation33_spill] sm:$0xff] %v7798_v18  ;;  %v3441_v59 = vpop.f32.mrb[147].mxu1  ;;  %v7803_v41 = vadd.f32 %v3664_v19, %v7688_v57  ;;  %v3666_v10 = vpop.f32.mrb[179].mxu0  ;;  %v5732_v18 = vcombine.low %v1773_v48, %v1777_v3  ;;  %v1856_v48 = vld [vmem:[%s7251_s13 + $0x6b0] sm:$0xff]  ;;  %v1793_v3 = vld [vmem:[%s7251_s13 + $0x4b8] sm:$0xff] }
 0x392   : > { %8376 = vst [vmem:[#allocation34_spill] sm:$0xff] %v7803_v41  ;;  %3973 = vmatmul.mubr.bf16.gmra.mrb[252].mxu1 %v5786_v34  ;;  %4198 = vmatmul.mubr.bf16.gmra.mrb[28].mxu0 %v5724_v47  ;;  %v5803_v47 = vcombine.high %v1844_v63, %v1848_v31 }
 0x393   : > { %3980 = vmatprep.mubr.bf16.mxu1 %v5795_v24  ;;  %4205 = vmatprep.mubr.bf16.mxu0 %v5733_v56  ;;  %v5741_v24 = vcombine.high %v1781_v35, %v1785_v44 }
 0x395   : > { %v7809_v9 = vpop.f32.mrb[148].mxu1  ;;  %v3669_v37 = vpop.f32.mrb[180].mxu0 }
 0x396   : > { %v3446_v59 = vpop.f32.mrb[149].mxu1  ;;  %v7812_v57 = vadd.f32 %v3669_v37, %v7697_v22  ;;  %v3671_v34 = vpop.f32.mrb[181].mxu0  ;;  %v1789_v22 = vld [vmem:[%s7251_s13 + $0x498] sm:$0xff] }
 0x397   : > { %v7814_v56 = vpop.f32.mrb[150].mxu1  ;;  %v3672_v19 = vpop.f32.mrb[182].mxu0  ;;  %v5802_v34 = vcombine.low %v1844_v63, %v1848_v31  ;;  %v1860_v31 = vld [vmem:[%s7251_s13 + $0x6d0] sm:$0xff] }
 0x398   : > { %8377 = vst [vmem:[#allocation35_spill] sm:$0xff] %v7812_v57  ;;  %v3449_v10 = vpop.f32.mrb[151].mxu1  ;;  %v7817_v41 = vadd.f32 %v3672_v19, %v7702_v17  ;;  %v3674_v49 = vpop.f32.mrb[183].mxu0  ;;  %v5740_v57 = vcombine.low %v1781_v35, %v1785_v44  ;;  %v1864_v35 = vld [vmem:[%s7251_s13 + $0x6f0] sm:$0xff]  ;;  %v1801_v44 = vld [vmem:[%s7251_s13 + $0x4f8] sm:$0xff] }
 0x399   : > { %v5818_v58 = vcombine.low %v1860_v31, %v1864_v35 }
 0x39a   : > { %8378 = vst [vmem:[#allocation36_spill] sm:$0xff] %v7817_v41  ;;  %3981 = vmatmul.mubr.bf16.gmra.mrb[0].mxu1 %v5794_v43  ;;  %4206 = vmatmul.mubr.bf16.gmra.mrb[32].mxu0 %v5732_v18 }
 0x39b   : > { %3988 = vmatprep.mubr.bf16.mxu1 %v5803_v47  ;;  %4213 = vmatprep.mubr.bf16.mxu0 %v5741_v24  ;;  %v5811_v47 = vcombine.high %v1852_v7, %v1856_v48  ;;  %v5749_v24 = vcombine.high %v1789_v22, %v1793_v3 }
 0x39d   : > { %v7823_v37 = vpop.f32.mrb[152].mxu1  ;;  %v3677_v59 = vpop.f32.mrb[184].mxu0 }
 0x39e   : > { %v3454_v10 = vpop.f32.mrb[153].mxu1  ;;  %v7826_v17 = vadd.f32 %v3677_v59, %v7711_v33  ;;  %v3679_v18 = vpop.f32.mrb[185].mxu0  ;;  %v1797_v33 = vld [vmem:[%s7251_s13 + $0x4d8] sm:$0xff] }
 0x39f   : > { %v7828_v43 = vpop.f32.mrb[154].mxu1  ;;  %v3680_v19 = vpop.f32.mrb[186].mxu0  ;;  %v5810_v18 = vcombine.low %v1852_v7, %v1856_v48  ;;  %v1868_v48 = vld [vmem:[%s7251_s13 + $0x710] sm:$0xff] }
 0x3a0   : > { %8379 = vst [vmem:[#allocation37_spill] sm:$0xff] %v7826_v17  ;;  %v3457_v49 = vpop.f32.mrb[155].mxu1  ;;  %v7831_v41 = vadd.f32 %v3680_v19, %v7716_v45  ;;  %v3682_v63 = vpop.f32.mrb[187].mxu0  ;;  %v5748_v17 = vcombine.low %v1789_v22, %v1793_v3  ;;  %v1872_v22 = vld [vmem:[%s7251_s13 + $0x730] sm:$0xff]  ;;  %v1809_v3 = vld [vmem:[%s7251_s13 + $0x538] sm:$0xff] }
 0x3a2   : > { %8380 = vst [vmem:[#allocation38_spill] sm:$0xff] %v7831_v41  ;;  %3989 = vmatmul.mubr.bf16.gmra.mrb[4].mxu1 %v5802_v34  ;;  %4214 = vmatmul.mubr.bf16.gmra.mrb[36].mxu0 %v5740_v57 }
 0x3a3   : > { %3996 = vmatprep.mubr.bf16.mxu1 %v5811_v47  ;;  %4221 = vmatprep.mubr.bf16.mxu0 %v5749_v24  ;;  %v5819_v47 = vcombine.high %v1860_v31, %v1864_v35  ;;  %v5757_v24 = vcombine.high %v1797_v33, %v1801_v44  ;;  %v1880_v35 = vld [vmem:[%s7251_s13 + $0x770] sm:$0xff] }
 0x3a5   : > { %v7837_v59 = vpop.f32.mrb[156].mxu1  ;;  %v3685_v10 = vpop.f32.mrb[188].mxu0 }
 0x3a6   : > { %v3462_v49 = vpop.f32.mrb[157].mxu1  ;;  %v7840_v45 = vadd.f32 %v3685_v10, %v7725_v23  ;;  %v3687_v57 = vpop.f32.mrb[189].mxu0  ;;  %v1805_v23 = vld [vmem:[%s7251_s13 + $0x518] sm:$0xff] }
 0x3a7   : > { %v7842_v34 = vpop.f32.mrb[158].mxu1  ;;  %v3688_v19 = vpop.f32.mrb[190].mxu0 }
 0x3a8   : > { %8381 = vst [vmem:[#allocation39_spill] sm:$0xff] %v7840_v45  ;;  %v3465_v63 = vpop.f32.mrb[159].mxu1  ;;  %v7845_v41 = vadd.f32 %v3688_v19, %v7730_v26  ;;  %v3690_v7 = vpop.f32.mrb[191].mxu0 }
 0x3a9   : > { %v5756_v63 = vcombine.low %v1797_v33, %v1801_v44  ;;  %v1813_v33 = vld [vmem:[%s7251_s13 + $0x558] sm:$0xff] }
 0x3aa   : > { %3997 = vmatmul.mubr.bf16.gmra.mrb[8].mxu1 %v5810_v18  ;;  %4222 = vmatmul.mubr.bf16.gmra.mrb[40].mxu0 %v5748_v17  ;;  %v1817_v44 = vld [vmem:[%s7251_s13 + $0x578] sm:$0xff] }
 0x3ab   : > { %4004 = vmatprep.mubr.bf16.mxu1 %v5819_v47  ;;  %4229 = vmatprep.mubr.bf16.mxu0 %v5757_v24  ;;  %v5827_v47 = vcombine.high %v1868_v48, %v1872_v22  ;;  %v5765_v24 = vcombine.high %v1805_v23, %v1809_v3 }
 0x3ad   : > { %v3790_v10 = vpop.f32.mrb[160].mxu1  ;;  %v3693_v49 = vpop.f32.mrb[192].mxu0 }
 0x3ae   : > { %v7852_v57 = vadd.f32 %v3790_v10, %v7518_v2  ;;  %v3792_v45 = vpop.f32.mrb[161].mxu1  ;;  %v7855_v26 = vadd.f32 %v3693_v49, %v7739_v50  ;;  %v3695_v17 = vpop.f32.mrb[193].mxu0  ;;  %v1876_v50 = vld [vmem:[%s7251_s13 + $0x750] sm:$0xff] }
 0x3af   : > { %v3793_v18 = vpop.f32.mrb[162].mxu1  ;;  %v3696_v19 = vpop.f32.mrb[194].mxu0 }
 0x3b0   : > { %v7858_v7 = vadd.f32 %v3793_v18, %v7523_v11  ;;  %v3795_v2 = vpop.f32.mrb[163].mxu1  ;;  %v7861_v45 = vadd.f32 %v3696_v19, %v7744_v5  ;;  %v3698_v31 = vpop.f32.mrb[195].mxu0  ;;  %v5826_v18 = vcombine.low %v1868_v48, %v1872_v22  ;;  %v1888_v22 = vld [vmem:[%s7251_s13 + $0x7b0] sm:$0xff] }
 0x3b1   : > { %v5764_v2 = vcombine.low %v1805_v23, %v1809_v3  ;;  %v1821_v23 = vld [vmem:[%s7251_s13 + $0x598] sm:$0xff] }
 0x3b2   : > { %4005 = vmatmul.mubr.bf16.gmra.mrb[12].mxu1 %v5818_v58  ;;  %4230 = vmatmul.mubr.bf16.gmra.mrb[44].mxu0 %v5756_v63  ;;  %v1825_v3 = vld [vmem:[%s7251_s13 + $0x5b8] sm:$0xff] }
 0x3b3   : > { %4012 = vmatprep.mubr.bf16.mxu1 %v5827_v47  ;;  %4237 = vmatprep.mubr.bf16.mxu0 %v5765_v24  ;;  %v5835_v47 = vcombine.high %v1876_v50, %v1880_v35  ;;  %v5773_v24 = vcombine.high %v1813_v33, %v1817_v44 }
 0x3b5   : > { %v3798_v10 = vpop.f32.mrb[164].mxu1  ;;  %v3701_v49 = vpop.f32.mrb[196].mxu0 }
 0x3b6   : > { %v7868_v17 = vadd.f32 %v3798_v10, %v7532_v27  ;;  %v3800_v11 = vpop.f32.mrb[165].mxu1  ;;  %v7871_v5 = vadd.f32 %v3701_v49, %v7753_v1  ;;  %v3703_v58 = vpop.f32.mrb[197].mxu0  ;;  %v1884_v1 = vld [vmem:[%s7251_s13 + $0x790] sm:$0xff] }
 0x3b7   : > { %v3801_v63 = vpop.f32.mrb[166].mxu1  ;;  %v3704_v19 = vpop.f32.mrb[198].mxu0 }
 0x3b8   : > { %v7874_v31 = vadd.f32 %v3801_v63, %v7537_v32  ;;  %v3803_v27 = vpop.f32.mrb[167].mxu1  ;;  %v7877_v10 = vadd.f32 %v3704_v19, %v7758_v52  ;;  %v3706_v48 = vpop.f32.mrb[199].mxu0  ;;  %v5834_v63 = vcombine.low %v1876_v50, %v1880_v35  ;;  %v1896_v35 = vld [vmem:[%s7251_s13 + $0x7f0] sm:$0xff] }
 0x3b9   : > { %v5772_v27 = vcombine.low %v1813_v33, %v1817_v44  ;;  %v1829_v33 = vld [vmem:[%s7251_s13 + $0x5d8] sm:$0xff] }
 0x3ba   : > { %4013 = vmatmul.mubr.bf16.gmra.mrb[16].mxu1 %v5826_v18  ;;  %4238 = vmatmul.mubr.bf16.gmra.mrb[48].mxu0 %v5764_v2  ;;  %v1833_v44 = vld [vmem:[%s7251_s13 + $0x5f8] sm:$0xff] }
 0x3bb   : > { %4020 = vmatprep.mubr.bf16.mxu1 %v5835_v47  ;;  %4245 = vmatprep.mubr.bf16.mxu0 %v5773_v24  ;;  %v5843_v47 = vcombine.high %v1884_v1, %v1888_v22  ;;  %v5781_v24 = vcombine.high %v1821_v23, %v1825_v3 }
 0x3bd   : > { %v3806_v49 = vpop.f32.mrb[168].mxu1  ;;  %v3709_v11 = vpop.f32.mrb[200].mxu0 }
 0x3be   : > { %v7884_v58 = vadd.f32 %v3806_v49, %v7546_v40  ;;  %v3808_v32 = vpop.f32.mrb[169].mxu1  ;;  %v7887_v52 = vadd.f32 %v3709_v11, %v7767_v14  ;;  %v3711_v18 = vpop.f32.mrb[201].mxu0  ;;  %v1892_v14 = vld [vmem:[%s7251_s13 + $0x7d0] sm:$0xff] }
 0x3bf   : > { %v3809_v2 = vpop.f32.mrb[170].mxu1  ;;  %v3712_v19 = vpop.f32.mrb[202].mxu0 }
 0x3c0   : > { %v7890_v48 = vadd.f32 %v3809_v2, %v7551_v53  ;;  %v3811_v40 = vpop.f32.mrb[171].mxu1  ;;  %v7893_v49 = vadd.f32 %v3712_v19, %v7772_v36  ;;  %v3714_v50 = vpop.f32.mrb[203].mxu0  ;;  %v5842_v2 = vcombine.low %v1884_v1, %v1888_v22  ;;  %v1837_v1 = vld [vmem:[%s7251_s13 + $0x618] sm:$0xff] }
 0x3c1   : > { %v5780_v40 = vcombine.low %v1821_v23, %v1825_v3 }
 0x3c2   : > { %8382 = vst [vmem:[#allocation40_spill] sm:$0xff] %v7893_v49  ;;  %4021 = vmatmul.mubr.bf16.gmra.mrb[20].mxu1 %v5834_v63  ;;  %4246 = vmatmul.mubr.bf16.gmra.mrb[52].mxu0 %v5772_v27 }
 0x3c3   : > { %4028 = vmatprep.mubr.bf16.mxu1 %v5843_v47  ;;  %4253 = vmatprep.mubr.bf16.mxu0 %v5781_v24  ;;  %v5851_v47 = vcombine.high %v1892_v14, %v1896_v35  ;;  %v5789_v24 = vcombine.high %v1829_v33, %v1833_v44 }
 0x3c5   : > { %v3814_v11 = vpop.f32.mrb[172].mxu1  ;;  %v3717_v32 = vpop.f32.mrb[204].mxu0 }
 0x3c6   : > { %v7900_v18 = vadd.f32 %v3814_v11, %v7560_v15  ;;  %v3816_v53 = vpop.f32.mrb[173].mxu1  ;;  %v7903_v36 = vadd.f32 %v3717_v32, %v7781_v38  ;;  %v3719_v63 = vpop.f32.mrb[205].mxu0  ;;  %v1841_v38 = vld [vmem:[%s7251_s13 + $0x638] sm:$0xff] }
 0x3c7   : > { %v3817_v27 = vpop.f32.mrb[174].mxu1  ;;  %v3720_v19 = vpop.f32.mrb[206].mxu0 }
 0x3c8   : > { %v7906_v50 = vadd.f32 %v3817_v27, %v7565_v25  ;;  %v3819_v49 = vpop.f32.mrb[175].mxu1  ;;  %v7909_v15 = vadd.f32 %v3720_v19, %v7786_v60  ;;  %v3722_v11 = vpop.f32.mrb[207].mxu0  ;;  %v5850_v25 = vcombine.low %v1892_v14, %v1896_v35  ;;  %v1845_v14 = vld [vmem:[%s7251_s13 + $0x658] sm:$0xff] }
 0x3c9   : > { %v5788_v49 = vcombine.low %v1829_v33, %v1833_v44  ;;  %v1849_v35 = vld [vmem:[%s7251_s13 + $0x678] sm:$0xff] }
 0x3ca   : > { %4029 = vmatmul.mubr.bf16.gmra.mrb[24].mxu1 %v5842_v2  ;;  %4254 = vmatmul.mubr.bf16.gmra.mrb[56].mxu0 %v5780_v40  ;;  %v5797_v40 = vcombine.high %v1837_v1, %v1841_v38 }
 0x3cb   : > { %4036 = vmatprep.mubr.bf16.mxu1 %v5851_v47  ;;  %4261 = vmatprep.mubr.bf16.mxu0 %v5789_v24 }
 0x3cd   : > { %v3822_v22 = vpop.f32.mrb[176].mxu1  ;;  %v3725_v23 = vpop.f32.mrb[208].mxu0 }
 0x3ce   : > { %v7914_v3 = vadd.f32 %v3822_v22, %v7574_v61  ;;  %v3824_v32 = vpop.f32.mrb[177].mxu1  ;;  %v7917_v60 = vadd.f32 %v3725_v23, %v7795_v54  ;;  %v3727_v53 = vpop.f32.mrb[209].mxu0  ;;  %v5805_v23 = vcombine.high %v1845_v14, %v1849_v35 }
 0x3cf   : > { %v3825_v2 = vpop.f32.mrb[178].mxu1  ;;  %v3728_v63 = vpop.f32.mrb[210].mxu0 }
 0x3d0   : > { %v7920_v27 = vadd.f32 %v3825_v2, %v7579_v42  ;;  %v3827_v47 = vpop.f32.mrb[179].mxu1  ;;  %v7923_v24 = vadd.f32 %v3728_v63, %v7800_v62  ;;  %v3730_v61 = vpop.f32.mrb[211].mxu0  ;;  %v5796_v42 = vcombine.low %v1837_v1, %v1841_v38 }
 0x3d1   : > { %v5804_v47 = vcombine.low %v1845_v14, %v1849_v35 }
 0x3d2   : > { %4037 = vmatmul.mubr.bf16.gmra.mrb[28].mxu1 %v5850_v25  ;;  %4262 = vmatmul.mubr.bf16.gmra.mrb[60].mxu0 %v5788_v49 }
 0x3d3   : > { %4269 = vmatprep.mubr.bf16.mxu0 %v5797_v40  ;;  %v1857_v40 = vld [vmem:[%s7251_s13 + $0x6b8] sm:$0xff] }
 0x3d5   : > { %v3830_v33 = vpop.f32.mrb[180].mxu1  ;;  %v3733_v54 = vpop.f32.mrb[212].mxu0 }
 0x3d6   : > { %v7928_v44 = vadd.f32 %v3830_v33, %v7588_v12  ;;  %v3832_v19 = vpop.f32.mrb[181].mxu1  ;;  %v7931_v11 = vadd.f32 %v3733_v54, %v7809_v9  ;;  %v3735_v62 = vpop.f32.mrb[213].mxu0  ;;  %v1853_v12 = vld [vmem:[%s7251_s13 + $0x698] sm:$0xff] }
 0x3d7   : > { %v3833_v22 = vpop.f32.mrb[182].mxu1  ;;  %v3736_v32 = vpop.f32.mrb[214].mxu0  ;;  %v5813_v54 = vcombine.high %v1853_v12, %v1857_v40 }
 0x3d8   : > { %v7934_v25 = vadd.f32 %v3833_v22, %v7593_v4  ;;  %v3835_v49 = vpop.f32.mrb[183].mxu1  ;;  %v7937_v53 = vadd.f32 %v3736_v32, %v7814_v56  ;;  %v3738_v2 = vpop.f32.mrb[215].mxu0 }
 0x3d9   : > { %v5812_v49 = vcombine.low %v1853_v12, %v1857_v40 }
 0x3da   : > { %4270 = vmatmul.mubr.bf16.gmra.mrb[64].mxu0 %v5796_v42 }
 0x3db   : > { %4277 = vmatprep.mubr.bf16.mxu0 %v5805_v23  ;;  %v1865_v23 = vld [vmem:[%s7251_s13 + $0x6f8] sm:$0xff] }
 0x3dd   : > { %v3838_v1 = vpop.f32.mrb[184].mxu1  ;;  %v3741_v9 = vpop.f32.mrb[216].mxu0 }
 0x3de   : > { %v7942_v38 = vadd.f32 %v3838_v1, %v7602_v0  ;;  %v3840_v63 = vpop.f32.mrb[185].mxu1  ;;  %v7945_v4 = vadd.f32 %v3741_v9, %v7823_v37  ;;  %v3743_v61 = vpop.f32.mrb[217].mxu0  ;;  %v1861_v0 = vld [vmem:[%s7251_s13 + $0x6d8] sm:$0xff] }
 0x3df   : > { %v3841_v56 = vpop.f32.mrb[186].mxu1  ;;  %v3744_v33 = vpop.f32.mrb[218].mxu0  ;;  %v5821_v9 = vcombine.high %v1861_v0, %v1865_v23 }
 0x3e0   : > { %v7948_v19 = vadd.f32 %v3841_v56, %v7607_v30  ;;  %v3843_v42 = vpop.f32.mrb[187].mxu1  ;;  %v7951_v62 = vadd.f32 %v3744_v33, %v7828_v43  ;;  %v3746_v22 = vpop.f32.mrb[219].mxu0  ;;  %v1873_v33 = vld [vmem:[%s7251_s13 + $0x738] sm:$0xff] }
 0x3e1   : > { %v7969_v42 = vld [vmem:[#allocation9] ss:$0 sm:$0xff] }
 0x3e2   : > { %4278 = vmatmul.mubr.bf16.gmra.mrb[68].mxu0 %v5804_v47 }
 0x3e3   : > { %4285 = vmatprep.mubr.bf16.mxu0 %v5813_v54 }
 0x3e5   : > { %v3846_v14 = vpop.f32.mrb[188].mxu1  ;;  %v3749_v37 = vpop.f32.mrb[220].mxu0 }
 0x3e6   : > { %v7956_v35 = vadd.f32 %v3846_v14, %v7616_v39  ;;  %v3848_v32 = vpop.f32.mrb[189].mxu1  ;;  %v7959_v30 = vadd.f32 %v3749_v37, %v7837_v59  ;;  %v3751_v2 = vpop.f32.mrb[221].mxu0  ;;  %v1869_v39 = vld [vmem:[%s7251_s13 + $0x718] sm:$0xff] }
 0x3e7   : > { %v3849_v43 = vpop.f32.mrb[190].mxu1  ;;  %v3752_v1 = vpop.f32.mrb[222].mxu0  ;;  %v5829_v32 = vcombine.high %v1869_v39, %v1873_v33 }
 0x3e8   : > { %v7962_v63 = vadd.f32 %v3849_v43, %v7621_v46  ;;  %v7965_v47 = vadd.f32 %v3752_v1, %v7842_v34  ;;  %v3754_v61 = vpop.f32.mrb[223].mxu0  ;;  %v3851_v56 = vpop.f32.mrb[191].mxu1  ;;  %v5820_v34 = vcombine.low %v1861_v0, %v1865_v23  ;;  %v1881_v0 = vld [vmem:[%s7251_s13 + $0x778] sm:$0xff] }
 0x3e9   : > { %v1877_v56 = vld [vmem:[%s7251_s13 + $0x758] sm:$0xff] }
 0x3ea   : > { %4286 = vmatmul.mubr.bf16.gmra.mrb[72].mxu0 %v5812_v49 }
 0x3eb   : > { %4293 = vmatprep.mubr.bf16.mxu0 %v5821_v9 }
 0x3ed   : > { %v3854_v54 = vpop.f32.mrb[192].mxu1  ;;  %v4079_v59 = vpop.f32.mrb[224].mxu0 }
 0x3ee   : > { %v7972_v12 = vadd.f32 %v3854_v54, %v7630_v20  ;;  %v4080_v40 = vadd.f32 %v4079_v59, %v7852_v57  ;;  %v3856_v46 = vpop.f32.mrb[193].mxu1  ;;  %v4081_v22 = vpop.f32.mrb[225].mxu0 }
 0x3ef   : > { %v3857_v14 = vpop.f32.mrb[194].mxu1  ;;  %v4082_v37 = vpop.f32.mrb[226].mxu0  ;;  %v5828_v22 = vcombine.low %v1869_v39, %v1873_v33  ;;  %v1885_v33 = vld [vmem:[%s7251_s13 + $0x798] sm:$0xff] }
 0x3f0   : > { %v4536_v49 = vadd.f32 %v7969_v42, %v4080_v40  ;;  %v7977_v2 = vadd.f32 %v3857_v14, %v7635_v29  ;;  %v4083_v43 = vadd.f32 %v4082_v37, %v7858_v7  ;;  %v3859_v1 = vpop.f32.mrb[195].mxu1  ;;  %v4084_v20 = vpop.f32.mrb[227].mxu0  ;;  %v5837_v37 = vcombine.high %v1877_v56, %v1881_v0 }
 0x3f2   : > { %v4537_v9 = vadd.f32 %v7969_v42, %v4083_v43  ;;  %4294 = vmatmul.mubr.bf16.gmra.mrb[76].mxu0 %v5820_v34  ;;  %v4600_v57 = vmax.f32 %v4536_v49, 0.0 }
 0x3f3   : > { %4301 = vmatprep.mubr.bf16.mxu0 %v5829_v32 }
 0x3f4   : > { %v4601_v61 = vmax.f32 %v4537_v9, 0.0  ;;  %v1889_v9 = vld [vmem:[%s7251_s13 + $0x7b8] sm:$0xff] }
 0x3f5   : > { %v3862_v23 = vpop.f32.mrb[196].mxu1  ;;  %v4087_v54 = vpop.f32.mrb[228].mxu0 }
 0x3f6   : > { %v7984_v59 = vadd.f32 %v3862_v23, %v7644_v8  ;;  %v4088_v29 = vadd.f32 %v4087_v54, %v7868_v17  ;;  %v3864_v40 = vpop.f32.mrb[197].mxu1  ;;  %v4089_v46 = vpop.f32.mrb[229].mxu0  ;;  %v4664_v7 = vpack.c.bf16 %v4601_v61, %v4600_v57 }
 0x3f7   : > { %v3865_v14 = vpop.f32.mrb[198].mxu1  ;;  %v4090_v34 = vpop.f32.mrb[230].mxu0  ;;  %v5836_v40 = vcombine.low %v1877_v56, %v1881_v0  ;;  %v1893_v0 = vld [vmem:[%s7251_s13 + $0x7d8] sm:$0xff] }
 0x3f8   : > { %v4538_v32 = vadd.f32 %v7969_v42, %v4088_v29  ;;  %v7989_v49 = vadd.f32 %v3865_v14, %v7649_v21  ;;  %v4091_v43 = vadd.f32 %v4090_v34, %v7874_v31  ;;  %6462 = vmatprep.mubr.bf16.mxu1 %v4664_v7  ;;  %v3867_v8 = vpop.f32.mrb[199].mxu1  ;;  %v4092_v1 = vpop.f32.mrb[231].mxu0 }
 0x3f9   : > { %v1897_v8 = vld [vmem:[%s7251_s13 + $0x7f8] sm:$0xff] }
 0x3fa   : > { %v4539_v17 = vadd.f32 %v7969_v42, %v4091_v43  ;;  %4302 = vmatmul.mubr.bf16.gmra.mrb[80].mxu0 %v5828_v22  ;;  %v4602_v20 = vmax.f32 %v4538_v32, 0.0  ;;  %v5845_v22 = vcombine.high %v1885_v33, %v1889_v9 }
 0x3fb   : > { %4309 = vmatprep.mubr.bf16.mxu0 %v5837_v37 }
 0x3fc   : > { %v4603_v39 = vmax.f32 %v4539_v17, 0.0 }
 0x3fd   : > { %v3870_v57 = vpop.f32.mrb[200].mxu1  ;;  %v4095_v61 = vpop.f32.mrb[232].mxu0 }
 0x3fe   : > { %v4665_v23 = vpack.c.bf16 %v4603_v39, %v4602_v20  ;;  %v7996_v54 = vadd.f32 %v3870_v57, %v7658_v28  ;;  %v4096_v21 = vadd.f32 %v4095_v61, %v7884_v58  ;;  %v3872_v31 = vpop.f32.mrb[201].mxu1  ;;  %v4097_v29 = vpop.f32.mrb[233].mxu0  ;;  %v5844_v61 = vcombine.low %v1885_v33, %v1889_v9 }
 0x3ff   : > { %v3873_v46 = vpop.f32.mrb[202].mxu1  ;;  %v4098_v7 = vpop.f32.mrb[234].mxu0  ;;  %v5853_v31 = vcombine.high %v1893_v0, %v1897_v8 }
 0x400   : > { %v4540_v14 = vadd.f32 %v7969_v42, %v4096_v21  ;;  %v8001_v34 = vadd.f32 %v3873_v46, %v7663_v6  ;;  %v4099_v37 = vadd.f32 %v4098_v7, %v7890_v48  ;;  %6463 = vmatmul.mubr.bf16.vlgmr.msra.gmra.mrb[32].mxu1 %v4665_v23  ;;  %v3875_v28 = vpop.f32.mrb[203].mxu1  ;;  %v4100_v32 = vpop.f32.mrb[235].mxu0 }
 0x402   : > { %v4541_v58 = vadd.f32 %v7969_v42, %v4099_v37  ;;  %4310 = vmatmul.mubr.bf16.gmra.mrb[84].mxu0 %v5836_v40  ;;  %v4604_v43 = vmax.f32 %v4540_v14, 0.0 }
 0x403   : > { %4317 = vmatprep.mubr.bf16.mxu0 %v5845_v22 }
 0x404   : > { %v4605_v56 = vmax.f32 %v4541_v58, 0.0 }
 0x405   : > { %v3878_v1 = vpop.f32.mrb[204].mxu1  ;;  %v4103_v17 = vpop.f32.mrb[236].mxu0 }
 0x406   : > { %v8008_v20 = vadd.f32 %v3878_v1, %v7672_v51  ;;  %v4104_v6 = vadd.f32 %v4103_v17, %v7900_v18  ;;  %v3880_v39 = vpop.f32.mrb[205].mxu1  ;;  %v4105_v48 = vpop.f32.mrb[237].mxu0  ;;  %v4666_v57 = vpack.c.bf16 %v4605_v56, %v4604_v43 }
 0x407   : > { %v3881_v23 = vpop.f32.mrb[206].mxu1  ;;  %v4106_v21 = vpop.f32.mrb[238].mxu0 }
 0x408   : > { %v4542_v29 = vadd.f32 %v7969_v42, %v4104_v6  ;;  %v8013_v40 = vadd.f32 %v3881_v23, %v7677_v55  ;;  %v4107_v46 = vadd.f32 %v4106_v21, %v7906_v50  ;;  %6466 = vmatprep.mubr.bf16.mxu1 %v4666_v57  ;;  %v3883_v7 = vpop.f32.mrb[207].mxu1  ;;  %v4108_v51 = vpop.f32.mrb[239].mxu0  ;;  %v5852_v50 = vcombine.low %v1893_v0, %v1897_v8  ;;  %v8383_v0 = vld [vmem:[#allocation19_spill] sm:$0xff] }
 0x409   : > { %v8384_v51 = vld [vmem:[#allocation20_spill] sm:$0xff] }
 0x40a   : > { %v4543_v22 = vadd.f32 %v7969_v42, %v4107_v46  ;;  %4318 = vmatmul.mubr.bf16.gmra.mrb[88].mxu0 %v5844_v61  ;;  %v4606_v18 = vmax.f32 %v4542_v29, 0.0 }
 0x40b   : > { %4325 = vmatprep.mubr.bf16.mxu0 %v5853_v31 }
 0x40c   : > { %v4607_v14 = vmax.f32 %v4543_v22, 0.0 }
 0x40d   : > { %v3886_v33 = vpop.f32.mrb[208].mxu1  ;;  %v4111_v9 = vpop.f32.mrb[240].mxu0 }
 0x40e   : > { %v4667_v37 = vpack.c.bf16 %v4607_v14, %v4606_v18  ;;  %v8018_v28 = vadd.f32 %v3886_v33, %v7686_v13  ;;  %v4112_v55 = vadd.f32 %v4111_v9, %v7914_v3  ;;  %v3888_v32 = vpop.f32.mrb[209].mxu1  ;;  %v4113_v58 = vpop.f32.mrb[241].mxu0 }
 0x40f   : > { %v3889_v43 = vpop.f32.mrb[210].mxu1  ;;  %v4114_v56 = vpop.f32.mrb[242].mxu0 }
 0x410   : > { %v4544_v1 = vadd.f32 %v7969_v42, %v4112_v55  ;;  %v8023_v17 = vadd.f32 %v3889_v43, %v7691_v16  ;;  %v4115_v6 = vadd.f32 %v4114_v56, %v7920_v27  ;;  %6467 = vmatmul.mubr.bf16.gmra.mrb[36].mxu1 %v4667_v37  ;;  %v3891_v39 = vpop.f32.mrb[211].mxu1  ;;  %v4116_v48 = vpop.f32.mrb[243].mxu0 }
 0x412   : > { %v4545_v13 = vadd.f32 %v7969_v42, %v4115_v6  ;;  %4326 = vmatmul.mubr.bf16.gmra.mrb[92].mxu0 %v5852_v50  ;;  %v4608_v57 = vmax.f32 %v4544_v1, 0.0  ;;  %v8385_v50 = vld [vmem:[#allocation21_spill] sm:$0xff] }
 0x414   : > { %v4609_v3 = vmax.f32 %v4545_v13, 0.0  ;;  %v8386_v13 = vld [vmem:[#allocation22_spill] sm:$0xff] }
 0x415   : > { %v3894_v61 = vpop.f32.mrb[212].mxu1  ;;  %v4119_v23 = vpop.f32.mrb[244].mxu0 }
 0x416   : > { %v8028_v8 = vadd.f32 %v3894_v61, %v8383_v0  ;;  %v4120_v21 = vadd.f32 %v4119_v23, %v7928_v44  ;;  %v3896_v31 = vpop.f32.mrb[213].mxu1  ;;  %v4121_v16 = vpop.f32.mrb[245].mxu0  ;;  %v4668_v29 = vpack.c.bf16 %v4609_v3, %v4608_v57 }
 0x417   : > { %v3897_v46 = vpop.f32.mrb[214].mxu1  ;;  %v4122_v27 = vpop.f32.mrb[246].mxu0 }
 0x418   : > { %v4546_v7 = vadd.f32 %v7969_v42, %v4120_v21  ;;  %v8033_v22 = vadd.f32 %v3897_v46, %v8384_v51  ;;  %v4123_v18 = vadd.f32 %v4122_v27, %v7934_v25  ;;  %6470 = vmatprep.mubr.bf16.mxu1 %v4668_v29  ;;  %v3899_v14 = vpop.f32.mrb[215].mxu1  ;;  %v4124_v33 = vpop.f32.mrb[247].mxu0  ;;  %v8387_v29 = vld [vmem:[#allocation23_spill] sm:$0xff] }
 0x41a   : > { %v4547_v9 = vadd.f32 %v7969_v42, %v4123_v18  ;;  %v4610_v37 = vmax.f32 %v4546_v7, 0.0 }
 0x41c   : > { %v4611_v55 = vmax.f32 %v4547_v9, 0.0  ;;  %v8388_v9 = vld [vmem:[#allocation24_spill] sm:$0xff] }
 0x41d   : > { %v3902_v44 = vpop.f32.mrb[216].mxu1  ;;  %v4127_v32 = vpop.f32.mrb[248].mxu0 }
 0x41e   : > { %v4669_v58 = vpack.c.bf16 %v4611_v55, %v4610_v37  ;;  %v8038_v43 = vadd.f32 %v3902_v44, %v8385_v50  ;;  %v4128_v56 = vadd.f32 %v4127_v32, %v7942_v38  ;;  %v3904_v1 = vpop.f32.mrb[217].mxu1  ;;  %v4129_v6 = vpop.f32.mrb[249].mxu0 }
 0x41f   : > { %v3905_v39 = vpop.f32.mrb[218].mxu1  ;;  %v4130_v48 = vpop.f32.mrb[250].mxu0 }
 0x420   : > { %v4548_v25 = vadd.f32 %v7969_v42, %v4128_v56  ;;  %v8043_v57 = vadd.f32 %v3905_v39, %v8386_v13  ;;  %v4131_v3 = vadd.f32 %v4130_v48, %v7948_v19  ;;  %6471 = vmatmul.mubr.bf16.gmra.mrb[40].mxu1 %v4669_v58  ;;  %v3907_v61 = vpop.f32.mrb[219].mxu1  ;;  %v4132_v23 = vpop.f32.mrb[251].mxu0  ;;  %v8389_v39 = vld [vmem:[#allocation25_spill] sm:$0xff] }
 0x422   : > { %v4549_v0 = vadd.f32 %v7969_v42, %v4131_v3  ;;  %v4612_v21 = vmax.f32 %v4548_v25, 0.0 }
 0x424   : > { %v4613_v31 = vmax.f32 %v4549_v0, 0.0  ;;  %v8390_v0 = vld [vmem:[#allocation26_spill] sm:$0xff] }
 0x425   : > { %v3910_v16 = vpop.f32.mrb[220].mxu1  ;;  %v4135_v38 = vpop.f32.mrb[252].mxu0 }
 0x426   : > { %v8048_v46 = vadd.f32 %v3910_v16, %v8387_v29  ;;  %v4136_v27 = vadd.f32 %v4135_v38, %v7956_v35  ;;  %v3912_v7 = vpop.f32.mrb[221].mxu1  ;;  %v4137_v51 = vpop.f32.mrb[253].mxu0  ;;  %v4670_v18 = vpack.c.bf16 %v4613_v31, %v4612_v21 }
 0x427   : > { %v3913_v14 = vpop.f32.mrb[222].mxu1  ;;  %v4138_v33 = vpop.f32.mrb[254].mxu0 }
 0x428   : > { %v4550_v19 = vadd.f32 %v7969_v42, %v4136_v27  ;;  %v8053_v37 = vadd.f32 %v3913_v14, %v8388_v9  ;;  %v4139_v55 = vadd.f32 %v4138_v33, %v7962_v63  ;;  %6474 = vmatprep.mubr.bf16.mxu1 %v4670_v18  ;;  %v3915_v44 = vpop.f32.mrb[223].mxu1  ;;  %v4140_v32 = vpop.f32.mrb[255].mxu0  ;;  %v8391_v18 = vld [vmem:[#allocation27_spill] sm:$0xff] }
 0x42a   : > { %v4551_v58 = vadd.f32 %v7969_v42, %v4139_v55  ;;  %v4614_v50 = vmax.f32 %v4550_v19, 0.0 }
 0x42c   : > { %v4615_v56 = vmax.f32 %v4551_v58, 0.0  ;;  %v8392_v58 = vld [vmem:[#allocation28_spill] sm:$0xff] }
 0x42d   : > { %v3918_v35 = vpop.f32.mrb[224].mxu1  ;;  %v4143_v1 = vpop.f32.mrb[0].mxu0 }
 0x42e   : > { %v4671_v6 = vpack.c.bf16 %v4615_v56, %v4614_v50  ;;  %v8058_v48 = vadd.f32 %v3918_v35, %v8389_v39  ;;  %v4144_v25 = vadd.f32 %v4143_v1, %v7972_v12  ;;  %v3920_v13 = vpop.f32.mrb[225].mxu1  ;;  %v4145_v3 = vpop.f32.mrb[1].mxu0 }
 0x42f   : > { %v3921_v61 = vpop.f32.mrb[226].mxu1  ;;  %v4146_v23 = vpop.f32.mrb[2].mxu0 }
 0x430   : > { %v4552_v63 = vadd.f32 %v7969_v42, %v4144_v25  ;;  %v8063_v21 = vadd.f32 %v3921_v61, %v8390_v0  ;;  %v4147_v31 = vadd.f32 %v4146_v23, %v7977_v2  ;;  %6475 = vmatmul.mubr.bf16.gmra.mrb[44].mxu1 %v4671_v6  ;;  %v3923_v16 = vpop.f32.mrb[227].mxu1  ;;  %v4148_v38 = vpop.f32.mrb[3].mxu0  ;;  %v8393_v61 = vld [vmem:[#allocation29_spill] sm:$0xff] }
 0x432   : > { %v4553_v29 = vadd.f32 %v7969_v42, %v4147_v31  ;;  %v4616_v27 = vmax.f32 %v4552_v63, 0.0 }
 0x434   : > { %v4617_v7 = vmax.f32 %v4553_v29, 0.0  ;;  %v8394_v29 = vld [vmem:[#allocation30_spill] sm:$0xff] }
 0x435   : > { %v3926_v51 = vpop.f32.mrb[228].mxu1  ;;  %v4151_v12 = vpop.f32.mrb[4].mxu0 }
 0x436   : > { %v8068_v14 = vadd.f32 %v3926_v51, %v8391_v18  ;;  %v4152_v33 = vadd.f32 %v4151_v12, %v7984_v59  ;;  %v3928_v19 = vpop.f32.mrb[229].mxu1  ;;  %v4153_v9 = vpop.f32.mrb[5].mxu0  ;;  %v4672_v55 = vpack.c.bf16 %v4617_v7, %v4616_v27 }
 0x437   : > { %v3929_v44 = vpop.f32.mrb[230].mxu1  ;;  %v4154_v32 = vpop.f32.mrb[6].mxu0 }
 0x438   : > { %v4554_v2 = vadd.f32 %v7969_v42, %v4152_v33  ;;  %v8073_v50 = vadd.f32 %v3929_v44, %v8392_v58  ;;  %v4155_v56 = vadd.f32 %v4154_v32, %v7989_v49  ;;  %6478 = vmatprep.mubr.bf16.mxu1 %v4672_v55  ;;  %v3931_v35 = vpop.f32.mrb[231].mxu1  ;;  %v4156_v1 = vpop.f32.mrb[7].mxu0  ;;  %v8395_v55 = vld [vmem:[#allocation31_spill] sm:$0xff] }
 0x43a   : > { %v4555_v6 = vadd.f32 %v7969_v42, %v4155_v56  ;;  %v4618_v39 = vmax.f32 %v4554_v2, 0.0 }
 0x43c   : > { %v4619_v25 = vmax.f32 %v4555_v6, 0.0  ;;  %v8396_v6 = vld [vmem:[#allocation32_spill] sm:$0xff] }
 0x43d   : > { %v3934_v59 = vpop.f32.mrb[232].mxu1  ;;  %v4159_v13 = vpop.f32.mrb[8].mxu0 }
 0x43e   : > { %v4673_v3 = vpack.c.bf16 %v4619_v25, %v4618_v39  ;;  %v8078_v23 = vadd.f32 %v3934_v59, %v8393_v61  ;;  %v4160_v63 = vadd.f32 %v4159_v13, %v7996_v54  ;;  %v3936_v0 = vpop.f32.mrb[233].mxu1  ;;  %v4161_v31 = vpop.f32.mrb[9].mxu0 }
 0x43f   : > { %v3937_v16 = vpop.f32.mrb[234].mxu1  ;;  %v4162_v38 = vpop.f32.mrb[10].mxu0 }
 0x440   : > { %v4556_v49 = vadd.f32 %v7969_v42, %v4160_v63  ;;  %v8083_v27 = vadd.f32 %v3937_v16, %v8394_v29  ;;  %v4163_v7 = vadd.f32 %v4162_v38, %v8001_v34  ;;  %6479 = vmatmul.mubr.bf16.gmra.mrb[48].mxu1 %v4673_v3  ;;  %v3939_v51 = vpop.f32.mrb[235].mxu1  ;;  %v4164_v12 = vpop.f32.mrb[11].mxu0  ;;  %v8397_v16 = vld [vmem:[#allocation33_spill] sm:$0xff] }
 0x442   : > { %v4557_v18 = vadd.f32 %v7969_v42, %v4163_v7  ;;  %v4620_v33 = vmax.f32 %v4556_v49, 0.0 }
 0x444   : > { %v4621_v19 = vmax.f32 %v4557_v18, 0.0  ;;  %v8398_v18 = vld [vmem:[#allocation34_spill] sm:$0xff] }
 0x445   : > { %v3942_v9 = vpop.f32.mrb[236].mxu1  ;;  %v4167_v54 = vpop.f32.mrb[12].mxu0 }
 0x446   : > { %v8088_v44 = vadd.f32 %v3942_v9, %v8395_v55  ;;  %v4168_v32 = vadd.f32 %v4167_v54, %v8008_v20  ;;  %v3944_v2 = vpop.f32.mrb[237].mxu1  ;;  %v4169_v58 = vpop.f32.mrb[13].mxu0  ;;  %v4674_v56 = vpack.c.bf16 %v4621_v19, %v4620_v33 }
 0x447   : > { %v3945_v35 = vpop.f32.mrb[238].mxu1  ;;  %v4170_v1 = vpop.f32.mrb[14].mxu0 }
 0x448   : > { %v4558_v34 = vadd.f32 %v7969_v42, %v4168_v32  ;;  %v8093_v39 = vadd.f32 %v3945_v35, %v8396_v6  ;;  %v4171_v25 = vadd.f32 %v4170_v1, %v8013_v40  ;;  %6482 = vmatprep.mubr.bf16.mxu1 %v4674_v56  ;;  %v3947_v59 = vpop.f32.mrb[239].mxu1  ;;  %v4172_v13 = vpop.f32.mrb[15].mxu0  ;;  %v8399_v56 = vld [vmem:[#allocation35_spill] sm:$0xff] }
 0x44a   : > { %v4559_v3 = vadd.f32 %v7969_v42, %v4171_v25  ;;  %v4622_v61 = vmax.f32 %v4558_v34, 0.0 }
 0x44c   : > { %v4623_v63 = vmax.f32 %v4559_v3, 0.0  ;;  %v8400_v3 = vld [vmem:[#allocation36_spill] sm:$0xff] }
 0x44d   : > { %v3950_v20 = vpop.f32.mrb[240].mxu1  ;;  %v4175_v0 = vpop.f32.mrb[16].mxu0 }
 0x44e   : > { %v4675_v31 = vpack.c.bf16 %v4623_v63, %v4622_v61  ;;  %v8098_v38 = vadd.f32 %v3950_v20, %v8397_v16  ;;  %v4176_v49 = vadd.f32 %v4175_v0, %v8018_v28  ;;  %v3952_v29 = vpop.f32.mrb[241].mxu1  ;;  %v4177_v7 = vpop.f32.mrb[17].mxu0 }
 0x44f   : > { %v3953_v51 = vpop.f32.mrb[242].mxu1  ;;  %v4178_v12 = vpop.f32.mrb[18].mxu0 }
 0x450   : > { %v4560_v40 = vadd.f32 %v7969_v42, %v4176_v49  ;;  %v8103_v33 = vadd.f32 %v3953_v51, %v8398_v18  ;;  %v4179_v19 = vadd.f32 %v4178_v12, %v8023_v17  ;;  %6483 = vmatmul.mubr.bf16.gmra.mrb[52].mxu1 %v4675_v31  ;;  %v3955_v9 = vpop.f32.mrb[243].mxu1  ;;  %v4180_v54 = vpop.f32.mrb[19].mxu0  ;;  %v8401_v51 = vld [vmem:[#allocation37_spill] sm:$0xff] }
 0x452   : > { %v4561_v55 = vadd.f32 %v7969_v42, %v4179_v19  ;;  %v4624_v32 = vmax.f32 %v4560_v40, 0.0 }
 0x454   : > { %v4625_v2 = vmax.f32 %v4561_v55, 0.0  ;;  %v8402_v55 = vld [vmem:[#allocation38_spill] sm:$0xff] }
 0x455   : > { %v3958_v58 = vpop.f32.mrb[244].mxu1  ;;  %v4183_v28 = vpop.f32.mrb[20].mxu0 }
 0x456   : > { %v8108_v35 = vadd.f32 %v3958_v58, %v8399_v56  ;;  %v4184_v1 = vadd.f32 %v4183_v28, %v8028_v8  ;;  %v3960_v34 = vpop.f32.mrb[245].mxu1  ;;  %v4185_v6 = vpop.f32.mrb[21].mxu0  ;;  %v4676_v25 = vpack.c.bf16 %v4625_v2, %v4624_v32 }
 0x457   : > { %v3961_v59 = vpop.f32.mrb[246].mxu1  ;;  %v4186_v13 = vpop.f32.mrb[22].mxu0 }
 0x458   : > { %v4562_v17 = vadd.f32 %v7969_v42, %v4184_v1  ;;  %v8113_v61 = vadd.f32 %v3961_v59, %v8400_v3  ;;  %v4187_v63 = vadd.f32 %v4186_v13, %v8033_v22  ;;  %6486 = vmatprep.mubr.bf16.mxu1 %v4676_v25  ;;  %v3963_v20 = vpop.f32.mrb[247].mxu1  ;;  %v4188_v0 = vpop.f32.mrb[23].mxu0  ;;  %v8403_v25 = vld [vmem:[#allocation39_spill] sm:$0xff] }
 0x45a   : > { %v4563_v31 = vadd.f32 %v7969_v42, %v4187_v63  ;;  %v4626_v16 = vmax.f32 %v4562_v17, 0.0 }
 0x45c   : > { %v4627_v49 = vmax.f32 %v4563_v31, 0.0 }
 0x45d   : > { %v3966_v8 = vpop.f32.mrb[248].mxu1  ;;  %v4191_v29 = vpop.f32.mrb[24].mxu0 }
 0x45e   : > { %v4677_v7 = vpack.c.bf16 %v4627_v49, %v4626_v16  ;;  %v8118_v12 = vadd.f32 %v3966_v8, %v8401_v51  ;;  %v4192_v40 = vadd.f32 %v4191_v29, %v8038_v43  ;;  %v3968_v18 = vpop.f32.mrb[249].mxu1  ;;  %v4193_v19 = vpop.f32.mrb[25].mxu0 }
 0x45f   : > { %v3969_v9 = vpop.f32.mrb[250].mxu1  ;;  %v4194_v54 = vpop.f32.mrb[26].mxu0 }
 0x460   : > { %v4564_v22 = vadd.f32 %v7969_v42, %v4192_v40  ;;  %v8123_v32 = vadd.f32 %v3969_v9, %v8402_v55  ;;  %v4195_v2 = vadd.f32 %v4194_v54, %v8043_v57  ;;  %6487 = vmatmul.mubr.bf16.gmra.mrb[56].mxu1 %v4677_v7  ;;  %v3971_v58 = vpop.f32.mrb[251].mxu1  ;;  %v4196_v28 = vpop.f32.mrb[27].mxu0 }
 0x462   : > { %v4565_v56 = vadd.f32 %v7969_v42, %v4195_v2  ;;  %v4628_v1 = vmax.f32 %v4564_v22, 0.0 }
 0x464   : > { %v4629_v34 = vmax.f32 %v4565_v56, 0.0 }
 0x465   : > { %v3974_v6 = vpop.f32.mrb[252].mxu1  ;;  %v4199_v43 = vpop.f32.mrb[28].mxu0 }
 0x466   : > { %v8128_v59 = vadd.f32 %v3974_v6, %v8403_v25  ;;  %v4200_v13 = vadd.f32 %v4199_v43, %v8048_v46  ;;  %v3976_v17 = vpop.f32.mrb[253].mxu1  ;;  %v4201_v3 = vpop.f32.mrb[29].mxu0  ;;  %v4678_v63 = vpack.c.bf16 %v4629_v34, %v4628_v1 }
 0x467   : > { %v3977_v20 = vpop.f32.mrb[254].mxu1  ;;  %v4202_v0 = vpop.f32.mrb[30].mxu0 }
 0x468   : > { %v4566_v57 = vadd.f32 %v7969_v42, %v4200_v13  ;;  %v8133_v31 = vadd.f32 %v3977_v20, %v7845_v41  ;;  %v4203_v16 = vadd.f32 %v4202_v0, %v8053_v37  ;;  %6490 = vmatprep.mubr.bf16.mxu1 %v4678_v63  ;;  %v3979_v49 = vpop.f32.mrb[255].mxu1  ;;  %v4204_v8 = vpop.f32.mrb[31].mxu0 }
 0x46a   : > { %v4567_v29 = vadd.f32 %v7969_v42, %v4203_v16  ;;  %v4630_v7 = vmax.f32 %v4566_v57, 0.0 }
 0x46c   : > { %v4631_v51 = vmax.f32 %v4567_v29, 0.0 }
 0x46d   : > { %v3982_v46 = vpop.f32.mrb[0].mxu1  ;;  %v4207_v40 = vpop.f32.mrb[32].mxu0 }
 0x46e   : > { %v4679_v18 = vpack.c.bf16 %v4631_v51, %v4630_v7  ;;  %v8138_v19 = vadd.f32 %v3982_v46, %v7855_v26  ;;  %v4208_v9 = vadd.f32 %v4207_v40, %v8058_v48  ;;  %v3984_v54 = vpop.f32.mrb[1].mxu1  ;;  %v4209_v41 = vpop.f32.mrb[33].mxu0 }
 0x46f   : > { %v3985_v22 = vpop.f32.mrb[2].mxu1  ;;  %v4210_v55 = vpop.f32.mrb[34].mxu0  ;;  %v8404_v54 = vld [vmem:[#allocation40_spill] sm:$0xff] }
 0x470   : > { %v4568_v37 = vadd.f32 %v7969_v42, %v4208_v9  ;;  %v8143_v2 = vadd.f32 %v3985_v22, %v7861_v45  ;;  %v4211_v58 = vadd.f32 %v4210_v55, %v8063_v21  ;;  %6491 = vmatmul.mubr.bf16.gmra.mrb[60].mxu1 %v4679_v18  ;;  %v3987_v28 = vpop.f32.mrb[3].mxu1  ;;  %v4212_v56 = vpop.f32.mrb[35].mxu0 }
 0x472   : > { %v4569_v1 = vadd.f32 %v7969_v42, %v4211_v58  ;;  %v4632_v26 = vmax.f32 %v4568_v37, 0.0 }
 0x474   : > { %v4633_v34 = vmax.f32 %v4569_v1, 0.0 }
 0x475   : > { %v3990_v6 = vpop.f32.mrb[4].mxu1  ;;  %v4215_v48 = vpop.f32.mrb[36].mxu0 }
 0x476   : > { %v8148_v43 = vadd.f32 %v3990_v6, %v7871_v5  ;;  %v4216_v25 = vadd.f32 %v4215_v48, %v8068_v14  ;;  %v3992_v13 = vpop.f32.mrb[5].mxu1  ;;  %v4217_v17 = vpop.f32.mrb[37].mxu0  ;;  %v4680_v45 = vpack.c.bf16 %v4633_v34, %v4632_v26 }
 0x477   : > { %v3993_v3 = vpop.f32.mrb[6].mxu1  ;;  %v4218_v63 = vpop.f32.mrb[38].mxu0 }
 0x478   : > { %v4570_v21 = vadd.f32 %v7969_v42, %v4216_v25  ;;  %v8153_v20 = vadd.f32 %v3993_v3, %v7877_v10  ;;  %v4219_v0 = vadd.f32 %v4218_v63, %v8073_v50  ;;  %6494 = vmatprep.mubr.bf16.mxu1 %v4680_v45  ;;  %v3995_v57 = vpop.f32.mrb[7].mxu1  ;;  %v4220_v16 = vpop.f32.mrb[39].mxu0 }
 0x47a   : > { %v4571_v5 = vadd.f32 %v7969_v42, %v4219_v0  ;;  %v4634_v49 = vmax.f32 %v4570_v21, 0.0 }
 0x47c   : > { %v4635_v8 = vmax.f32 %v4571_v5, 0.0 }
 0x47d   : > { %v3998_v14 = vpop.f32.mrb[8].mxu1  ;;  %v4223_v29 = vpop.f32.mrb[40].mxu0 }
 0x47e   : > { %v4681_v7 = vpack.c.bf16 %v4635_v8, %v4634_v49  ;;  %v8158_v51 = vadd.f32 %v3998_v14, %v7887_v52  ;;  %v4224_v46 = vadd.f32 %v4223_v29, %v8078_v23  ;;  %v4000_v40 = vpop.f32.mrb[9].mxu1  ;;  %v4225_v10 = vpop.f32.mrb[41].mxu0 }
 0x47f   : > { %v4001_v18 = vpop.f32.mrb[10].mxu1  ;;  %v4226_v9 = vpop.f32.mrb[42].mxu0 }
 0x480   : > { %v4572_v50 = vadd.f32 %v7969_v42, %v4224_v46  ;;  %v8163_v41 = vadd.f32 %v4001_v18, %v8404_v54  ;;  %v4227_v22 = vadd.f32 %v4226_v9, %v8083_v27  ;;  %6495 = vmatmul.mubr.bf16.gmra.mrb[64].mxu1 %v4681_v7  ;;  %v4003_v55 = vpop.f32.mrb[11].mxu1  ;;  %v4228_v37 = vpop.f32.mrb[43].mxu0 }
 0x482   : > { %v4573_v58 = vadd.f32 %v7969_v42, %v4227_v22  ;;  %v4636_v52 = vmax.f32 %v4572_v50, 0.0 }
 0x484   : > { %v4637_v28 = vmax.f32 %v4573_v58, 0.0 }
 0x485   : > { %v4006_v56 = vpop.f32.mrb[12].mxu1  ;;  %v4231_v23 = vpop.f32.mrb[44].mxu0 }
 0x486   : > { %v8168_v1 = vadd.f32 %v4006_v56, %v7903_v36  ;;  %v4232_v26 = vadd.f32 %v4231_v23, %v8088_v44  ;;  %v4008_v34 = vpop.f32.mrb[13].mxu1  ;;  %v4233_v6 = vpop.f32.mrb[45].mxu0  ;;  %v4682_v48 = vpack.c.bf16 %v4637_v28, %v4636_v52 }
 0x487   : > { %v4009_v25 = vpop.f32.mrb[14].mxu1  ;;  %v4234_v13 = vpop.f32.mrb[46].mxu0 }
 0x488   : > { %v4574_v27 = vadd.f32 %v7969_v42, %v4232_v26  ;;  %v8173_v17 = vadd.f32 %v4009_v25, %v7909_v15  ;;  %v4235_v45 = vadd.f32 %v4234_v13, %v8093_v39  ;;  %6498 = vmatprep.mubr.bf16.mxu1 %v4682_v48  ;;  %v4011_v3 = vpop.f32.mrb[15].mxu1  ;;  %v4236_v63 = vpop.f32.mrb[47].mxu0 }
 0x48a   : > { %v4575_v36 = vadd.f32 %v7969_v42, %v4235_v45  ;;  %v4638_v21 = vmax.f32 %v4574_v27, 0.0 }
 0x48c   : > { %v4639_v0 = vmax.f32 %v4575_v36, 0.0 }
 0x48d   : > { %v4014_v44 = vpop.f32.mrb[16].mxu1  ;;  %v4239_v57 = vpop.f32.mrb[48].mxu0 }
 0x48e   : > { %v4683_v16 = vpack.c.bf16 %v4639_v0, %v4638_v21  ;;  %v8178_v5 = vadd.f32 %v4014_v44, %v7917_v60  ;;  %v4240_v49 = vadd.f32 %v4239_v57, %v8098_v38  ;;  %v4016_v8 = vpop.f32.mrb[17].mxu1  ;;  %v4241_v15 = vpop.f32.mrb[49].mxu0 }
 0x48f   : > { %v4017_v14 = vpop.f32.mrb[18].mxu1  ;;  %v4242_v29 = vpop.f32.mrb[50].mxu0 }
 0x490   : > { %v4576_v39 = vadd.f32 %v7969_v42, %v4240_v49  ;;  %v8183_v7 = vadd.f32 %v4017_v14, %v7923_v24  ;;  %v4243_v46 = vadd.f32 %v4242_v29, %v8103_v33  ;;  %6499 = vmatmul.mubr.bf16.gmra.mrb[68].mxu1 %v4683_v16  ;;  %v4019_v40 = vpop.f32.mrb[19].mxu1  ;;  %v4244_v10 = vpop.f32.mrb[51].mxu0 }
 0x492   : > { %v4577_v18 = vadd.f32 %v7969_v42, %v4243_v46  ;;  %v4640_v60 = vmax.f32 %v4576_v39, 0.0 }
 0x494   : > { %v4641_v9 = vmax.f32 %v4577_v18, 0.0 }
 0x495   : > { %v4022_v50 = vpop.f32.mrb[20].mxu1  ;;  %v4247_v38 = vpop.f32.mrb[52].mxu0 }
 0x496   : > { %v8188_v54 = vadd.f32 %v4022_v50, %v7931_v11  ;;  %v4248_v22 = vadd.f32 %v4247_v38, %v8108_v35  ;;  %v4024_v55 = vpop.f32.mrb[21].mxu1  ;;  %v4249_v37 = vpop.f32.mrb[53].mxu0  ;;  %v4684_v24 = vpack.c.bf16 %v4641_v9, %v4640_v60 }
 0x497   : > { %v4025_v58 = vpop.f32.mrb[22].mxu1  ;;  %v4250_v52 = vpop.f32.mrb[54].mxu0 }
 0x498   : > { %v4578_v33 = vadd.f32 %v7969_v42, %v4248_v22  ;;  %v8193_v28 = vadd.f32 %v4025_v58, %v7937_v53  ;;  %v4251_v56 = vadd.f32 %v4250_v52, %v8113_v61  ;;  %6502 = vmatprep.mubr.bf16.mxu1 %v4684_v24  ;;  %v4027_v23 = vpop.f32.mrb[23].mxu1  ;;  %v4252_v26 = vpop.f32.mrb[55].mxu0 }
 0x49a   : > { %v4579_v11 = vadd.f32 %v7969_v42, %v4251_v56  ;;  %v4642_v34 = vmax.f32 %v4578_v33, 0.0 }
 0x49c   : > { %v4643_v6 = vmax.f32 %v4579_v11, 0.0 }
 0x49d   : > { %v4030_v35 = vpop.f32.mrb[24].mxu1  ;;  %v4255_v48 = vpop.f32.mrb[56].mxu0 }
 0x49e   : > { %v4685_v25 = vpack.c.bf16 %v4643_v6, %v4642_v34  ;;  %v8198_v13 = vadd.f32 %v4030_v35, %v7945_v4  ;;  %v4256_v27 = vadd.f32 %v4255_v48, %v8118_v12  ;;  %v4032_v45 = vpop.f32.mrb[25].mxu1  ;;  %v4257_v53 = vpop.f32.mrb[57].mxu0 }
 0x49f   : > { %v4033_v3 = vpop.f32.mrb[26].mxu1  ;;  %v4258_v63 = vpop.f32.mrb[58].mxu0 }
 0x4a0   : > { %v4580_v61 = vadd.f32 %v7969_v42, %v4256_v27  ;;  %v8203_v36 = vadd.f32 %v4033_v3, %v7951_v62  ;;  %v4259_v21 = vadd.f32 %v4258_v63, %v8123_v32  ;;  %6503 = vmatmul.mubr.bf16.gmra.mrb[72].mxu1 %v4685_v25  ;;  %v4035_v0 = vpop.f32.mrb[27].mxu1  ;;  %v4260_v44 = vpop.f32.mrb[59].mxu0 }
 0x4a2   : > { %v4581_v57 = vadd.f32 %v7969_v42, %v4259_v21  ;;  %v4644_v4 = vmax.f32 %v4580_v61, 0.0 }
 0x4a4   : > { %v4645_v16 = vmax.f32 %v4581_v57, 0.0 }
 0x4a5   : > { %v4038_v49 = vpop.f32.mrb[28].mxu1  ;;  %v4263_v12 = vpop.f32.mrb[60].mxu0 }
 0x4a6   : > { %v8208_v8 = vadd.f32 %v4038_v49, %v7959_v30  ;;  %v4264_v15 = vadd.f32 %v4263_v12, %v8128_v59  ;;  %v4040_v14 = vpop.f32.mrb[29].mxu1  ;;  %v4265_v29 = vpop.f32.mrb[61].mxu0  ;;  %v4686_v62 = vpack.c.bf16 %v4645_v16, %v4644_v4 }
 0x4a7   : > { %v4041_v39 = vpop.f32.mrb[30].mxu1  ;;  %v4266_v46 = vpop.f32.mrb[62].mxu0 }
 0x4a8   : > { %v4582_v32 = vadd.f32 %v7969_v42, %v4264_v15  ;;  %v8213_v40 = vadd.f32 %v4041_v39, %v7965_v47  ;;  %v4267_v10 = vadd.f32 %v4266_v46, %v8133_v31  ;;  %6506 = vmatprep.mubr.bf16.mxu1 %v4686_v62  ;;  %v4268_v18 = vpop.f32.mrb[63].mxu0  ;;  %v4043_v60 = vpop.f32.mrb[31].mxu1 }
 0x4aa   : > { %v4583_v30 = vadd.f32 %v7969_v42, %v4267_v10  ;;  %v4646_v9 = vmax.f32 %v4582_v32, 0.0 }
 0x4ac   : > { %v4647_v50 = vmax.f32 %v4583_v30, 0.0 }
 0x4ad   : > { %v4271_v59 = vpop.f32.mrb[64].mxu0 }
 0x4ae   : > { %v4687_v38 = vpack.c.bf16 %v4647_v50, %v4646_v9  ;;  %v4272_v22 = vadd.f32 %v4271_v59, %v8138_v19  ;;  %v4273_v55 = vpop.f32.mrb[65].mxu0 }
 0x4af   : > { %v4274_v37 = vpop.f32.mrb[66].mxu0 }
 0x4b0   : > { %v4584_v24 = vadd.f32 %v7969_v42, %v4272_v22  ;;  %v4275_v47 = vadd.f32 %v4274_v37, %v8143_v2  ;;  %6507 = vmatmul.mubr.bf16.gmra.mrb[76].mxu1 %v4687_v38  ;;  %v4276_v58 = vpop.f32.mrb[67].mxu0 }
 0x4b2   : > { %v4585_v31 = vadd.f32 %v7969_v42, %v4275_v47  ;;  %v4648_v52 = vmax.f32 %v4584_v24, 0.0 }
 0x4b4   : > { %v4649_v33 = vmax.f32 %v4585_v31, 0.0 }
 0x4b5   : > { %v4279_v56 = vpop.f32.mrb[68].mxu0 }
 0x4b6   : > { %v4280_v23 = vadd.f32 %v4279_v56, %v8148_v43  ;;  %v4281_v26 = vpop.f32.mrb[69].mxu0  ;;  %v4688_v11 = vpack.c.bf16 %v4649_v33, %v4648_v52 }
 0x4b7   : > { %v4282_v34 = vpop.f32.mrb[70].mxu0 }
 0x4b8   : > { %v4586_v19 = vadd.f32 %v7969_v42, %v4280_v23  ;;  %v4283_v6 = vadd.f32 %v4282_v34, %v8153_v20  ;;  %6510 = vmatprep.mubr.bf16.mxu1 %v4688_v11  ;;  %v4284_v35 = vpop.f32.mrb[71].mxu0 }
 0x4ba   : > { %v4587_v2 = vadd.f32 %v7969_v42, %v4283_v6  ;;  %v4650_v48 = vmax.f32 %v4586_v19, 0.0 }
 0x4bc   : > { %v4651_v25 = vmax.f32 %v4587_v2, 0.0 }
 0x4bd   : > { %v4287_v27 = vpop.f32.mrb[72].mxu0 }
 0x4be   : > { %v4689_v45 = vpack.c.bf16 %v4651_v25, %v4650_v48  ;;  %v4288_v53 = vadd.f32 %v4287_v27, %v8158_v51  ;;  %v4289_v3 = vpop.f32.mrb[73].mxu0 }
 0x4bf   : > { %v4290_v63 = vpop.f32.mrb[74].mxu0 }
 0x4c0   : > { %v4588_v43 = vadd.f32 %v7969_v42, %v4288_v53  ;;  %v4291_v61 = vadd.f32 %v4290_v63, %v8163_v41  ;;  %6511 = vmatmul.mubr.bf16.gmra.mrb[80].mxu1 %v4689_v45  ;;  %v4292_v21 = vpop.f32.mrb[75].mxu0 }
 0x4c2   : > { %v4589_v20 = vadd.f32 %v7969_v42, %v4291_v61  ;;  %v4652_v0 = vmax.f32 %v4588_v43, 0.0 }
 0x4c4   : > { %v4653_v44 = vmax.f32 %v4589_v20, 0.0 }
 0x4c5   : > { %v4295_v57 = vpop.f32.mrb[76].mxu0 }
 0x4c6   : > { %v4296_v4 = vadd.f32 %v4295_v57, %v8168_v1  ;;  %v4297_v16 = vpop.f32.mrb[77].mxu0  ;;  %v4690_v49 = vpack.c.bf16 %v4653_v44, %v4652_v0 }
 0x4c7   : > { %v4298_v12 = vpop.f32.mrb[78].mxu0 }
 0x4c8   : > { %v4590_v51 = vadd.f32 %v7969_v42, %v4296_v4  ;;  %v4299_v15 = vadd.f32 %v4298_v12, %v8173_v17  ;;  %6514 = vmatprep.mubr.bf16.mxu1 %v4690_v49  ;;  %v4300_v14 = vpop.f32.mrb[79].mxu0 }
 0x4ca   : > { %v4591_v41 = vadd.f32 %v7969_v42, %v4299_v15  ;;  %v4654_v29 = vmax.f32 %v4590_v51, 0.0 }
 0x4cc   : > { %v4655_v62 = vmax.f32 %v4591_v41, 0.0 }
 0x4cd   : > { %v4303_v39 = vpop.f32.mrb[80].mxu0 }
 0x4ce   : > { %v4691_v46 = vpack.c.bf16 %v4655_v62, %v4654_v29  ;;  %v4304_v32 = vadd.f32 %v4303_v39, %v8178_v5  ;;  %v4305_v10 = vpop.f32.mrb[81].mxu0 }
 0x4cf   : > { %v4306_v1 = vpop.f32.mrb[82].mxu0 }
 0x4d0   : > { %v4592_v18 = vadd.f32 %v7969_v42, %v4304_v32  ;;  %v4307_v60 = vadd.f32 %v4306_v1, %v8183_v7  ;;  %6515 = vmatmul.mubr.bf16.gmra.mrb[84].mxu1 %v4691_v46  ;;  %v4308_v30 = vpop.f32.mrb[83].mxu0  ;;  %v6732_v7 = vld [vmem:[#allocation9] ss:$0 sm:$0xff] }
 0x4d2   : > { %v4593_v17 = vadd.f32 %v7969_v42, %v4307_v60  ;;  %v4656_v50 = vmax.f32 %v4592_v18, 0.0 }
 0x4d3   : > { %v6464_v9 = vpop.f32.mrb[32].mxu1 }
 0x4d4   : > { %v4657_v59 = vmax.f32 %v4593_v17, 0.0  ;;  %v4794_v38 = vpop.f32.mrb[33].mxu1 }
 0x4d5   : > { %v4311_v22 = vpop.f32.mrb[84].mxu0  ;;  %v6465_v55 = vpop.f32.mrb[34].mxu1 }
 0x4d6   : > { %v4312_v37 = vadd.f32 %v4311_v22, %v8188_v54  ;;  %v6007_v5 = vpack.c.bf16 %v6465_v55, %v6464_v9  ;;  %v4313_v24 = vpop.f32.mrb[85].mxu0  ;;  %v4797_v47 = vpop.f32.mrb[35].mxu1  ;;  %v4692_v58 = vpack.c.bf16 %v4657_v59, %v4656_v50 }
 0x4d7   : > { %v6002_v31 = vpack.c.bf16 %v4797_v47, %v4794_v38  ;;  %v4314_v52 = vpop.f32.mrb[86].mxu0 }
 0x4d8   : > { %v4594_v33 = vadd.f32 %v6732_v7, %v4312_v37  ;;  %6159 = vst [vmem:[%s8239_s28 + $0x8] sm:$0xff] %v6007_v5   ;;  %v4315_v42 = vadd.f32 %v4314_v52, %v8193_v28  ;;  %6518 = vmatprep.mubr.bf16.mxu1 %v4692_v58  ;;  %v4316_v56 = vpop.f32.mrb[87].mxu0 }
 0x4d9   : > { %6003 = vst [vmem:[%s8239_s28] sm:$0xff] %v6002_v31  }
 0x4da   : > { %v4595_v23 = vadd.f32 %v6732_v7, %v4315_v42  ;;  %v4658_v54 = vmax.f32 %v4594_v33, 0.0 }
 0x4dc   : > { %v4659_v26 = vmax.f32 %v4595_v23, 0.0 }
 0x4dd   : > { %v4319_v11 = vpop.f32.mrb[88].mxu0 }
 0x4de   : > { %v4693_v34 = vpack.c.bf16 %v4659_v26, %v4658_v54  ;;  %v4320_v19 = vadd.f32 %v4319_v11, %v8198_v13  ;;  %v4321_v6 = vpop.f32.mrb[89].mxu0 }
 0x4df   : > { %v4322_v35 = vpop.f32.mrb[90].mxu0 }
 0x4e0   : > { %v4596_v2 = vadd.f32 %v6732_v7, %v4320_v19  ;;  %v4323_v48 = vadd.f32 %v4322_v35, %v8203_v36  ;;  %6519 = vmatmul.mubr.bf16.gmra.mrb[88].mxu1 %v4693_v34  ;;  %v4324_v25 = vpop.f32.mrb[91].mxu0 }
 0x4e2   : > { %v4597_v27 = vadd.f32 %v6732_v7, %v4323_v48  ;;  %v4660_v45 = vmax.f32 %v4596_v2, 0.0 }
 0x4e3   : > { %v6468_v28 = vpop.f32.mrb[36].mxu1 }
 0x4e4   : > { %v4661_v53 = vmax.f32 %v4597_v27, 0.0  ;;  %v4810_v3 = vpop.f32.mrb[37].mxu1 }
 0x4e5   : > { %v4327_v63 = vpop.f32.mrb[92].mxu0  ;;  %v6469_v43 = vpop.f32.mrb[38].mxu1 }
 0x4e6   : > { %v4328_v61 = vadd.f32 %v4327_v63, %v8208_v8  ;;  %v6017_v21 = vpack.c.bf16 %v6469_v43, %v6468_v28  ;;  %v4329_v13 = vpop.f32.mrb[93].mxu0  ;;  %v4813_v20 = vpop.f32.mrb[39].mxu1  ;;  %v4694_v0 = vpack.c.bf16 %v4661_v53, %v4660_v45 }
 0x4e7   : > { %v6012_v44 = vpack.c.bf16 %v4813_v20, %v4810_v3  ;;  %v4330_v57 = vpop.f32.mrb[94].mxu0 }
 0x4e8   : > { %v4598_v36 = vadd.f32 %v6732_v7, %v4328_v61  ;;  %6161 = vst [vmem:[%s8239_s28 + $0x18] sm:$0xff] %v6017_v21   ;;  %v4331_v4 = vadd.f32 %v4330_v57, %v8213_v40  ;;  %6522 = vmatprep.mubr.bf16.mxu1 %v4694_v0  ;;  %v4332_v16 = vpop.f32.mrb[95].mxu0 }
 0x4e9   : > { %6160 = vst [vmem:[%s8239_s28 + $0x10] sm:$0xff] %v6012_v44  }
 0x4ea   : > { %v4599_v49 = vadd.f32 %v6732_v7, %v4331_v4  ;;  %v4662_v12 = vmax.f32 %v4598_v36, 0.0 }
 0x4ec   : > { %v4663_v51 = vmax.f32 %v4599_v49, 0.0 }
 0x4ee   : > { %v4695_v15 = vpack.c.bf16 %v4663_v51, %v4662_v12 }
 0x4f0   : > { %6523 = vmatmul.mubr.bf16.gmra.mrb[92].mxu1 %v4695_v15 }
 0x4f3   : > { %v6472_v8 = vpop.f32.mrb[40].mxu1 }
 0x4f4   : > { %v4826_v14 = vpop.f32.mrb[41].mxu1 }
 0x4f5   : > { %v6473_v41 = vpop.f32.mrb[42].mxu1 }
 0x4f6   : > { %v6027_v29 = vpack.c.bf16 %v6473_v41, %v6472_v8  ;;  %v4829_v62 = vpop.f32.mrb[43].mxu1 }
 0x4f7   : > { %v6022_v39 = vpack.c.bf16 %v4829_v62, %v4826_v14 }
 0x4f8   : > { %6163 = vst [vmem:[%s8239_s28 + $0x28] sm:$0xff] %v6027_v29  }
 0x4f9   : > { %6162 = vst [vmem:[%s8239_s28 + $0x20] sm:$0xff] %v6022_v39  }
 0x503   : > { %v6476_v40 = vpop.f32.mrb[44].mxu1 }
 0x504   : > { %v4842_v46 = vpop.f32.mrb[45].mxu1 }
 0x505   : > { %v6477_v32 = vpop.f32.mrb[46].mxu1 }
 0x506   : > { %v6037_v10 = vpack.c.bf16 %v6477_v32, %v6476_v40  ;;  %v4845_v1 = vpop.f32.mrb[47].mxu1 }
 0x507   : > { %v6032_v18 = vpack.c.bf16 %v4845_v1, %v4842_v46 }
 0x508   : > { %6165 = vst [vmem:[%s8239_s28 + $0x38] sm:$0xff] %v6037_v10  }
 0x509   : > { %6164 = vst [vmem:[%s8239_s28 + $0x30] sm:$0xff] %v6032_v18  }
 0x513   : > { %v6480_v60 = vpop.f32.mrb[48].mxu1 }
 0x514   : > { %v4858_v30 = vpop.f32.mrb[49].mxu1 }
 0x515   : > { %v6481_v17 = vpop.f32.mrb[50].mxu1 }
 0x516   : > { %v6047_v9 = vpack.c.bf16 %v6481_v17, %v6480_v60  ;;  %v4861_v50 = vpop.f32.mrb[51].mxu1 }
 0x517   : > { %v6042_v59 = vpack.c.bf16 %v4861_v50, %v4858_v30 }
 0x518   : > { %6167 = vst [vmem:[%s8239_s28 + $0x48] sm:$0xff] %v6047_v9  }
 0x519   : > { %6166 = vst [vmem:[%s8239_s28 + $0x40] sm:$0xff] %v6042_v59  }
 0x523   : > { %v6484_v38 = vpop.f32.mrb[52].mxu1 }
 0x524   : > { %v4874_v22 = vpop.f32.mrb[53].mxu1 }
 0x525   : > { %v6485_v55 = vpop.f32.mrb[54].mxu1 }
 0x526   : > { %v6057_v37 = vpack.c.bf16 %v6485_v55, %v6484_v38  ;;  %v4877_v5 = vpop.f32.mrb[55].mxu1 }
 0x527   : > { %v6052_v24 = vpack.c.bf16 %v4877_v5, %v4874_v22 }
 0x528   : > { %6169 = vst [vmem:[%s8239_s28 + $0x58] sm:$0xff] %v6057_v37  }
 0x529   : > { %6168 = vst [vmem:[%s8239_s28 + $0x50] sm:$0xff] %v6052_v24  }
 0x533   : > { %v6488_v47 = vpop.f32.mrb[56].mxu1 }
 0x534   : > { %v4890_v58 = vpop.f32.mrb[57].mxu1 }
 0x535   : > { %v6489_v31 = vpop.f32.mrb[58].mxu1 }
 0x536   : > { %v6067_v52 = vpack.c.bf16 %v6489_v31, %v6488_v47  ;;  %v4893_v7 = vpop.f32.mrb[59].mxu1 }
 0x537   : > { %v6062_v33 = vpack.c.bf16 %v4893_v7, %v4890_v58 }
 0x538   : > { %6171 = vst [vmem:[%s8239_s28 + $0x68] sm:$0xff] %v6067_v52  }
 0x539   : > { %6170 = vst [vmem:[%s8239_s28 + $0x60] sm:$0xff] %v6062_v33  }
 0x543   : > { %v6492_v42 = vpop.f32.mrb[60].mxu1 }
 0x544   : > { %v4906_v56 = vpop.f32.mrb[61].mxu1 }
 0x545   : > { %v6493_v23 = vpop.f32.mrb[62].mxu1 }
 0x546   : > { %v6077_v54 = vpack.c.bf16 %v6493_v23, %v6492_v42  ;;  %v4909_v26 = vpop.f32.mrb[63].mxu1 }
 0x547   : > { %v6072_v11 = vpack.c.bf16 %v4909_v26, %v4906_v56 }
 0x548   : > { %6173 = vst [vmem:[%s8239_s28 + $0x78] sm:$0xff] %v6077_v54  }
 0x549   : > { %6172 = vst [vmem:[%s8239_s28 + $0x70] sm:$0xff] %v6072_v11  }
 0x553   : > { %v6496_v34 = vpop.f32.mrb[64].mxu1 }
 0x554   : > { %v4922_v19 = vpop.f32.mrb[65].mxu1 }
 0x555   : > { %v6497_v6 = vpop.f32.mrb[66].mxu1 }
 0x556   : > { %v6087_v35 = vpack.c.bf16 %v6497_v6, %v6496_v34  ;;  %v4925_v2 = vpop.f32.mrb[67].mxu1 }
 0x557   : > { %v6082_v48 = vpack.c.bf16 %v4925_v2, %v4922_v19 }
 0x558   : > { %6175 = vst [vmem:[%s8239_s28 + $0x88] sm:$0xff] %v6087_v35  }
 0x559   : > { %6174 = vst [vmem:[%s8239_s28 + $0x80] sm:$0xff] %v6082_v48  }
 0x563   : > { %v6500_v25 = vpop.f32.mrb[68].mxu1 }
 0x564   : > { %v4938_v27 = vpop.f32.mrb[69].mxu1 }
 0x565   : > { %v6501_v28 = vpop.f32.mrb[70].mxu1 }
 0x566   : > { %v6097_v45 = vpack.c.bf16 %v6501_v28, %v6500_v25  ;;  %v4941_v53 = vpop.f32.mrb[71].mxu1 }
 0x567   : > { %v6092_v3 = vpack.c.bf16 %v4941_v53, %v4938_v27 }
 0x568   : > { %6177 = vst [vmem:[%s8239_s28 + $0x98] sm:$0xff] %v6097_v45  }
 0x569   : > { %6176 = vst [vmem:[%s8239_s28 + $0x90] sm:$0xff] %v6092_v3  }
 0x573   : > { %v6504_v63 = vpop.f32.mrb[72].mxu1 }
 0x574   : > { %v4954_v43 = vpop.f32.mrb[73].mxu1 }
 0x575   : > { %v6505_v61 = vpop.f32.mrb[74].mxu1 }
 0x576   : > { %v6107_v21 = vpack.c.bf16 %v6505_v61, %v6504_v63  ;;  %v4957_v13 = vpop.f32.mrb[75].mxu1 }
 0x577   : > { %v6102_v20 = vpack.c.bf16 %v4957_v13, %v4954_v43 }
 0x578   : > { %6179 = vst [vmem:[%s8239_s28 + $0xa8] sm:$0xff] %v6107_v21  }
 0x579   : > { %6178 = vst [vmem:[%s8239_s28 + $0xa0] sm:$0xff] %v6102_v20  }
 0x583   : > { %v6508_v0 = vpop.f32.mrb[76].mxu1 }
 0x584   : > { %v4970_v44 = vpop.f32.mrb[77].mxu1 }
 0x585   : > { %v6509_v57 = vpop.f32.mrb[78].mxu1 }
 0x586   : > { %v6117_v36 = vpack.c.bf16 %v6509_v57, %v6508_v0  ;;  %v4973_v4 = vpop.f32.mrb[79].mxu1 }
 0x587   : > { %v6112_v16 = vpack.c.bf16 %v4973_v4, %v4970_v44 }
 0x588   : > { %6181 = vst [vmem:[%s8239_s28 + $0xb8] sm:$0xff] %v6117_v36  }
 0x589   : > { %6180 = vst [vmem:[%s8239_s28 + $0xb0] sm:$0xff] %v6112_v16  }
 0x593   : > { %v6512_v49 = vpop.f32.mrb[80].mxu1 }
 0x594   : > { %v4986_v12 = vpop.f32.mrb[81].mxu1 }
 0x595   : > { %v6513_v51 = vpop.f32.mrb[82].mxu1 }
 0x596   : > { %v6127_v15 = vpack.c.bf16 %v6513_v51, %v6512_v49  ;;  %v4989_v8 = vpop.f32.mrb[83].mxu1 }
 0x597   : > { %v6122_v14 = vpack.c.bf16 %v4989_v8, %v4986_v12 }
 0x598   : > { %6183 = vst [vmem:[%s8239_s28 + $0xc8] sm:$0xff] %v6127_v15  }
 0x599   : > { %6182 = vst [vmem:[%s8239_s28 + $0xc0] sm:$0xff] %v6122_v14  }
 0x5a3   : > { %v6516_v41 = vpop.f32.mrb[84].mxu1 }
 0x5a4   : > { %v5002_v29 = vpop.f32.mrb[85].mxu1 }
 0x5a5   : > { %v6517_v62 = vpop.f32.mrb[86].mxu1 }
 0x5a6   : > { %v6137_v39 = vpack.c.bf16 %v6517_v62, %v6516_v41  ;;  %v5005_v40 = vpop.f32.mrb[87].mxu1 }
 0x5a7   : > { %v6132_v46 = vpack.c.bf16 %v5005_v40, %v5002_v29 }
 0x5a8   : > { %6185 = vst [vmem:[%s8239_s28 + $0xd8] sm:$0xff] %v6137_v39  }
 0x5a9   : > { %6184 = vst [vmem:[%s8239_s28 + $0xd0] sm:$0xff] %v6132_v46  }
 0x5b3   : > { %v6520_v32 = vpop.f32.mrb[88].mxu1 }
 0x5b4   : > { %v5018_v10 = vpop.f32.mrb[89].mxu1 }
 0x5b5   : > { %v6521_v1 = vpop.f32.mrb[90].mxu1 }
 0x5b6   : > { %v6147_v18 = vpack.c.bf16 %v6521_v1, %v6520_v32  ;;  %v5021_v60 = vpop.f32.mrb[91].mxu1 }
 0x5b7   : > { %v6142_v30 = vpack.c.bf16 %v5021_v60, %v5018_v10 }
 0x5b8   : > { %6187 = vst [vmem:[%s8239_s28 + $0xe8] sm:$0xff] %v6147_v18  }
 0x5b9   : > { %6186 = vst [vmem:[%s8239_s28 + $0xe0] sm:$0xff] %v6142_v30  }
 0x5c3   : > { %v6524_v17 = vpop.f32.mrb[92].mxu1 }
 0x5c4   : > { %v5034_v9 = vpop.f32.mrb[93].mxu1 }
 0x5c5   : > { %v6525_v50 = vpop.f32.mrb[94].mxu1 }
 0x5c6   : > { %v6157_v59 = vpack.c.bf16 %v6525_v50, %v6524_v17  ;;  %v5037_v38 = vpop.f32.mrb[95].mxu1 }
 0x5c7   : > { %v6152_v22 = vpack.c.bf16 %v5037_v38, %v5034_v9 }
 0x5c8   : > { %6189 = vst [vmem:[%s8239_s28 + $0xf8] sm:$0xff] %v6157_v59  }
 0x5c9   : > { %6188 = vst [vmem:[%s8239_s28 + $0xf0] sm:$0xff] %v6152_v22  }
 0x5ca   : > { %6888 = shalt.err (!%p6885_p0)
}
 0x5cb   : > { %s6889_s10 = scalar_lea.hbm %s8281_s12, 4096  ;;  %s6893_s11 = scalar_lea.hbm %s8339_s5, 8192 }
 0x5cc   : > { %p6890_p4 = scmp.ne.s32.totalorder %s8281_s12, %s6889_s10  ;;  %p6894_p12 = scmp.lt.u32.totalorder %s8281_s12, %s8339_s5 }
 0x5cd   : > { %p6895_p1 = scmp.lt.u32.totalorder %s6893_s11, %s6889_s10  ;;  %p6897_p8 = scmp.lt.u32.totalorder %s6889_s10, %s8281_s12 }
 0x5ce   : > { %p6891_p13 = pnand %p6890_p4, %p7192_p5 }
 0x5cf   : > { %p6896_p11 = por %p6895_p1, %p6894_p12 }
 0x5d0   : > { %p6892_p2 = pneg %p6891_p13 }
 0x5d1   : > { %p6898_p6 = por %p6897_p8, %p6896_p11 }
 0x5d3   : > { %p6899_p10 = pnand %p6898_p6, %p6892_p2 }
 0x5d5   : > { %6902 = shalt.err (!%p6899_p10)
}
 0x5d6   : > { %s6978_s28 = smov 64   ;;  %s6979_s30 = smov 4  }
 0x5d7   : > { %6560 = dma.vmem_to_hbm [thread:$0]  (%p7192_p5), %s8283_s9, 4096, %s8281_s12, %s5370_s17, %s6978_s28, %s6978_s28, %s6979_s30  }
 0x5d8 PF: > { %s8405_s7 = sld [smem:[#allocation17_spill]]  ;;  %s8406_s14 = sld [smem:[#allocation18_spill]] }
 0x5d9   : > { %p8408_p7 = scmp.ge.s32.totalorder %s6965_s23, 2 }
 0x5de   : > { %s5398_s21 = sand.u32 1, %s8405_s7   ;;  %p8407_p3 = scmp.ne.s32.totalorder %s8406_s14, 0 }
 0x5df   : > { %s5399_s25 = scalar_lea.sflag [#allocation5], %s5398_s21 }
 0x5e0   : > { %p6580_p9 = pnand %p8408_p7, %p8407_p3 }
 0x5e2   : > { %6940 = dma.done.wait (!%p6580_p9), %s5399_s25, 4096  }
 0x5e3   : > { %6942 = vsyncadd (!%p6580_p9), %s5399_s25, 4294963200  ;;  %s23_s23 = sadd.s32 1, %s6965_s23   ;;  %s8409_s18 = smov %s6949_s19 }
 0x5e4   : > { %p20_p0 = scmp.ge.s32.totalorder %s23_s23, 4   ;;  %s8410_s19 = smov %s6953_s20 }
 0x5e5   : > { %s8411_s20 = smov %s7201_s15  ;;  %s8412_s21 = smov %s6961_s22 }
 0x5e6   : > { %s8413_s22 = smov %s8415_s24  ;;  %22 = sbr.rel (!%p20_p0) target bundleno = 8 (0x8), region = 110 }
 0x5ed   :  { %5404 = vsyncpa [#allocation4], 1 }
 0x5ee   :  { %5406 = vsyncpa [#allocation4 + $0x1], 1 }
 0x5ef   :  { %5407 = vsyncpa [#allocation7], 1 }
 0x5f0   :  { %5408 = vsyncpa [#allocation10], 1 }
 0x5f1   :  { %5409 = vsyncpa [#allocation5], 1 }
 0x5f2   :  { %5411 = vsyncpa [#allocation5 + $0x1], 1 }

</bundles_post_ra>
